<compile_context>
chip_gen: v6e
topology: v6e:2x2x1
jax: 0.10.0
libtpu: 0.0.40
codegen_flags: <defaults>
</compile_context>

<pallas_src>
import functools
import math

import jax
import jax.numpy as jnp
from jax.experimental import pallas as pl
from jax.experimental.pallas import tpu as pltpu


def _round_up(x, m):
    return ((x + m - 1) // m) * m


def _pick_tile(m, target=256):
    """Largest tile <= target that divides m (multiple of 8, or full m)."""
    t = math.gcd(m, min(target, m))
    if t % 8 != 0 and t != m:
        t = m
    return t


# --------------------------------------------------------------------------
# Fused conv(3x3, s=2, p=1) + bias + ReLU + encoder 1x1 projection + ReLU
# One row-batched matmul (M = TM output pixels, K = 9*Cin) per grid step.
# --------------------------------------------------------------------------
def _conv_stage_kernel(p_ref, w_ref, b_ref, wp_ref, bp_ref, feat_ref, proj_ref):
    x = p_ref[0]                                                    # (TM, Kp) bf16
    y = jnp.dot(x, w_ref[...], preferred_element_type=jnp.float32) + b_ref[...]
    y = jnp.maximum(y, 0.0)                                         # conv + ReLU
    feat_ref[0] = y.astype(feat_ref.dtype)                          # (TM, Cout)

    z = jnp.dot(y.astype(jnp.bfloat16), wp_ref[...],
                preferred_element_type=jnp.float32) + bp_ref[...]   # encoder proj
    z = jnp.maximum(z, 0.0)
    proj_ref[0] = z.astype(proj_ref.dtype)                          # (TM, Hd)


def _im2col_s2(x):
    """x: (B, H, W, C) -> (B, Ho, Wo, 9*C) patches, PyTorch k=3/s=2/p=1 semantics."""
    B, H, W, C = x.shape
    Ho, Wo = H // 2, W // 2
    xp = jnp.pad(x, ((0, 0), (1, 1), (1, 1), (0, 0)))
    taps = [xp[:, i:i + 2 * Ho:2, j:j + 2 * Wo:2, :]
            for i in range(3) for j in range(3)]
    return jnp.concatenate(taps, axis=-1)


def conv_stage(x, stage):
    """x: (B, H, W, Cin) -> (feat (B, Ho*Wo, Cout) bf16, proj (B, Ho*Wo, Hd) bf16)."""
    # TODO(synk): do the stride-2 tap selection in-kernel (pl.ds stride) to avoid
    # the im2col HBM copy; kept in the wrapper for robustness.
    B, H, W, _ = x.shape
    Ho, Wo = H // 2, W // 2
    Kp, Cout = stage["w"].shape
    Hd = stage["wproj"].shape[1]

    patches = _im2col_s2(x.astype(jnp.bfloat16))                    # (B, Ho, Wo, K9)
    K9 = patches.shape[-1]
    if K9 != Kp:
        patches = jnp.pad(patches, ((0, 0), (0, 0), (0, 0), (0, Kp - K9)))
    M = Ho * Wo
    patches = patches.reshape(B, M, Kp)

    tm = _pick_tile(M, 256)
    grid = (B, M // tm)

    feat, proj = pl.pallas_call(
        _conv_stage_kernel,
        out_shape=(jax.ShapeDtypeStruct((B, M, Cout), jnp.bfloat16),
                   jax.ShapeDtypeStruct((B, M, Hd), jnp.bfloat16)),
        grid=grid,
        in_specs=[
            pl.BlockSpec((1, tm, Kp), lambda n, m: (n, m, 0)),
            pl.BlockSpec((Kp, Cout), lambda n, m: (0, 0)),
            pl.BlockSpec((1, Cout), lambda n, m: (0, 0)),
            pl.BlockSpec((Cout, Hd), lambda n, m: (0, 0)),
            pl.BlockSpec((1, Hd), lambda n, m: (0, 0)),
        ],
        out_specs=(pl.BlockSpec((1, tm, Cout), lambda n, m: (n, m, 0)),
                   pl.BlockSpec((1, tm, Hd), lambda n, m: (n, m, 0))),
        compiler_params=pltpu.CompilerParams(
            dimension_semantics=("parallel", "parallel"),
            vmem_limit_bytes=32 * 1024 * 1024,
        ),
    )(patches, stage["w"], stage["b"], stage["wproj"], stage["bproj"])
    return feat, proj


def backbone_encoder_forward(x, packed):
    """Backbone stages with the encoder 1x1 projection fused into each conv epilogue."""
    projs = []
    h = x
    for stage in packed["stages"]:
        B, H, W, _ = h.shape
        feat, proj = conv_stage(h, stage)
        h = feat.reshape(B, H // 2, W // 2, -1)     # input to next stage
        projs.append(proj)                          # flat (B, Ho*Wo, Hd) memory
    return projs


# --------------------------------------------------------------------------
# Fused decoder kernel, S-tiled (flash-style online softmax over memory blocks)
# --------------------------------------------------------------------------
def _decoder_kernel(mem_ref, qemb_ref, wq_ref, bq_ref, wk_ref, bk_ref,
                    wv_ref, bv_ref, wff_ref, bff_ref, whead_ref, bhead_ref,
                    o_ref, q_sc, m_sc, l_sc, acc_sc, *, S, TS, nc):
    kv = pl.program_id(1)
    D = q_sc.shape[1]

    @pl.when(kv == 0)
    def _init():
        scale = 1.0 / jnp.sqrt(jnp.float32(D))
        q = jnp.dot(qemb_ref[...], wq_ref[...],
                    preferred_element_type=jnp.float32) + bq_ref[...]
        q_sc[...] = (q * scale).astype(q_sc.dtype)           # pre-scaled query
        m_sc[...] = jnp.full_like(m_sc[...], -1e30)
        l_sc[...] = jnp.zeros_like(l_sc[...])
        acc_sc[...] = jnp.zeros_like(acc_sc[...])

    mem = mem_ref[0]                                          # (TS, D) bf16
    k = (jnp.dot(mem, wk_ref[...], preferred_element_type=jnp.float32)
         + bk_ref[...]).astype(jnp.bfloat16)                  # (TS, D)
    v = (jnp.dot(mem, wv_ref[...], preferred_element_type=jnp.float32)
         + bv_ref[...]).astype(jnp.bfloat16)                  # (TS, D)

    # NT matmul: contract the shared D axis directly (no k.T transpose).
    s = jax.lax.dot_general(q_sc[...], k,
                            dimension_numbers=(((1,), (1,)), ((), ())),
                            preferred_element_type=jnp.float32)      # (nq, TS)
    col = jax.lax.broadcasted_iota(jnp.int32, s.shape, 1) + kv * TS
    s = jnp.where(col < S, s, -1e30)                          # mask padded memory

    m_new = jnp.maximum(m_sc[...], jnp.max(s, axis=-1, keepdims=True))
    alpha = jnp.exp(m_sc[...] - m_new)
    p = jnp.exp(s - m_new)
    l_sc[...] = alpha * l_sc[...] + jnp.sum(p, axis=-1, keepdims=True)
    acc_sc[...] = alpha * acc_sc[...] + jnp.dot(p.astype(jnp.bfloat16), v,
                                                preferred_element_type=jnp.float32)
    m_sc[...] = m_new

    @pl.when(kv == pl.num_programs(1) - 1)
    def _finalize():
        attn = acc_sc[...] * pl.reciprocal(l_sc[...], approx=True)    # (nq, D)
        h = jnp.dot(attn.astype(jnp.bfloat16), wff_ref[...],
                    preferred_element_type=jnp.float32) + bff_ref[...]
        h = jnp.maximum(h, 0.0)
        head = jnp.dot(h.astype(jnp.bfloat16), whead_ref[...],
                       preferred_element_type=jnp.float32) + bhead_ref[...]
        hcol = jax.lax.broadcasted_iota(jnp.int32, head.shape, 1)
        head = jnp.where((hcol >= nc) & (hcol < nc + 4),
                         jax.nn.sigmoid(head), head)                  # box lanes
        o_ref[0] = head.astype(o_ref.dtype)


def decoder_forward(feats, dec, targets=None):
    """Query-based decoder over flattened multi-scale memory (eval path)."""
    del targets  # eval path: targets unused
    B = feats[0].shape[0]
    nq, D = dec["qemb"].shape
    nc = dec["num_classes"]
    HP = dec["whead"].shape[1]

    mem = jnp.concatenate(feats, axis=1).astype(jnp.bfloat16)         # (B, S, D)
    S = mem.shape[1]
    TS = 512 if S >= 512 else max(128, _round_up(S, 128))
    Sp = _round_up(S, TS)
    if Sp != S:
        mem = jnp.pad(mem, ((0, 0), (0, Sp - S), (0, 0)))
    n_kv = Sp // TS

    out = pl.pallas_call(
        functools.partial(_decoder_kernel, S=S, TS=TS, nc=nc),
        out_shape=jax.ShapeDtypeStruct((B, nq, HP), jnp.float32),
        grid=(B, n_kv),
        in_specs=[
            pl.BlockSpec((1, TS, D), lambda b, k: (b, k, 0)),
            pl.BlockSpec((nq, D), lambda b, k: (0, 0)),
            pl.BlockSpec((D, D), lambda b, k: (0, 0)),   # wq
            pl.BlockSpec((1, D), lambda b, k: (0, 0)),   # bq
            pl.BlockSpec((D, D), lambda b, k: (0, 0)),   # wk
            pl.BlockSpec((1, D), lambda b, k: (0, 0)),   # bk
            pl.BlockSpec((D, D), lambda b, k: (0, 0)),   # wv
            pl.BlockSpec((1, D), lambda b, k: (0, 0)),   # bv
            pl.BlockSpec((D, D), lambda b, k: (0, 0)),   # wff
            pl.BlockSpec((1, D), lambda b, k: (0, 0)),   # bff
            pl.BlockSpec((D, HP), lambda b, k: (0, 0)),  # whead (cls|box, padded)
            pl.BlockSpec((1, HP), lambda b, k: (0, 0)),  # bhead
        ],
        out_specs=pl.BlockSpec((1, nq, HP), lambda b, k: (b, 0, 0)),
        scratch_shapes=[
            pltpu.VMEM((nq, D), jnp.bfloat16),   # pre-scaled q
            pltpu.VMEM((nq, 1), jnp.float32),    # running max m
            pltpu.VMEM((nq, 1), jnp.float32),    # running denom l
            pltpu.VMEM((nq, D), jnp.float32),    # running numerator acc
        ],
        compiler_params=pltpu.CompilerParams(
            dimension_semantics=("parallel", "arbitrary"),
            vmem_limit_bytes=32 * 1024 * 1024,
        ),
    )(mem, dec["qemb"], dec["wq"], dec["bq"], dec["wk"], dec["bk"],
      dec["wv"], dec["bv"], dec["wff"], dec["bff"], dec["whead"], dec["bhead"])

    logits = out[:, :, :nc]
    boxes = out[:, :, nc:nc + 4]
    return {"pred_logits": logits, "pred_boxes": boxes}


# --------------------------------------------------------------------------
# RT-DETR forward (eval / deploy path)
# --------------------------------------------------------------------------
def rtdetr_forward(x_source, packed, x_target=None, targets=None):
    """Eval-mode RTDETR.forward (training == False): returns the decoder dict.

    # TODO(synk): training-only branches (multi_scale F.interpolate, DA_Pixel,
    # DA_Instance, coral logits) are gated on self.training and not implemented.
    """
    if x_target is not None:
        x = jnp.concatenate([x_source, x_target], axis=0)
    else:
        x = x_source
    x = jnp.transpose(x, (0, 2, 3, 1)).astype(jnp.bfloat16)       # NCHW -> NHWC
    feats = backbone_encoder_forward(x, packed)
    if x_target is not None:
        bs = x_source.shape[0]
        list_source = [f[:bs] for f in feats]
    else:
        list_source = feats
    return decoder_forward(list_source, packed["decoder"], targets)


# --------------------------------------------------------------------------
# Parameter init + one-time packing (bf16 casts, im2col weights, head padding)
# --------------------------------------------------------------------------
def init_params(key, cin=3, widths=(128, 128, 128), hidden=128,
                num_queries=8, num_classes=8):
    keys = iter(jax.random.split(key, 32))

    def w(shape, scale=0.05):
        return (scale * jax.random.normal(next(keys), shape)).astype(jnp.float32)

    def b(n):
        return jnp.zeros((n,), jnp.float32)

    stages = []
    c_prev = cin
    for c in widths:
        stages.append((w((3, 3, c_prev, c)), b(c)))
        c_prev = c
    proj = [(w((c, hidden)), b(hidden)) for c in widths]

    decoder = dict(
        query_embed=w((num_queries, hidden)),
        wq=w((hidden, hidden)), bq=b(hidden),
        wk=w((hidden, hidden)), bk=b(hidden),
        wv=w((hidden, hidden)), bv=b(hidden),
        wff=w((hidden, hidden)), bff=b(hidden),
        wcls=w((hidden, num_classes)), bcls=b(num_classes),
        wbox=w((hidden, 4)), bbox=b(4),
    )
    return {"backbone": {"stages": stages}, "encoder": {"proj": proj},
            "decoder": decoder}


def pack_params(params):
    """One-time packing outside the forward: bf16 casts, conv-weight im2col
    reshape + K padding, wk/wv kept separate, cls|box head padded to 128 lanes."""
    stages = []
    for (w, b), (wp, bp) in zip(params["backbone"]["stages"],
                                params["encoder"]["proj"]):
        kh, kw, cin, cout = w.shape
        wmat = w.reshape(kh * kw * cin, cout)
        kp = _round_up(wmat.shape[0], 128)
        wmat = jnp.pad(wmat, ((0, kp - wmat.shape[0]), (0, 0)))
        stages.append(dict(
            w=wmat.astype(jnp.bfloat16),
            b=b.reshape(1, -1).astype(jnp.float32),
            wproj=wp.astype(jnp.bfloat16),
            bproj=bp.reshape(1, -1).astype(jnp.float32),
        ))

    d = params["decoder"]
    D = d["wq"].shape[0]
    nc = d["wcls"].shape[1]
    HP = 128
    assert nc + 4 <= HP
    whead = jnp.concatenate([d["wcls"], d["wbox"]], axis=1)
    whead = jnp.pad(whead, ((0, 0), (0, HP - (nc + 4)))).astype(jnp.bfloat16)
    bhead = jnp.concatenate([d["bcls"], d["bbox"]], axis=0)
    bhead = jnp.pad(bhead, (0, HP - (nc + 4))).astype(jnp.float32).reshape(1, HP)

    dec = dict(
        qemb=d["query_embed"].astype(jnp.bfloat16),
        wq=d["wq"].astype(jnp.bfloat16), bq=d["bq"].reshape(1, D).astype(jnp.float32),
        wk=d["wk"].astype(jnp.bfloat16), bk=d["bk"].reshape(1, D).astype(jnp.float32),
        wv=d["wv"].astype(jnp.bfloat16), bv=d["bv"].reshape(1, D).astype(jnp.float32),
        wff=d["wff"].astype(jnp.bfloat16), bff=d["bff"].reshape(1, D).astype(jnp.float32),
        whead=whead, bhead=bhead, num_classes=nc,
    )
    return {"stages": stages, "decoder": dec}


# --------------------------------------------------------------------------
if __name__ == "__main__":
    key = jax.random.PRNGKey(0)
    k_params, k_x = jax.random.split(key)

    params = init_params(k_params)
    packed = pack_params(params)                     # one-time pre-pack (not per call)
    x_source = jax.random.normal(k_x, (2, 3, 64, 64), dtype=jnp.float32)  # NCHW

    fwd = jax.jit(lambda x: rtdetr_forward(x, packed))
    out = fwd(x_source)
    jax.block_until_ready(out)

    assert out["pred_logits"].shape == (2, 8, 8)
    assert out["pred_boxes"].shape == (2, 8, 4)
    assert bool(jnp.all(jnp.isfinite(out["pred_logits"])))
    assert bool(jnp.all((out["pred_boxes"] >= 0.0) & (out["pred_boxes"] <= 1.0)))

    print("KERNEL_OK")
</pallas_src>

<mosaic_0001>
module attributes {stable_mosaic.version = 11 : i64} {
  func.func @_conv_stage_kernel(%arg0: i32, %arg1: i32, %arg2: memref<1x256x128xbf16, #tpu.memory_space<vmem>>, %arg3: memref<128x128xbf16, #tpu.memory_space<vmem>>, %arg4: memref<1x128xf32, #tpu.memory_space<vmem>>, %arg5: memref<128x128xbf16, #tpu.memory_space<vmem>>, %arg6: memref<1x128xf32, #tpu.memory_space<vmem>>, %arg7: memref<1x256x128xbf16, #tpu.memory_space<vmem>>, %arg8: memref<1x256x128xbf16, #tpu.memory_space<vmem>>) attributes {dimension_semantics = [#tpu.dimension_semantics<parallel>, #tpu.dimension_semantics<parallel>], iteration_bounds = array<i64: 2, 4>, scalar_prefetch = 0 : i64, scratch_operands = 0 : i64, tpu.core_type = #tpu.core_type<tc>, window_params = [{transform_indices = @transform_0, window_bounds = array<i64: 1, 256, 128>}, {pipeline_mode = #tpu.pipeline_mode<synchronous>, transform_indices = @transform_1, window_bounds = array<i64: 128, 128>}, {pipeline_mode = #tpu.pipeline_mode<synchronous>, transform_indices = @transform_2, window_bounds = array<i64: 1, 128>}, {pipeline_mode = #tpu.pipeline_mode<synchronous>, transform_indices = @transform_3, window_bounds = array<i64: 128, 128>}, {pipeline_mode = #tpu.pipeline_mode<synchronous>, transform_indices = @transform_4, window_bounds = array<i64: 1, 128>}, {transform_indices = @transform_5, window_bounds = array<i64: 1, 256, 128>}, {transform_indices = @transform_6, window_bounds = array<i64: 1, 256, 128>}]} {
    %c0 = arith.constant 0 : index
    %c0_0 = arith.constant 0 : index
    %c0_1 = arith.constant 0 : index
    %0 = vector.load %arg2[%c0, %c0_0, %c0_1] : memref<1x256x128xbf16, #tpu.memory_space<vmem>>, vector<1x256x128xbf16>
    %1 = vector.shape_cast %0 : vector<1x256x128xbf16> to vector<256x128xbf16>
    %c0_2 = arith.constant 0 : index
    %c0_3 = arith.constant 0 : index
    %2 = vector.load %arg3[%c0_2, %c0_3] : memref<128x128xbf16, #tpu.memory_space<vmem>>, vector<128x128xbf16>
    %cst = arith.constant dense<0.000000e+00> : vector<256x128xf32>
    %3 = tpu.matmul %1, %2, %cst {dimension_numbers = #tpu.dot_dimension_numbers<[1], [0], [0], [1], [0, 0, 1, 1], [], []>} : vector<256x128xbf16>, vector<128x128xbf16>, vector<256x128xf32> -> vector<256x128xf32>
    %c0_4 = arith.constant 0 : index
    %c0_5 = arith.constant 0 : index
    %4 = vector.load %arg4[%c0_4, %c0_5] : memref<1x128xf32, #tpu.memory_space<vmem>>, vector<1x128xf32>
    %5 = vector.broadcast %4 : vector<1x128xf32> to vector<256x128xf32>
    %6 = arith.addf %3, %5 : vector<256x128xf32>
    %cst_6 = arith.constant 0.000000e+00 : f32
    %7 = vector.broadcast %cst_6 : f32 to vector<256x128xf32>
    %8 = arith.maximumf %6, %7 : vector<256x128xf32>
    %9 = arith.truncf %8 : vector<256x128xf32> to vector<256x128xbf16>
    %c0_7 = arith.constant 0 : index
    %c0_8 = arith.constant 0 : index
    %c0_9 = arith.constant 0 : index
    %10 = vector.load %arg7[%c0_7, %c0_8, %c0_9] : memref<1x256x128xbf16, #tpu.memory_space<vmem>>, vector<1x256x128xbf16>
    %11 = vector.shape_cast %10 : vector<1x256x128xbf16> to vector<256x128xbf16>
    %12 = vector.shape_cast %9 : vector<256x128xbf16> to vector<1x256x128xbf16>
    tpu.vector_store %arg7[%c0_7, %c0_8, %c0_9], %12 {strides = array<i32>} : memref<1x256x128xbf16, #tpu.memory_space<vmem>>, vector<1x256x128xbf16>,
    %13 = arith.truncf %8 : vector<256x128xf32> to vector<256x128xbf16>
    %c0_10 = arith.constant 0 : index
    %c0_11 = arith.constant 0 : index
    %14 = vector.load %arg5[%c0_10, %c0_11] : memref<128x128xbf16, #tpu.memory_space<vmem>>, vector<128x128xbf16>
    %cst_12 = arith.constant dense<0.000000e+00> : vector<256x128xf32>
    %15 = tpu.matmul %13, %14, %cst_12 {dimension_numbers = #tpu.dot_dimension_numbers<[1], [0], [0], [1], [0, 0, 1, 1], [], []>} : vector<256x128xbf16>, vector<128x128xbf16>, vector<256x128xf32> -> vector<256x128xf32>
    %c0_13 = arith.constant 0 : index
    %c0_14 = arith.constant 0 : index
    %16 = vector.load %arg6[%c0_13, %c0_14] : memref<1x128xf32, #tpu.memory_space<vmem>>, vector<1x128xf32>
    %17 = vector.broadcast %16 : vector<1x128xf32> to vector<256x128xf32>
    %18 = arith.addf %15, %17 : vector<256x128xf32>
    %cst_15 = arith.constant 0.000000e+00 : f32
    %19 = vector.broadcast %cst_15 : f32 to vector<256x128xf32>
    %20 = arith.maximumf %18, %19 : vector<256x128xf32>
    %21 = arith.truncf %20 : vector<256x128xf32> to vector<256x128xbf16>
    %c0_16 = arith.constant 0 : index
    %c0_17 = arith.constant 0 : index
    %c0_18 = arith.constant 0 : index
    %22 = vector.load %arg8[%c0_16, %c0_17, %c0_18] : memref<1x256x128xbf16, #tpu.memory_space<vmem>>, vector<1x256x128xbf16>
    %23 = vector.shape_cast %22 : vector<1x256x128xbf16> to vector<256x128xbf16>
    %24 = vector.shape_cast %21 : vector<256x128xbf16> to vector<1x256x128xbf16>
    tpu.vector_store %arg8[%c0_16, %c0_17, %c0_18], %24 {strides = array<i32>} : memref<1x256x128xbf16, #tpu.memory_space<vmem>>, vector<1x256x128xbf16>,
    return
  }
  func.func @transform_0(%arg0: i32, %arg1: i32) -> (i32, i32, i32) {
    %c0_i32 = arith.constant 0 : i32
    %c0_i32_0 = arith.constant 0 : i32
    return %arg0, %arg1, %c0_i32 : i32, i32, i32
  }
  func.func @transform_1(%arg0: i32, %arg1: i32) -> (i32, i32) {
    %c0_i32 = arith.constant 0 : i32
    %c0_i32_0 = arith.constant 0 : i32
    %c0_i32_1 = arith.constant 0 : i32
    return %c0_i32, %c0_i32_0 : i32, i32
  }
  func.func @transform_2(%arg0: i32, %arg1: i32) -> (i32, i32) {
    %c0_i32 = arith.constant 0 : i32
    %c0_i32_0 = arith.constant 0 : i32
    %c0_i32_1 = arith.constant 0 : i32
    return %c0_i32, %c0_i32_0 : i32, i32
  }
  func.func @transform_3(%arg0: i32, %arg1: i32) -> (i32, i32) {
    %c0_i32 = arith.constant 0 : i32
    %c0_i32_0 = arith.constant 0 : i32
    %c0_i32_1 = arith.constant 0 : i32
    return %c0_i32, %c0_i32_0 : i32, i32
  }
  func.func @transform_4(%arg0: i32, %arg1: i32) -> (i32, i32) {
    %c0_i32 = arith.constant 0 : i32
    %c0_i32_0 = arith.constant 0 : i32
    %c0_i32_1 = arith.constant 0 : i32
    return %c0_i32, %c0_i32_0 : i32, i32
  }
  func.func @transform_5(%arg0: i32, %arg1: i32) -> (i32, i32, i32) {
    %c0_i32 = arith.constant 0 : i32
    %c0_i32_0 = arith.constant 0 : i32
    return %arg0, %arg1, %c0_i32 : i32, i32, i32
  }
  func.func @transform_6(%arg0: i32, %arg1: i32) -> (i32, i32, i32) {
    %c0_i32 = arith.constant 0 : i32
    %c0_i32_0 = arith.constant 0 : i32
    return %arg0, %arg1, %c0_i32 : i32, i32, i32
  }
}

module attributes {stable_mosaic.version = 11 : i64} {
  func.func @_conv_stage_kernel(%arg0: i32, %arg1: i32, %arg2: memref<1x256x1152xbf16, #tpu.memory_space<vmem>>, %arg3: memref<1152x128xbf16, #tpu.memory_space<vmem>>, %arg4: memref<1x128xf32, #tpu.memory_space<vmem>>, %arg5: memref<128x128xbf16, #tpu.memory_space<vmem>>, %arg6: memref<1x128xf32, #tpu.memory_space<vmem>>, %arg7: memref<1x256x128xbf16, #tpu.memory_space<vmem>>, %arg8: memref<1x256x128xbf16, #tpu.memory_space<vmem>>) attributes {dimension_semantics = [#tpu.dimension_semantics<parallel>, #tpu.dimension_semantics<parallel>], iteration_bounds = array<i64: 2, 1>, scalar_prefetch = 0 : i64, scratch_operands = 0 : i64, tpu.core_type = #tpu.core_type<tc>, window_params = [{transform_indices = @transform_0, window_bounds = array<i64: 1, 256, 1152>}, {pipeline_mode = #tpu.pipeline_mode<synchronous>, transform_indices = @transform_1, window_bounds = array<i64: 1152, 128>}, {pipeline_mode = #tpu.pipeline_mode<synchronous>, transform_indices = @transform_2, window_bounds = array<i64: 1, 128>}, {pipeline_mode = #tpu.pipeline_mode<synchronous>, transform_indices = @transform_3, window_bounds = array<i64: 128, 128>}, {pipeline_mode = #tpu.pipeline_mode<synchronous>, transform_indices = @transform_4, window_bounds = array<i64: 1, 128>}, {transform_indices = @transform_5, window_bounds = array<i64: 1, 256, 128>}, {transform_indices = @transform_6, window_bounds = array<i64: 1, 256, 128>}]} {
    %c0 = arith.constant 0 : index
    %c0_0 = arith.constant 0 : index
    %c0_1 = arith.constant 0 : index
    %0 = vector.load %arg2[%c0, %c0_0, %c0_1] : memref<1x256x1152xbf16, #tpu.memory_space<vmem>>, vector<1x256x1152xbf16>
    %1 = vector.shape_cast %0 : vector<1x256x1152xbf16> to vector<256x1152xbf16>
    %c0_2 = arith.constant 0 : index
    %c0_3 = arith.constant 0 : index
    %2 = vector.load %arg3[%c0_2, %c0_3] : memref<1152x128xbf16, #tpu.memory_space<vmem>>, vector<1152x128xbf16>
    %cst = arith.constant dense<0.000000e+00> : vector<256x128xf32>
    %3 = tpu.matmul %1, %2, %cst {dimension_numbers = #tpu.dot_dimension_numbers<[1], [0], [0], [1], [0, 0, 1, 1], [], []>} : vector<256x1152xbf16>, vector<1152x128xbf16>, vector<256x128xf32> -> vector<256x128xf32>
    %c0_4 = arith.constant 0 : index
    %c0_5 = arith.constant 0 : index
    %4 = vector.load %arg4[%c0_4, %c0_5] : memref<1x128xf32, #tpu.memory_space<vmem>>, vector<1x128xf32>
    %5 = vector.broadcast %4 : vector<1x128xf32> to vector<256x128xf32>
    %6 = arith.addf %3, %5 : vector<256x128xf32>
    %cst_6 = arith.constant 0.000000e+00 : f32
    %7 = vector.broadcast %cst_6 : f32 to vector<256x128xf32>
    %8 = arith.maximumf %6, %7 : vector<256x128xf32>
    %9 = arith.truncf %8 : vector<256x128xf32> to vector<256x128xbf16>
    %c0_7 = arith.constant 0 : index
    %c0_8 = arith.constant 0 : index
    %c0_9 = arith.constant 0 : index
    %10 = vector.load %arg7[%c0_7, %c0_8, %c0_9] : memref<1x256x128xbf16, #tpu.memory_space<vmem>>, vector<1x256x128xbf16>
    %11 = vector.shape_cast %10 : vector<1x256x128xbf16> to vector<256x128xbf16>
    %12 = vector.shape_cast %9 : vector<256x128xbf16> to vector<1x256x128xbf16>
    tpu.vector_store %arg7[%c0_7, %c0_8, %c0_9], %12 {strides = array<i32>} : memref<1x256x128xbf16, #tpu.memory_space<vmem>>, vector<1x256x128xbf16>,
    %13 = arith.truncf %8 : vector<256x128xf32> to vector<256x128xbf16>
    %c0_10 = arith.constant 0 : index
    %c0_11 = arith.constant 0 : index
    %14 = vector.load %arg5[%c0_10, %c0_11] : memref<128x128xbf16, #tpu.memory_space<vmem>>, vector<128x128xbf16>
    %cst_12 = arith.constant dense<0.000000e+00> : vector<256x128xf32>
    %15 = tpu.matmul %13, %14, %cst_12 {dimension_numbers = #tpu.dot_dimension_numbers<[1], [0], [0], [1], [0, 0, 1, 1], [], []>} : vector<256x128xbf16>, vector<128x128xbf16>, vector<256x128xf32> -> vector<256x128xf32>
    %c0_13 = arith.constant 0 : index
    %c0_14 = arith.constant 0 : index
    %16 = vector.load %arg6[%c0_13, %c0_14] : memref<1x128xf32, #tpu.memory_space<vmem>>, vector<1x128xf32>
    %17 = vector.broadcast %16 : vector<1x128xf32> to vector<256x128xf32>
    %18 = arith.addf %15, %17 : vector<256x128xf32>
    %cst_15 = arith.constant 0.000000e+00 : f32
    %19 = vector.broadcast %cst_15 : f32 to vector<256x128xf32>
    %20 = arith.maximumf %18, %19 : vector<256x128xf32>
    %21 = arith.truncf %20 : vector<256x128xf32> to vector<256x128xbf16>
    %c0_16 = arith.constant 0 : index
    %c0_17 = arith.constant 0 : index
    %c0_18 = arith.constant 0 : index
    %22 = vector.load %arg8[%c0_16, %c0_17, %c0_18] : memref<1x256x128xbf16, #tpu.memory_space<vmem>>, vector<1x256x128xbf16>
    %23 = vector.shape_cast %22 : vector<1x256x128xbf16> to vector<256x128xbf16>
    %24 = vector.shape_cast %21 : vector<256x128xbf16> to vector<1x256x128xbf16>
    tpu.vector_store %arg8[%c0_16, %c0_17, %c0_18], %24 {strides = array<i32>} : memref<1x256x128xbf16, #tpu.memory_space<vmem>>, vector<1x256x128xbf16>,
    return
  }
  func.func @transform_0(%arg0: i32, %arg1: i32) -> (i32, i32, i32) {
    %c0_i32 = arith.constant 0 : i32
    %c0_i32_0 = arith.constant 0 : i32
    return %arg0, %arg1, %c0_i32 : i32, i32, i32
  }
  func.func @transform_1(%arg0: i32, %arg1: i32) -> (i32, i32) {
    %c0_i32 = arith.constant 0 : i32
    %c0_i32_0 = arith.constant 0 : i32
    %c0_i32_1 = arith.constant 0 : i32
    return %c0_i32, %c0_i32_0 : i32, i32
  }
  func.func @transform_2(%arg0: i32, %arg1: i32) -> (i32, i32) {
    %c0_i32 = arith.constant 0 : i32
    %c0_i32_0 = arith.constant 0 : i32
    %c0_i32_1 = arith.constant 0 : i32
    return %c0_i32, %c0_i32_0 : i32, i32
  }
  func.func @transform_3(%arg0: i32, %arg1: i32) -> (i32, i32) {
    %c0_i32 = arith.constant 0 : i32
    %c0_i32_0 = arith.constant 0 : i32
    %c0_i32_1 = arith.constant 0 : i32
    return %c0_i32, %c0_i32_0 : i32, i32
  }
  func.func @transform_4(%arg0: i32, %arg1: i32) -> (i32, i32) {
    %c0_i32 = arith.constant 0 : i32
    %c0_i32_0 = arith.constant 0 : i32
    %c0_i32_1 = arith.constant 0 : i32
    return %c0_i32, %c0_i32_0 : i32, i32
  }
  func.func @transform_5(%arg0: i32, %arg1: i32) -> (i32, i32, i32) {
    %c0_i32 = arith.constant 0 : i32
    %c0_i32_0 = arith.constant 0 : i32
    return %arg0, %arg1, %c0_i32 : i32, i32, i32
  }
  func.func @transform_6(%arg0: i32, %arg1: i32) -> (i32, i32, i32) {
    %c0_i32 = arith.constant 0 : i32
    %c0_i32_0 = arith.constant 0 : i32
    return %arg0, %arg1, %c0_i32 : i32, i32, i32
  }
}

module attributes {stable_mosaic.version = 11 : i64} {
  func.func @_conv_stage_kernel(%arg0: i32, %arg1: i32, %arg2: memref<1x64x1152xbf16, #tpu.memory_space<vmem>>, %arg3: memref<1152x128xbf16, #tpu.memory_space<vmem>>, %arg4: memref<1x128xf32, #tpu.memory_space<vmem>>, %arg5: memref<128x128xbf16, #tpu.memory_space<vmem>>, %arg6: memref<1x128xf32, #tpu.memory_space<vmem>>, %arg7: memref<1x64x128xbf16, #tpu.memory_space<vmem>>, %arg8: memref<1x64x128xbf16, #tpu.memory_space<vmem>>) attributes {dimension_semantics = [#tpu.dimension_semantics<parallel>, #tpu.dimension_semantics<parallel>], iteration_bounds = array<i64: 2, 1>, scalar_prefetch = 0 : i64, scratch_operands = 0 : i64, tpu.core_type = #tpu.core_type<tc>, window_params = [{transform_indices = @transform_0, window_bounds = array<i64: 1, 64, 1152>}, {pipeline_mode = #tpu.pipeline_mode<synchronous>, transform_indices = @transform_1, window_bounds = array<i64: 1152, 128>}, {pipeline_mode = #tpu.pipeline_mode<synchronous>, transform_indices = @transform_2, window_bounds = array<i64: 1, 128>}, {pipeline_mode = #tpu.pipeline_mode<synchronous>, transform_indices = @transform_3, window_bounds = array<i64: 128, 128>}, {pipeline_mode = #tpu.pipeline_mode<synchronous>, transform_indices = @transform_4, window_bounds = array<i64: 1, 128>}, {transform_indices = @transform_5, window_bounds = array<i64: 1, 64, 128>}, {transform_indices = @transform_6, window_bounds = array<i64: 1, 64, 128>}]} {
    %c0 = arith.constant 0 : index
    %c0_0 = arith.constant 0 : index
    %c0_1 = arith.constant 0 : index
    %0 = vector.load %arg2[%c0, %c0_0, %c0_1] : memref<1x64x1152xbf16, #tpu.memory_space<vmem>>, vector<1x64x1152xbf16>
    %1 = vector.shape_cast %0 : vector<1x64x1152xbf16> to vector<64x1152xbf16>
    %c0_2 = arith.constant 0 : index
    %c0_3 = arith.constant 0 : index
    %2 = vector.load %arg3[%c0_2, %c0_3] : memref<1152x128xbf16, #tpu.memory_space<vmem>>, vector<1152x128xbf16>
    %cst = arith.constant dense<0.000000e+00> : vector<64x128xf32>
    %3 = tpu.matmul %1, %2, %cst {dimension_numbers = #tpu.dot_dimension_numbers<[1], [0], [0], [1], [0, 0, 1, 1], [], []>} : vector<64x1152xbf16>, vector<1152x128xbf16>, vector<64x128xf32> -> vector<64x128xf32>
    %c0_4 = arith.constant 0 : index
    %c0_5 = arith.constant 0 : index
    %4 = vector.load %arg4[%c0_4, %c0_5] : memref<1x128xf32, #tpu.memory_space<vmem>>, vector<1x128xf32>
    %5 = vector.broadcast %4 : vector<1x128xf32> to vector<64x128xf32>
    %6 = arith.addf %3, %5 : vector<64x128xf32>
    %cst_6 = arith.constant 0.000000e+00 : f32
    %7 = vector.broadcast %cst_6 : f32 to vector<64x128xf32>
    %8 = arith.maximumf %6, %7 : vector<64x128xf32>
    %9 = arith.truncf %8 : vector<64x128xf32> to vector<64x128xbf16>
    %c0_7 = arith.constant 0 : index
    %c0_8 = arith.constant 0 : index
    %c0_9 = arith.constant 0 : index
    %10 = vector.load %arg7[%c0_7, %c0_8, %c0_9] : memref<1x64x128xbf16, #tpu.memory_space<vmem>>, vector<1x64x128xbf16>
    %11 = vector.shape_cast %10 : vector<1x64x128xbf16> to vector<64x128xbf16>
    %12 = vector.shape_cast %9 : vector<64x128xbf16> to vector<1x64x128xbf16>
    tpu.vector_store %arg7[%c0_7, %c0_8, %c0_9], %12 {strides = array<i32>} : memref<1x64x128xbf16, #tpu.memory_space<vmem>>, vector<1x64x128xbf16>,
    %13 = arith.truncf %8 : vector<64x128xf32> to vector<64x128xbf16>
    %c0_10 = arith.constant 0 : index
    %c0_11 = arith.constant 0 : index
    %14 = vector.load %arg5[%c0_10, %c0_11] : memref<128x128xbf16, #tpu.memory_space<vmem>>, vector<128x128xbf16>
    %cst_12 = arith.constant dense<0.000000e+00> : vector<64x128xf32>
    %15 = tpu.matmul %13, %14, %cst_12 {dimension_numbers = #tpu.dot_dimension_numbers<[1], [0], [0], [1], [0, 0, 1, 1], [], []>} : vector<64x128xbf16>, vector<128x128xbf16>, vector<64x128xf32> -> vector<64x128xf32>
    %c0_13 = arith.constant 0 : index
    %c0_14 = arith.constant 0 : index
    %16 = vector.load %arg6[%c0_13, %c0_14] : memref<1x128xf32, #tpu.memory_space<vmem>>, vector<1x128xf32>
    %17 = vector.broadcast %16 : vector<1x128xf32> to vector<64x128xf32>
    %18 = arith.addf %15, %17 : vector<64x128xf32>
    %cst_15 = arith.constant 0.000000e+00 : f32
    %19 = vector.broadcast %cst_15 : f32 to vector<64x128xf32>
    %20 = arith.maximumf %18, %19 : vector<64x128xf32>
    %21 = arith.truncf %20 : vector<64x128xf32> to vector<64x128xbf16>
    %c0_16 = arith.constant 0 : index
    %c0_17 = arith.constant 0 : index
    %c0_18 = arith.constant 0 : index
    %22 = vector.load %arg8[%c0_16, %c0_17, %c0_18] : memref<1x64x128xbf16, #tpu.memory_space<vmem>>, vector<1x64x128xbf16>
    %23 = vector.shape_cast %22 : vector<1x64x128xbf16> to vector<64x128xbf16>
    %24 = vector.shape_cast %21 : vector<64x128xbf16> to vector<1x64x128xbf16>
    tpu.vector_store %arg8[%c0_16, %c0_17, %c0_18], %24 {strides = array<i32>} : memref<1x64x128xbf16, #tpu.memory_space<vmem>>, vector<1x64x128xbf16>,
    return
  }
  func.func @transform_0(%arg0: i32, %arg1: i32) -> (i32, i32, i32) {
    %c0_i32 = arith.constant 0 : i32
    %c0_i32_0 = arith.constant 0 : i32
    return %arg0, %arg1, %c0_i32 : i32, i32, i32
  }
  func.func @transform_1(%arg0: i32, %arg1: i32) -> (i32, i32) {
    %c0_i32 = arith.constant 0 : i32
    %c0_i32_0 = arith.constant 0 : i32
    %c0_i32_1 = arith.constant 0 : i32
    return %c0_i32, %c0_i32_0 : i32, i32
  }
  func.func @transform_2(%arg0: i32, %arg1: i32) -> (i32, i32) {
    %c0_i32 = arith.constant 0 : i32
    %c0_i32_0 = arith.constant 0 : i32
    %c0_i32_1 = arith.constant 0 : i32
    return %c0_i32, %c0_i32_0 : i32, i32
  }
  func.func @transform_3(%arg0: i32, %arg1: i32) -> (i32, i32) {
    %c0_i32 = arith.constant 0 : i32
    %c0_i32_0 = arith.constant 0 : i32
    %c0_i32_1 = arith.constant 0 : i32
    return %c0_i32, %c0_i32_0 : i32, i32
  }
  func.func @transform_4(%arg0: i32, %arg1: i32) -> (i32, i32) {
    %c0_i32 = arith.constant 0 : i32
    %c0_i32_0 = arith.constant 0 : i32
    %c0_i32_1 = arith.constant 0 : i32
    return %c0_i32, %c0_i32_0 : i32, i32
  }
  func.func @transform_5(%arg0: i32, %arg1: i32) -> (i32, i32, i32) {
    %c0_i32 = arith.constant 0 : i32
    %c0_i32_0 = arith.constant 0 : i32
    return %arg0, %arg1, %c0_i32 : i32, i32, i32
  }
  func.func @transform_6(%arg0: i32, %arg1: i32) -> (i32, i32, i32) {
    %c0_i32 = arith.constant 0 : i32
    %c0_i32_0 = arith.constant 0 : i32
    return %arg0, %arg1, %c0_i32 : i32, i32, i32
  }
}

module attributes {stable_mosaic.version = 11 : i64} {
  func.func @_decoder_kernel(%arg0: i32, %arg1: i32, %arg2: memref<1x512x128xbf16, #tpu.memory_space<vmem>>, %arg3: memref<8x128xbf16, #tpu.memory_space<vmem>>, %arg4: memref<128x128xbf16, #tpu.memory_space<vmem>>, %arg5: memref<1x128xf32, #tpu.memory_space<vmem>>, %arg6: memref<128x128xbf16, #tpu.memory_space<vmem>>, %arg7: memref<1x128xf32, #tpu.memory_space<vmem>>, %arg8: memref<128x128xbf16, #tpu.memory_space<vmem>>, %arg9: memref<1x128xf32, #tpu.memory_space<vmem>>, %arg10: memref<128x128xbf16, #tpu.memory_space<vmem>>, %arg11: memref<1x128xf32, #tpu.memory_space<vmem>>, %arg12: memref<128x128xbf16, #tpu.memory_space<vmem>>, %arg13: memref<1x128xf32, #tpu.memory_space<vmem>>, %arg14: memref<1x8x128xf32, #tpu.memory_space<vmem>>, %arg15: memref<8x128xbf16, #tpu.memory_space<vmem>>, %arg16: memref<8x1xf32, #tpu.memory_space<vmem>>, %arg17: memref<8x1xf32, #tpu.memory_space<vmem>>, %arg18: memref<8x128xf32, #tpu.memory_space<vmem>>) attributes {dimension_semantics = [#tpu.dimension_semantics<parallel>, #tpu.dimension_semantics<arbitrary>], iteration_bounds = array<i64: 2, 3>, scalar_prefetch = 0 : i64, scratch_operands = 4 : i64, tpu.core_type = #tpu.core_type<tc>, window_params = [{transform_indices = @transform_0, window_bounds = array<i64: 1, 512, 128>}, {pipeline_mode = #tpu.pipeline_mode<synchronous>, transform_indices = @transform_1, window_bounds = array<i64: 8, 128>}, {pipeline_mode = #tpu.pipeline_mode<synchronous>, transform_indices = @transform_2, window_bounds = array<i64: 128, 128>}, {pipeline_mode = #tpu.pipeline_mode<synchronous>, transform_indices = @transform_3, window_bounds = array<i64: 1, 128>}, {pipeline_mode = #tpu.pipeline_mode<synchronous>, transform_indices = @transform_4, window_bounds = array<i64: 128, 128>}, {pipeline_mode = #tpu.pipeline_mode<synchronous>, transform_indices = @transform_5, window_bounds = array<i64: 1, 128>}, {pipeline_mode = #tpu.pipeline_mode<synchronous>, transform_indices = @transform_6, window_bounds = array<i64: 128, 128>}, {pipeline_mode = #tpu.pipeline_mode<synchronous>, transform_indices = @transform_7, window_bounds = array<i64: 1, 128>}, {pipeline_mode = #tpu.pipeline_mode<synchronous>, transform_indices = @transform_8, window_bounds = array<i64: 128, 128>}, {pipeline_mode = #tpu.pipeline_mode<synchronous>, transform_indices = @transform_9, window_bounds = array<i64: 1, 128>}, {pipeline_mode = #tpu.pipeline_mode<synchronous>, transform_indices = @transform_10, window_bounds = array<i64: 128, 128>}, {pipeline_mode = #tpu.pipeline_mode<synchronous>, transform_indices = @transform_11, window_bounds = array<i64: 1, 128>}, {transform_indices = @transform_12, window_bounds = array<i64: 1, 8, 128>}]} {
    %c0_i32 = arith.constant 0 : i32
    %0 = arith.cmpi eq, %arg1, %c0_i32 : i32
    %1 = arith.extui %0 : i1 to i32
    %c0_i32_0 = arith.constant 0 : i32
    %2 = arith.cmpi ne, %1, %c0_i32_0 : i32
    scf.if %2 {
      %cst_34 = arith.constant 1.280000e+02 : f32
      %54 = math.sqrt %cst_34 : f32
      %cst_35 = arith.constant 1.000000e+00 : f32
      %55 = arith.divf %cst_35, %54 : f32
      %c0_36 = arith.constant 0 : index
      %c0_37 = arith.constant 0 : index
      %56 = vector.load %arg3[%c0_36, %c0_37] : memref<8x128xbf16, #tpu.memory_space<vmem>>, vector<8x128xbf16>
      %c0_38 = arith.constant 0 : index
      %c0_39 = arith.constant 0 : index
      %57 = vector.load %arg4[%c0_38, %c0_39] : memref<128x128xbf16, #tpu.memory_space<vmem>>, vector<128x128xbf16>
      %cst_40 = arith.constant dense<0.000000e+00> : vector<8x128xf32>
      %58 = tpu.matmul %56, %57, %cst_40 {dimension_numbers = #tpu.dot_dimension_numbers<[1], [0], [0], [1], [0, 0, 1, 1], [], []>} : vector<8x128xbf16>, vector<128x128xbf16>, vector<8x128xf32> -> vector<8x128xf32>
      %c0_41 = arith.constant 0 : index
      %c0_42 = arith.constant 0 : index
      %59 = vector.load %arg5[%c0_41, %c0_42] : memref<1x128xf32, #tpu.memory_space<vmem>>, vector<1x128xf32>
      %60 = vector.broadcast %59 : vector<1x128xf32> to vector<8x128xf32>
      %61 = arith.addf %58, %60 : vector<8x128xf32>
      %62 = vector.broadcast %55 : f32 to vector<8x128xf32>
      %63 = arith.mulf %61, %62 : vector<8x128xf32>
      %64 = arith.truncf %63 : vector<8x128xf32> to vector<8x128xbf16>
      %c0_43 = arith.constant 0 : index
      %c0_44 = arith.constant 0 : index
      %65 = vector.load %arg15[%c0_43, %c0_44] : memref<8x128xbf16, #tpu.memory_space<vmem>>, vector<8x128xbf16>
      tpu.vector_store %arg15[%c0_43, %c0_44], %64 {strides = array<i32>} : memref<8x128xbf16, #tpu.memory_space<vmem>>, vector<8x128xbf16>,
      %cst_45 = arith.constant -1.000000e+30 : f32
      %66 = vector.broadcast %cst_45 : f32 to vector<8x1xf32>
      %c0_46 = arith.constant 0 : index
      %c0_47 = arith.constant 0 : index
      %67 = vector.load %arg16[%c0_46, %c0_47] : memref<8x1xf32, #tpu.memory_space<vmem>>, vector<8x1xf32>
      tpu.vector_store %arg16[%c0_46, %c0_47], %66 {strides = array<i32>} : memref<8x1xf32, #tpu.memory_space<vmem>>, vector<8x1xf32>,
      %cst_48 = arith.constant 0.000000e+00 : f32
      %68 = vector.broadcast %cst_48 : f32 to vector<8x1xf32>
      %c0_49 = arith.constant 0 : index
      %c0_50 = arith.constant 0 : index
      %69 = vector.load %arg17[%c0_49, %c0_50] : memref<8x1xf32, #tpu.memory_space<vmem>>, vector<8x1xf32>
      tpu.vector_store %arg17[%c0_49, %c0_50], %68 {strides = array<i32>} : memref<8x1xf32, #tpu.memory_space<vmem>>, vector<8x1xf32>,
      %cst_51 = arith.constant 0.000000e+00 : f32
      %70 = vector.broadcast %cst_51 : f32 to vector<8x128xf32>
      %c0_52 = arith.constant 0 : index
      %c0_53 = arith.constant 0 : index
      %71 = vector.load %arg18[%c0_52, %c0_53] : memref<8x128xf32, #tpu.memory_space<vmem>>, vector<8x128xf32>
      tpu.vector_store %arg18[%c0_52, %c0_53], %70 {strides = array<i32>} : memref<8x128xf32, #tpu.memory_space<vmem>>, vector<8x128xf32>,
    } else {
    }
    %c0 = arith.constant 0 : index
    %c0_1 = arith.constant 0 : index
    %c0_2 = arith.constant 0 : index
    %3 = vector.load %arg2[%c0, %c0_1, %c0_2] : memref<1x512x128xbf16, #tpu.memory_space<vmem>>, vector<1x512x128xbf16>
    %4 = vector.shape_cast %3 : vector<1x512x128xbf16> to vector<512x128xbf16>
    %c0_3 = arith.constant 0 : index
    %c0_4 = arith.constant 0 : index
    %5 = vector.load %arg6[%c0_3, %c0_4] : memref<128x128xbf16, #tpu.memory_space<vmem>>, vector<128x128xbf16>
    %cst = arith.constant dense<0.000000e+00> : vector<512x128xf32>
    %6 = tpu.matmul %4, %5, %cst {dimension_numbers = #tpu.dot_dimension_numbers<[1], [0], [0], [1], [0, 0, 1, 1], [], []>} : vector<512x128xbf16>, vector<128x128xbf16>, vector<512x128xf32> -> vector<512x128xf32>
    %c0_5 = arith.constant 0 : index
    %c0_6 = arith.constant 0 : index
    %7 = vector.load %arg7[%c0_5, %c0_6] : memref<1x128xf32, #tpu.memory_space<vmem>>, vector<1x128xf32>
    %8 = vector.broadcast %7 : vector<1x128xf32> to vector<512x128xf32>
    %9 = arith.addf %6, %8 : vector<512x128xf32>
    %10 = arith.truncf %9 : vector<512x128xf32> to vector<512x128xbf16>
    %c0_7 = arith.constant 0 : index
    %c0_8 = arith.constant 0 : index
    %11 = vector.load %arg8[%c0_7, %c0_8] : memref<128x128xbf16, #tpu.memory_space<vmem>>, vector<128x128xbf16>
    %cst_9 = arith.constant dense<0.000000e+00> : vector<512x128xf32>
    %12 = tpu.matmul %4, %11, %cst_9 {dimension_numbers = #tpu.dot_dimension_numbers<[1], [0], [0], [1], [0, 0, 1, 1], [], []>} : vector<512x128xbf16>, vector<128x128xbf16>, vector<512x128xf32> -> vector<512x128xf32>
    %c0_10 = arith.constant 0 : index
    %c0_11 = arith.constant 0 : index
    %13 = vector.load %arg9[%c0_10, %c0_11] : memref<1x128xf32, #tpu.memory_space<vmem>>, vector<1x128xf32>
    %14 = vector.broadcast %13 : vector<1x128xf32> to vector<512x128xf32>
    %15 = arith.addf %12, %14 : vector<512x128xf32>
    %16 = arith.truncf %15 : vector<512x128xf32> to vector<512x128xbf16>
    %c0_12 = arith.constant 0 : index
    %c0_13 = arith.constant 0 : index
    %17 = vector.load %arg15[%c0_12, %c0_13] : memref<8x128xbf16, #tpu.memory_space<vmem>>, vector<8x128xbf16>
    %cst_14 = arith.constant dense<0.000000e+00> : vector<8x512xf32>
    %18 = tpu.matmul %17, %10, %cst_14 {dimension_numbers = #tpu.dot_dimension_numbers<[1], [1], [0], [0], [0, 0, 1, 0], [], []>} : vector<8x128xbf16>, vector<512x128xbf16>, vector<8x512xf32> -> vector<8x512xf32>
    %19 = tpu.iota {dimensions = array<i32: 1>} : vector<8x512xi32>
    %c512_i32 = arith.constant 512 : i32
    %20 = arith.muli %arg1, %c512_i32 : i32
    %21 = vector.broadcast %20 : i32 to vector<8x512xi32>
    %22 = arith.addi %19, %21 : vector<8x512xi32>
    %c1344_i32 = arith.constant 1344 : i32
    %23 = vector.broadcast %c1344_i32 : i32 to vector<8x512xi32>
    %24 = arith.cmpi slt, %22, %23 : vector<8x512xi32>
    %cst_15 = arith.constant -1.000000e+30 : f32
    %25 = vector.broadcast %cst_15 : f32 to vector<8x512xf32>
    %26 = arith.select %24, %18, %25 : vector<8x512xi1>, vector<8x512xf32>
    %c0_16 = arith.constant 0 : index
    %c0_17 = arith.constant 0 : index
    %27 = vector.load %arg16[%c0_16, %c0_17] : memref<8x1xf32, #tpu.memory_space<vmem>>, vector<8x1xf32>
    %cst_18 = arith.constant dense<0xFF800000> : vector<8xf32>
    %28 = vector.multi_reduction <maximumf>, %26, %cst_18 [1] : vector<8x512xf32> to vector<8xf32>
    %29 = vector.shape_cast %28 : vector<8xf32> to vector<8x1xf32>
    %30 = arith.maximumf %27, %29 : vector<8x1xf32>
    %c0_19 = arith.constant 0 : index
    %c0_20 = arith.constant 0 : index
    %31 = vector.load %arg16[%c0_19, %c0_20] : memref<8x1xf32, #tpu.memory_space<vmem>>, vector<8x1xf32>
    %32 = arith.subf %31, %30 : vector<8x1xf32>
    %33 = math.exp %32 : vector<8x1xf32>
    %34 = vector.broadcast %30 : vector<8x1xf32> to vector<8x512xf32>
    %35 = arith.subf %26, %34 : vector<8x512xf32>
    %36 = math.exp %35 : vector<8x512xf32>
    %c0_21 = arith.constant 0 : index
    %c0_22 = arith.constant 0 : index
    %37 = vector.load %arg17[%c0_21, %c0_22] : memref<8x1xf32, #tpu.memory_space<vmem>>, vector<8x1xf32>
    %38 = arith.mulf %33, %37 : vector<8x1xf32>
    %cst_23 = arith.constant dense<0.000000e+00> : vector<8xf32>
    %39 = vector.multi_reduction <add>, %36, %cst_23 [1] : vector<8x512xf32> to vector<8xf32>
    %40 = vector.shape_cast %39 : vector<8xf32> to vector<8x1xf32>
    %41 = arith.addf %38, %40 : vector<8x1xf32>
    %c0_24 = arith.constant 0 : index
    %c0_25 = arith.constant 0 : index
    %42 = vector.load %arg17[%c0_24, %c0_25] : memref<8x1xf32, #tpu.memory_space<vmem>>, vector<8x1xf32>
    tpu.vector_store %arg17[%c0_24, %c0_25], %41 {strides = array<i32>} : memref<8x1xf32, #tpu.memory_space<vmem>>, vector<8x1xf32>,
    %c0_26 = arith.constant 0 : index
    %c0_27 = arith.constant 0 : index
    %43 = vector.load %arg18[%c0_26, %c0_27] : memref<8x128xf32, #tpu.memory_space<vmem>>, vector<8x128xf32>
    %44 = vector.broadcast %33 : vector<8x1xf32> to vector<8x128xf32>
    %45 = arith.mulf %44, %43 : vector<8x128xf32>
    %46 = arith.truncf %36 : vector<8x512xf32> to vector<8x512xbf16>
    %cst_28 = arith.constant dense<0.000000e+00> : vector<8x128xf32>
    %47 = tpu.matmul %46, %16, %cst_28 {dimension_numbers = #tpu.dot_dimension_numbers<[1], [0], [0], [1], [0, 0, 1, 1], [], []>} : vector<8x512xbf16>, vector<512x128xbf16>, vector<8x128xf32> -> vector<8x128xf32>
    %48 = arith.addf %45, %47 : vector<8x128xf32>
    %c0_29 = arith.constant 0 : index
    %c0_30 = arith.constant 0 : index
    %49 = vector.load %arg18[%c0_29, %c0_30] : memref<8x128xf32, #tpu.memory_space<vmem>>, vector<8x128xf32>
    tpu.vector_store %arg18[%c0_29, %c0_30], %48 {strides = array<i32>} : memref<8x128xf32, #tpu.memory_space<vmem>>, vector<8x128xf32>,
    %c0_31 = arith.constant 0 : index
    %c0_32 = arith.constant 0 : index
    %50 = vector.load %arg16[%c0_31, %c0_32] : memref<8x1xf32, #tpu.memory_space<vmem>>, vector<8x1xf32>
    tpu.vector_store %arg16[%c0_31, %c0_32], %30 {strides = array<i32>} : memref<8x1xf32, #tpu.memory_space<vmem>>, vector<8x1xf32>,
    %c2_i32 = arith.constant 2 : i32
    %51 = arith.cmpi eq, %arg1, %c2_i32 : i32
    %52 = arith.extui %51 : i1 to i32
    %c0_i32_33 = arith.constant 0 : i32
    %53 = arith.cmpi ne, %52, %c0_i32_33 : i32
    scf.if %53 {
      %c0_34 = arith.constant 0 : index
      %c0_35 = arith.constant 0 : index
      %54 = vector.load %arg18[%c0_34, %c0_35] : memref<8x128xf32, #tpu.memory_space<vmem>>, vector<8x128xf32>
      %c0_36 = arith.constant 0 : index
      %c0_37 = arith.constant 0 : index
      %55 = vector.load %arg17[%c0_36, %c0_37] : memref<8x1xf32, #tpu.memory_space<vmem>>, vector<8x1xf32>
      %56 = tpu.reciprocal %55 {approx = true} : vector<8x1xf32> -> vector<8x1xf32>
      %57 = vector.broadcast %56 : vector<8x1xf32> to vector<8x128xf32>
      %58 = arith.mulf %54, %57 : vector<8x128xf32>
      %59 = arith.truncf %58 : vector<8x128xf32> to vector<8x128xbf16>
      %c0_38 = arith.constant 0 : index
      %c0_39 = arith.constant 0 : index
      %60 = vector.load %arg10[%c0_38, %c0_39] : memref<128x128xbf16, #tpu.memory_space<vmem>>, vector<128x128xbf16>
      %cst_40 = arith.constant dense<0.000000e+00> : vector<8x128xf32>
      %61 = tpu.matmul %59, %60, %cst_40 {dimension_numbers = #tpu.dot_dimension_numbers<[1], [0], [0], [1], [0, 0, 1, 1], [], []>} : vector<8x128xbf16>, vector<128x128xbf16>, vector<8x128xf32> -> vector<8x128xf32>
      %c0_41 = arith.constant 0 : index
      %c0_42 = arith.constant 0 : index
      %62 = vector.load %arg11[%c0_41, %c0_42] : memref<1x128xf32, #tpu.memory_space<vmem>>, vector<1x128xf32>
      %63 = vector.broadcast %62 : vector<1x128xf32> to vector<8x128xf32>
      %64 = arith.addf %61, %63 : vector<8x128xf32>
      %cst_43 = arith.constant 0.000000e+00 : f32
      %65 = vector.broadcast %cst_43 : f32 to vector<8x128xf32>
      %66 = arith.maximumf %64, %65 : vector<8x128xf32>
      %67 = arith.truncf %66 : vector<8x128xf32> to vector<8x128xbf16>
      %c0_44 = arith.constant 0 : index
      %c0_45 = arith.constant 0 : index
      %68 = vector.load %arg12[%c0_44, %c0_45] : memref<128x128xbf16, #tpu.memory_space<vmem>>, vector<128x128xbf16>
      %cst_46 = arith.constant dense<0.000000e+00> : vector<8x128xf32>
      %69 = tpu.matmul %67, %68, %cst_46 {dimension_numbers = #tpu.dot_dimension_numbers<[1], [0], [0], [1], [0, 0, 1, 1], [], []>} : vector<8x128xbf16>, vector<128x128xbf16>, vector<8x128xf32> -> vector<8x128xf32>
      %c0_47 = arith.constant 0 : index
      %c0_48 = arith.constant 0 : index
      %70 = vector.load %arg13[%c0_47, %c0_48] : memref<1x128xf32, #tpu.memory_space<vmem>>, vector<1x128xf32>
      %71 = vector.broadcast %70 : vector<1x128xf32> to vector<8x128xf32>
      %72 = arith.addf %69, %71 : vector<8x128xf32>
      %73 = tpu.iota {dimensions = array<i32: 1>} : vector<8x128xi32>
      %c8_i32 = arith.constant 8 : i32
      %74 = vector.broadcast %c8_i32 : i32 to vector<8x128xi32>
      %75 = arith.cmpi sge, %73, %74 : vector<8x128xi32>
      %c12_i32 = arith.constant 12 : i32
      %76 = vector.broadcast %c12_i32 : i32 to vector<8x128xi32>
      %77 = arith.cmpi slt, %73, %76 : vector<8x128xi32>
      %78 = arith.andi %75, %77 : vector<8x128xi1>
      %79 = arith.negf %72 : vector<8x128xf32>
      %80 = math.exp %79 : vector<8x128xf32>
      %cst_49 = arith.constant 1.000000e+00 : f32
      %81 = vector.broadcast %cst_49 : f32 to vector<8x128xf32>
      %82 = arith.addf %81, %80 : vector<8x128xf32>
      %83 = arith.divf %81, %82 : vector<8x128xf32>
      %84 = arith.select %78, %83, %72 : vector<8x128xi1>, vector<8x128xf32>
      %c0_50 = arith.constant 0 : index
      %c0_51 = arith.constant 0 : index
      %c0_52 = arith.constant 0 : index
      %85 = vector.load %arg14[%c0_50, %c0_51, %c0_52] : memref<1x8x128xf32, #tpu.memory_space<vmem>>, vector<1x8x128xf32>
      %86 = vector.shape_cast %85 : vector<1x8x128xf32> to vector<8x128xf32>
      %87 = vector.shape_cast %84 : vector<8x128xf32> to vector<1x8x128xf32>
      tpu.vector_store %arg14[%c0_50, %c0_51, %c0_52], %87 {strides = array<i32>} : memref<1x8x128xf32, #tpu.memory_space<vmem>>, vector<1x8x128xf32>,
    } else {
    }
    return
  }
  func.func @transform_0(%arg0: i32, %arg1: i32) -> (i32, i32, i32) {
    %c0_i32 = arith.constant 0 : i32
    %c0_i32_0 = arith.constant 0 : i32
    return %arg0, %arg1, %c0_i32 : i32, i32, i32
  }
  func.func @transform_1(%arg0: i32, %arg1: i32) -> (i32, i32) {
    %c0_i32 = arith.constant 0 : i32
    %c0_i32_0 = arith.constant 0 : i32
    %c0_i32_1 = arith.constant 0 : i32
    return %c0_i32, %c0_i32_0 : i32, i32
  }
  func.func @transform_2(%arg0: i32, %arg1: i32) -> (i32, i32) {
    %c0_i32 = arith.constant 0 : i32
    %c0_i32_0 = arith.constant 0 : i32
    %c0_i32_1 = arith.constant 0 : i32
    return %c0_i32, %c0_i32_0 : i32, i32
  }
  func.func @transform_3(%arg0: i32, %arg1: i32) -> (i32, i32) {
    %c0_i32 = arith.constant 0 : i32
    %c0_i32_0 = arith.constant 0 : i32
    %c0_i32_1 = arith.constant 0 : i32
    return %c0_i32, %c0_i32_0 : i32, i32
  }
  func.func @transform_4(%arg0: i32, %arg1: i32) -> (i32, i32) {
    %c0_i32 = arith.constant 0 : i32
    %c0_i32_0 = arith.constant 0 : i32
    %c0_i32_1 = arith.constant 0 : i32
    return %c0_i32, %c0_i32_0 : i32, i32
  }
  func.func @transform_5(%arg0: i32, %arg1: i32) -> (i32, i32) {
    %c0_i32 = arith.constant 0 : i32
    %c0_i32_0 = arith.constant 0 : i32
    %c0_i32_1 = arith.constant 0 : i32
    return %c0_i32, %c0_i32_0 : i32, i32
  }
  func.func @transform_6(%arg0: i32, %arg1: i32) -> (i32, i32) {
    %c0_i32 = arith.constant 0 : i32
    %c0_i32_0 = arith.constant 0 : i32
    %c0_i32_1 = arith.constant 0 : i32
    return %c0_i32, %c0_i32_0 : i32, i32
  }
  func.func @transform_7(%arg0: i32, %arg1: i32) -> (i32, i32) {
    %c0_i32 = arith.constant 0 : i32
    %c0_i32_0 = arith.constant 0 : i32
    %c0_i32_1 = arith.constant 0 : i32
    return %c0_i32, %c0_i32_0 : i32, i32
  }
  func.func @transform_8(%arg0: i32, %arg1: i32) -> (i32, i32) {
    %c0_i32 = arith.constant 0 : i32
    %c0_i32_0 = arith.constant 0 : i32
    %c0_i32_1 = arith.constant 0 : i32
    return %c0_i32, %c0_i32_0 : i32, i32
  }
  func.func @transform_9(%arg0: i32, %arg1: i32) -> (i32, i32) {
    %c0_i32 = arith.constant 0 : i32
    %c0_i32_0 = arith.constant 0 : i32
    %c0_i32_1 = arith.constant 0 : i32
    return %c0_i32, %c0_i32_0 : i32, i32
  }
  func.func @transform_10(%arg0: i32, %arg1: i32) -> (i32, i32) {
    %c0_i32 = arith.constant 0 : i32
    %c0_i32_0 = arith.constant 0 : i32
    %c0_i32_1 = arith.constant 0 : i32
    return %c0_i32, %c0_i32_0 : i32, i32
  }
  func.func @transform_11(%arg0: i32, %arg1: i32) -> (i32, i32) {
    %c0_i32 = arith.constant 0 : i32
    %c0_i32_0 = arith.constant 0 : i32
    %c0_i32_1 = arith.constant 0 : i32
    return %c0_i32, %c0_i32_0 : i32, i32
  }
  func.func @transform_12(%arg0: i32, %arg1: i32) -> (i32, i32, i32) {
    %c0_i32 = arith.constant 0 : i32
    %c0_i32_0 = arith.constant 0 : i32
    %c0_i32_1 = arith.constant 0 : i32
    return %arg0, %c0_i32, %c0_i32_0 : i32, i32, i32
  }
}

</mosaic_0001>

<bundles_post_ra>
// kernel: _lambda_.4
= control target key start
LH: loop header
LB: loop body
LE: loop exit
PB: predicated region body
PF: predicated region fallthrough
CT: control target
= control target key end

     0   :  { %s2091_s21 = smov 0   ;;  %s2093_s22 = smov 0   ;;  %s2326_s0 = inlined_call_operand.vmem [shape: bf16[2,1024,128], index: 0, kind: input, shape index: {}]   ;;  %s2327_s1 = inlined_call_operand.vmem [shape: bf16[128,128], index: 1, kind: input, shape index: {}]   ;;  %s2328_s2 = inlined_call_operand.vmem [shape: f32[1,128], index: 2, kind: input, shape index: {}, may-alias: {2,4}]   ;;  %s2329_s3 = inlined_call_operand.vmem [shape: bf16[128,128], index: 3, kind: input, shape index: {}]   ;;  %s2330_s4 = inlined_call_operand.vmem [shape: f32[1,128], index: 4, kind: input, shape index: {}, may-alias: {2,4}]   ;;  %s2331_s5 = inlined_call_operand.vmem [shape: bf16[2,1024,128], index: 5, kind: output, shape index: {0}]   ;;  %s2332_s6 = inlined_call_operand.vmem [shape: bf16[2,1024,128], index: 6, kind: output, shape index: {1}]  }
   0x1   :  { %s2095_s23 = smov 0   ;;  %s2097_s24 = smov 0  }
   0x2   :  { %s2099_s25 = smov 0  }
   0x3 LB: > { %s26_s26 = sadd.s32 1, %s2046_s23  ;;  %s29_s27 = sadd.s32 1, %s2050_s24  ;;  %s2054_s25 = sphi %s2099_s25, %s17_s25   ;;  %s2050_s24 = sphi %s2097_s24, %s2336_s24   ;;  %s2046_s23 = sphi %s2095_s23, %s2335_s23   ;;  %s2042_s22 = sphi %s2093_s22, %s2334_s22   ;;  %s2038_s21 = sphi %s2091_s21, %s2333_s21  }
   0x4   : > { %p27_p0 = scmp.ge.s32.totalorder %s26_s26, 4  ;;  %p1436_p1 = scmp.ge.s32.totalorder %s2054_s25, 1 }
   0x5   : > { %p238_p2 = scmp.lt.s32.totalorder %s2054_s25, 9 }
   0x6   : > { %s2338_s26 = smov (%p27_p0, %s26_s26), 0  ;;  %s2340_s27 = smov (!%p27_p0, %s29_s27), %s2050_s24 }
   0x7   : > { %p239_p3 = pnand %p1436_p1, %p238_p2  ;;  %p31_p4 = scmp.ge.s32.totalorder %s2340_s27, 2 }
   0x8   : > { %s1437_s30 = sshll.u32 (!%p239_p3), %s2038_s21, 5  ;;  %p286_p5 = scmp.lt.s32.totalorder (!%p239_p3), %s2042_s22, 1 }
   0x9   : > { %s2342_s27 = smov (%p31_p4, %s2340_s27), 0  ;;  %242 = sbr.rel (%p239_p3) target bundleno = 515 (0x203), region = 40 }
   0xa   : > { %p288_p6 = scmp.lt.s32.totalorder (!%p239_p3), %s1437_s30, 127 }
   0xe   : > { %v1984_v0 = vld [vmem:[%s2327_s1 + $0x38] sm:$0xff]   ;;  %v1985_v1 = vld [vmem:[%s2327_s1 + $0x30] sm:$0xff]   ;;  %s2344_s22 = smov (!%p286_p5, %s2042_s22), 1  ;;  %v1986_v2 = vld [vmem:[%s2327_s1 + $0x28] sm:$0xff]   ;;  %s2346_s30 = smov (!%p288_p6, %s1437_s30), 127 }
   0xf   : > { %1848 = vmatprep.subr.bf16.mxu0 %v1984_v0  ;;  %s1438_s11 = sshll.u32 %s2344_s22, 7  ;;  %v1987_v3 = vld [vmem:[%s2327_s1 + $0x20] sm:$0xff]   ;;  %v2008_v4 = vld [vmem:[%s2329_s3 + $0x38] sm:$0xff]   ;;  %v1989_v7 = vld [vmem:[%s2327_s1 + $0x10] sm:$0xff]  }
  0x10   : > { %1849 = vmatpush3.bf16.msra.mxu0 %v1984_v0  ;;  %s291_s12 = sadd.s32 %s1438_s11, %s2346_s30  ;;  %1896 = vmatprep.subr.bf16.mxu1 %v2008_v4  ;;  %v1988_v6 = vld [vmem:[%s2327_s1 + $0x18] sm:$0xff]   ;;  %v1990_v8 = vld [vmem:[%s2327_s1 + $0x8] sm:$0xff]   ;;  %v1991_v9 = vld [vmem:[%s2327_s1] sm:$0xff]  }
  0x11   : > { %1850 = vmatprep.subr.bf16.mxu0 %v1985_v1  ;;  %s2133_s15 = sshll.u32 %s291_s12, 2  ;;  %1897 = vmatpush3.bf16.msra.mxu1 %v2008_v4  ;;  %v2009_v10 = vld [vmem:[%s2329_s3 + $0x30] sm:$0xff]   ;;  %v2010_v11 = vld [vmem:[%s2329_s3 + $0x28] sm:$0xff]   ;;  %v2011_v13 = vld [vmem:[%s2329_s3 + $0x20] sm:$0xff]  }
  0x12   : > { %s2139_s18 = scalar_lea.vmem %s2326_s0, %s2133_s15  ;;  %1898 = vmatprep.subr.bf16.mxu1 %v2009_v10  ;;  %v2012_v15 = vld [vmem:[%s2329_s3 + $0x18] sm:$0xff]   ;;  %v2013_v29 = vld [vmem:[%s2329_s3 + $0x10] sm:$0xff]   ;;  %v2014_v30 = vld [vmem:[%s2329_s3 + $0x8] sm:$0xff]   ;;  %s2206_s10 = scalar_lea.vmem %s2331_s5, %s2133_s15 }
  0x13   : > { %v1992_v5 = vld [vmem:[%s2139_s18] sm:$0xff]   ;;  %v1993_v12 = vld [vmem:[%s2139_s18 + $0x8] sm:$0xff]   ;;  %v1994_v14 = vld [vmem:[%s2139_s18 + $0x10] sm:$0xff]   ;;  %s2265_s16 = scalar_lea.vmem %s2332_s6, %s2133_s15 }
  0x14   : > { %1851 = vmatpush3.bf16.msra.mxu0 %v1985_v1  ;;  %1864 = vmatprep.mubr.bf16.mxu0 %v1992_v5  ;;  %v1995_v16 = vld [vmem:[%s2139_s18 + $0x18] sm:$0xff]   ;;  %v1996_v17 = vld [vmem:[%s2139_s18 + $0x20] sm:$0xff]   ;;  %v1997_v18 = vld [vmem:[%s2139_s18 + $0x28] sm:$0xff]  }
  0x15   : > { %1852 = vmatprep.subr.bf16.mxu0 %v1986_v2  ;;  %1899 = vmatpush3.bf16.msra.mxu1 %v2009_v10  ;;  %v1998_v19 = vld [vmem:[%s2139_s18 + $0x30] sm:$0xff]   ;;  %v1999_v20 = vld [vmem:[%s2139_s18 + $0x38] sm:$0xff]   ;;  %v2000_v21 = vld [vmem:[%s2139_s18 + $0x40] sm:$0xff]  }
  0x16   : > { %1900 = vmatprep.subr.bf16.mxu1 %v2010_v11  ;;  %v2001_v22 = vld [vmem:[%s2139_s18 + $0x48] sm:$0xff]   ;;  %v2002_v23 = vld [vmem:[%s2139_s18 + $0x50] sm:$0xff]   ;;  %v2003_v24 = vld [vmem:[%s2139_s18 + $0x58] sm:$0xff]  }
  0x17   : > { %v2004_v25 = vld [vmem:[%s2139_s18 + $0x60] sm:$0xff]   ;;  %v2005_v26 = vld [vmem:[%s2139_s18 + $0x68] sm:$0xff]   ;;  %v2006_v27 = vld [vmem:[%s2139_s18 + $0x70] sm:$0xff]  }
  0x18   : > { %1853 = vmatpush3.bf16.msra.mxu0 %v1986_v2  ;;  %v2007_v28 = vld [vmem:[%s2139_s18 + $0x78] sm:$0xff]   ;;  %v2015_v31 = vld [vmem:[%s2329_s3] sm:$0xff]  }
  0x19   : > { %1854 = vmatprep.subr.bf16.mxu0 %v1987_v3  ;;  %1901 = vmatpush3.bf16.msra.mxu1 %v2010_v11  ;;  %v2196_v33 = vld [vmem:[%s2328_s2] ss:$0 sm:$0xff] }
  0x1a   : > { %1902 = vmatprep.subr.bf16.mxu1 %v2011_v13 }
  0x1c   : > { %1855 = vmatpush3.bf16.msra.mxu0 %v1987_v3 }
  0x1d   : > { %1856 = vmatprep.subr.bf16.mxu0 %v1988_v6  ;;  %1903 = vmatpush3.bf16.msra.mxu1 %v2011_v13 }
  0x1e   : > { %1904 = vmatprep.subr.bf16.mxu1 %v2012_v15 }
  0x20   : > { %1857 = vmatpush3.bf16.msra.mxu0 %v1988_v6 }
  0x21   : > { %1858 = vmatprep.subr.bf16.mxu0 %v1989_v7  ;;  %1905 = vmatpush3.bf16.msra.mxu1 %v2012_v15 }
  0x22   : > { %1906 = vmatprep.subr.bf16.mxu1 %v2013_v29 }
  0x24   : > { %1859 = vmatpush3.bf16.msra.mxu0 %v1989_v7 }
  0x25   : > { %1860 = vmatprep.subr.bf16.mxu0 %v1990_v8  ;;  %1907 = vmatpush3.bf16.msra.mxu1 %v2013_v29 }
  0x26   : > { %1908 = vmatprep.subr.bf16.mxu1 %v2014_v30 }
  0x28   : > { %1861 = vmatpush3.bf16.msra.mxu0 %v1990_v8 }
  0x29   : > { %1862 = vmatprep.subr.bf16.mxu0 %v1991_v9  ;;  %1909 = vmatpush3.bf16.msra.mxu1 %v2014_v30 }
  0x2a   : > { %1910 = vmatprep.subr.bf16.mxu1 %v2015_v31 }
  0x2c   : > { %1863 = vmatpush3.bf16.msra.mxu0 %v1991_v9 }
  0x2d   : > { %1911 = vmatpush3.bf16.msra.mxu1 %v2015_v31 }
  0x2f   : > { %1865 = vmatmul.mubr.bf16.vlgmr.msra.gmra.mxu0 %v1993_v12 }
  0x30   : > { %1868 = vmatprep.mubr.bf16.mxu0 %v1994_v14 }
  0x37   : > { %1869 = vmatmul.mubr.bf16.gmra.mxu0 %v1995_v16 }
  0x38   : > { %1872 = vmatprep.mubr.bf16.mxu0 %v1996_v17 }
  0x3f   : > { %1873 = vmatmul.mubr.bf16.gmra.mxu0 %v1997_v18 }
  0x40   : > { %1876 = vmatprep.mubr.bf16.mxu0 %v1998_v19 }
  0x47   : > { %1877 = vmatmul.mubr.bf16.gmra.mxu0 %v1999_v20 }
  0x48   : > { %1880 = vmatprep.mubr.bf16.mxu0 %v2000_v21 }
  0x4f   : > { %1881 = vmatmul.mubr.bf16.gmra.mxu0 %v2001_v22 }
  0x50   : > { %1884 = vmatprep.mubr.bf16.mxu0 %v2002_v23 }
  0x57   : > { %1885 = vmatmul.mubr.bf16.gmra.mxu0 %v2003_v24 }
  0x58   : > { %1888 = vmatprep.mubr.bf16.mxu0 %v2004_v25 }
  0x5f   : > { %1889 = vmatmul.mubr.bf16.gmra.mxu0 %v2005_v26 }
  0x60   : > { %1892 = vmatprep.mubr.bf16.mxu0 %v2006_v27 }
  0x67   : > { %1893 = vmatmul.mubr.bf16.gmra.mxu0 %v2007_v28 }
  0xef   : > { %v1866_v32 = vpop.f32.mrf.mxu0 }
  0xf0   : > { %v558_v35 = vadd.f32 %v1866_v32, %v2196_v33 }
  0xf1   : > { %v549_v34 = vpop.f32.mrf.mxu0 }
  0xf2   : > { %v550_v37 = vadd.f32 %v2196_v33, %v549_v34  ;;  %v678_v40 = vmax.f32 %v558_v35, 0.0 }
  0xf3   : > { %v1867_v36 = vpop.f32.mrf.mxu0 }
  0xf4   : > { %v561_v38 = vadd.f32 %v1867_v36, %v2196_v33  ;;  %v676_v44 = vmax.f32 %v550_v37, 0.0 }
  0xf5   : > { %v552_v39 = vpop.f32.mrf.mxu0 }
  0xf6   : > { %v679_v41 = vmax.f32 %v561_v38, 0.0  ;;  %v553_v42 = vadd.f32 %v2196_v33, %v552_v39 }
  0xf7   : > { %v1870_v43 = vpop.f32.mrf.mxu0 }
  0xf8   : > { %v709_v45 = vpack.c.bf16 %v679_v41, %v678_v40  ;;  %v677_v46 = vmax.f32 %v553_v42, 0.0  ;;  %v574_v48 = vadd.f32 %v1870_v43, %v2196_v33 }
  0xf9   : > { %v565_v47 = vpop.f32.mrf.mxu0 }
  0xfa   : > { %1770 = vst [vmem:[%s2206_s10 + $0x8] sm:$0xff] %v709_v45   ;;  %v708_v49 = vpack.c.bf16 %v677_v46, %v676_v44  ;;  %v566_v51 = vadd.f32 %v2196_v33, %v565_v47  ;;  %v682_v54 = vmax.f32 %v574_v48, 0.0 }
  0xfb   : > { %v1871_v50 = vpop.f32.mrf.mxu0 }
  0xfc   : > { %v577_v52 = vadd.f32 %v1871_v50, %v2196_v33  ;;  %1614 = vst [vmem:[%s2206_s10] sm:$0xff] %v708_v49   ;;  %1912 = vmatprep.mubr.bf16.mxu1 %v708_v49  ;;  %v680_v58 = vmax.f32 %v566_v51, 0.0 }
  0xfd   : > { %v568_v53 = vpop.f32.mrf.mxu0  ;;  %1913 = vmatmul.mubr.bf16.vlgmr.msra.gmra.mxu1 %v709_v45 }
  0xfe   : > { %v683_v55 = vmax.f32 %v577_v52, 0.0  ;;  %v569_v56 = vadd.f32 %v2196_v33, %v568_v53 }
  0xff   : > { %v1874_v57 = vpop.f32.mrf.mxu0 }
 0x100   : > { %v711_v59 = vpack.c.bf16 %v683_v55, %v682_v54  ;;  %v681_v60 = vmax.f32 %v569_v56, 0.0  ;;  %v590_v63 = vadd.f32 %v1874_v57, %v2196_v33 }
 0x101   : > { %v581_v61 = vpop.f32.mrf.mxu0 }
 0x102   : > { %1772 = vst [vmem:[%s2206_s10 + $0x18] sm:$0xff] %v711_v59   ;;  %v710_v62 = vpack.c.bf16 %v681_v60, %v680_v58  ;;  %v582_v1 = vadd.f32 %v2196_v33, %v581_v61  ;;  %v686_v4 = vmax.f32 %v590_v63, 0.0 }
 0x103   : > { %v1875_v0 = vpop.f32.mrf.mxu0 }
 0x104   : > { %1771 = vst [vmem:[%s2206_s10 + $0x10] sm:$0xff] %v710_v62   ;;  %v593_v2 = vadd.f32 %v1875_v0, %v2196_v33  ;;  %1916 = vmatprep.mubr.bf16.mxu1 %v710_v62  ;;  %v684_v8 = vmax.f32 %v582_v1, 0.0 }
 0x105   : > { %v584_v3 = vpop.f32.mrf.mxu0  ;;  %1917 = vmatmul.mubr.bf16.gmra.mxu1 %v711_v59 }
 0x106   : > { %v687_v5 = vmax.f32 %v593_v2, 0.0  ;;  %v585_v6 = vadd.f32 %v2196_v33, %v584_v3 }
 0x107   : > { %v1878_v7 = vpop.f32.mrf.mxu0 }
 0x108   : > { %v713_v9 = vpack.c.bf16 %v687_v5, %v686_v4  ;;  %v685_v10 = vmax.f32 %v585_v6, 0.0  ;;  %v606_v13 = vadd.f32 %v1878_v7, %v2196_v33 }
 0x109   : > { %v597_v11 = vpop.f32.mrf.mxu0 }
 0x10a   : > { %1774 = vst [vmem:[%s2206_s10 + $0x28] sm:$0xff] %v713_v9   ;;  %v712_v12 = vpack.c.bf16 %v685_v10, %v684_v8  ;;  %v598_v15 = vadd.f32 %v2196_v33, %v597_v11  ;;  %v690_v18 = vmax.f32 %v606_v13, 0.0 }
 0x10b   : > { %v1879_v14 = vpop.f32.mrf.mxu0 }
 0x10c   : > { %1773 = vst [vmem:[%s2206_s10 + $0x20] sm:$0xff] %v712_v12   ;;  %v609_v16 = vadd.f32 %v1879_v14, %v2196_v33  ;;  %1920 = vmatprep.mubr.bf16.mxu1 %v712_v12  ;;  %v688_v22 = vmax.f32 %v598_v15, 0.0 }
 0x10d   : > { %v600_v17 = vpop.f32.mrf.mxu0  ;;  %1921 = vmatmul.mubr.bf16.gmra.mxu1 %v713_v9 }
 0x10e   : > { %v691_v19 = vmax.f32 %v609_v16, 0.0  ;;  %v601_v20 = vadd.f32 %v2196_v33, %v600_v17 }
 0x10f   : > { %v1882_v21 = vpop.f32.mrf.mxu0 }
 0x110   : > { %v715_v23 = vpack.c.bf16 %v691_v19, %v690_v18  ;;  %v689_v24 = vmax.f32 %v601_v20, 0.0  ;;  %v622_v27 = vadd.f32 %v1882_v21, %v2196_v33  ;;  %v2255_v19 = vld [vmem:[%s2330_s4] ss:$0 sm:$0xff] }
 0x111   : > { %v613_v25 = vpop.f32.mrf.mxu0 }
 0x112   : > { %1776 = vst [vmem:[%s2206_s10 + $0x38] sm:$0xff] %v715_v23   ;;  %v714_v26 = vpack.c.bf16 %v689_v24, %v688_v22  ;;  %v614_v29 = vadd.f32 %v2196_v33, %v613_v25  ;;  %v694_v32 = vmax.f32 %v622_v27, 0.0 }
 0x113   : > { %v1883_v28 = vpop.f32.mrf.mxu0 }
 0x114   : > { %1775 = vst [vmem:[%s2206_s10 + $0x30] sm:$0xff] %v714_v26   ;;  %v625_v30 = vadd.f32 %v1883_v28, %v2196_v33  ;;  %1924 = vmatprep.mubr.bf16.mxu1 %v714_v26  ;;  %v692_v37 = vmax.f32 %v614_v29, 0.0 }
 0x115   : > { %v616_v31 = vpop.f32.mrf.mxu0  ;;  %1925 = vmatmul.mubr.bf16.gmra.mxu1 %v715_v23 }
 0x116   : > { %v695_v34 = vmax.f32 %v625_v30, 0.0  ;;  %v617_v35 = vadd.f32 %v2196_v33, %v616_v31 }
 0x117   : > { %v1886_v36 = vpop.f32.mrf.mxu0 }
 0x118   : > { %v717_v38 = vpack.c.bf16 %v695_v34, %v694_v32  ;;  %v693_v39 = vmax.f32 %v617_v35, 0.0  ;;  %v638_v42 = vadd.f32 %v1886_v36, %v2196_v33 }
 0x119   : > { %v629_v40 = vpop.f32.mrf.mxu0 }
 0x11a   : > { %1778 = vst [vmem:[%s2206_s10 + $0x48] sm:$0xff] %v717_v38   ;;  %v716_v41 = vpack.c.bf16 %v693_v39, %v692_v37  ;;  %v630_v44 = vadd.f32 %v2196_v33, %v629_v40  ;;  %v698_v47 = vmax.f32 %v638_v42, 0.0 }
 0x11b   : > { %v1887_v43 = vpop.f32.mrf.mxu0 }
 0x11c   : > { %1777 = vst [vmem:[%s2206_s10 + $0x40] sm:$0xff] %v716_v41   ;;  %v641_v45 = vadd.f32 %v1887_v43, %v2196_v33  ;;  %1928 = vmatprep.mubr.bf16.mxu1 %v716_v41  ;;  %v696_v51 = vmax.f32 %v630_v44, 0.0 }
 0x11d   : > { %v632_v46 = vpop.f32.mrf.mxu0  ;;  %1929 = vmatmul.mubr.bf16.gmra.mxu1 %v717_v38 }
 0x11e   : > { %v699_v48 = vmax.f32 %v641_v45, 0.0  ;;  %v633_v49 = vadd.f32 %v2196_v33, %v632_v46 }
 0x11f   : > { %v1890_v50 = vpop.f32.mrf.mxu0 }
 0x120   : > { %v719_v52 = vpack.c.bf16 %v699_v48, %v698_v47  ;;  %v697_v53 = vmax.f32 %v633_v49, 0.0  ;;  %v654_v56 = vadd.f32 %v1890_v50, %v2196_v33 }
 0x121   : > { %v645_v54 = vpop.f32.mrf.mxu0 }
 0x122   : > { %1780 = vst [vmem:[%s2206_s10 + $0x58] sm:$0xff] %v719_v52   ;;  %v718_v55 = vpack.c.bf16 %v697_v53, %v696_v51  ;;  %v646_v58 = vadd.f32 %v2196_v33, %v645_v54  ;;  %v702_v61 = vmax.f32 %v654_v56, 0.0 }
 0x123   : > { %v1891_v57 = vpop.f32.mrf.mxu0 }
 0x124   : > { %1779 = vst [vmem:[%s2206_s10 + $0x50] sm:$0xff] %v718_v55   ;;  %v657_v59 = vadd.f32 %v1891_v57, %v2196_v33  ;;  %1932 = vmatprep.mubr.bf16.mxu1 %v718_v55  ;;  %v700_v1 = vmax.f32 %v646_v58, 0.0 }
 0x125   : > { %v648_v60 = vpop.f32.mrf.mxu0  ;;  %1933 = vmatmul.mubr.bf16.gmra.mxu1 %v719_v52 }
 0x126   : > { %v703_v62 = vmax.f32 %v657_v59, 0.0  ;;  %v649_v63 = vadd.f32 %v2196_v33, %v648_v60 }
 0x127   : > { %v1894_v0 = vpop.f32.mrf.mxu0 }
 0x128   : > { %v721_v2 = vpack.c.bf16 %v703_v62, %v702_v61  ;;  %v701_v3 = vmax.f32 %v649_v63, 0.0  ;;  %v670_v6 = vadd.f32 %v1894_v0, %v2196_v33 }
 0x129   : > { %v661_v4 = vpop.f32.mrf.mxu0 }
 0x12a   : > { %1782 = vst [vmem:[%s2206_s10 + $0x68] sm:$0xff] %v721_v2   ;;  %v720_v5 = vpack.c.bf16 %v701_v3, %v700_v1  ;;  %v662_v8 = vadd.f32 %v2196_v33, %v661_v4  ;;  %v706_v11 = vmax.f32 %v670_v6, 0.0 }
 0x12b   : > { %v1895_v7 = vpop.f32.mrf.mxu0 }
 0x12c   : > { %1781 = vst [vmem:[%s2206_s10 + $0x60] sm:$0xff] %v720_v5   ;;  %v673_v9 = vadd.f32 %v1895_v7, %v2196_v33  ;;  %1936 = vmatprep.mubr.bf16.mxu1 %v720_v5  ;;  %v704_v14 = vmax.f32 %v662_v8, 0.0 }
 0x12d   : > { %v664_v10 = vpop.f32.mrf.mxu0  ;;  %1937 = vmatmul.mubr.bf16.gmra.mxu1 %v721_v2 }
 0x12e   : > { %v707_v12 = vmax.f32 %v673_v9, 0.0  ;;  %v665_v13 = vadd.f32 %v2196_v33, %v664_v10 }
 0x130   : > { %v723_v15 = vpack.c.bf16 %v707_v12, %v706_v11  ;;  %v705_v16 = vmax.f32 %v665_v13, 0.0 }
 0x132   : > { %1784 = vst [vmem:[%s2206_s10 + $0x78] sm:$0xff] %v723_v15   ;;  %v722_v17 = vpack.c.bf16 %v705_v16, %v704_v14 }
 0x134   : > { %1783 = vst [vmem:[%s2206_s10 + $0x70] sm:$0xff] %v722_v17   ;;  %1940 = vmatprep.mubr.bf16.mxu1 %v722_v17 }
 0x135   : > { %1941 = vmatmul.mubr.bf16.gmra.mxu1 %v723_v15 }
 0x1bd   : > { %v1914_v18 = vpop.f32.mrf.mxu1 }
 0x1be   : > { %v982_v21 = vadd.f32 %v1914_v18, %v2255_v19 }
 0x1bf   : > { %v973_v20 = vpop.f32.mrf.mxu1 }
 0x1c0   : > { %v974_v33 = vadd.f32 %v2255_v19, %v973_v20  ;;  %v1102_v25 = vmax.f32 %v982_v21, 0.0 }
 0x1c1   : > { %v1915_v22 = vpop.f32.mrf.mxu1 }
 0x1c2   : > { %v985_v23 = vadd.f32 %v1915_v22, %v2255_v19  ;;  %v1100_v29 = vmax.f32 %v974_v33, 0.0 }
 0x1c3   : > { %v976_v24 = vpop.f32.mrf.mxu1 }
 0x1c4   : > { %v1103_v26 = vmax.f32 %v985_v23, 0.0  ;;  %v977_v27 = vadd.f32 %v2255_v19, %v976_v24 }
 0x1c5   : > { %v1918_v28 = vpop.f32.mrf.mxu1 }
 0x1c6   : > { %v1698_v30 = vpack.c.bf16 %v1103_v26, %v1102_v25  ;;  %v1101_v31 = vmax.f32 %v977_v27, 0.0  ;;  %v998_v35 = vadd.f32 %v1918_v28, %v2255_v19 }
 0x1c7   : > { %v989_v32 = vpop.f32.mrf.mxu1 }
 0x1c8   : > { %1785 = vst [vmem:[%s2265_s16 + $0x8] sm:$0xff] %v1698_v30   ;;  %v1693_v34 = vpack.c.bf16 %v1101_v31, %v1100_v29  ;;  %v990_v37 = vadd.f32 %v2255_v19, %v989_v32  ;;  %v1106_v40 = vmax.f32 %v998_v35, 0.0 }
 0x1c9   : > { %v1919_v36 = vpop.f32.mrf.mxu1 }
 0x1ca   : > { %1694 = vst [vmem:[%s2265_s16] sm:$0xff] %v1693_v34   ;;  %v1001_v38 = vadd.f32 %v1919_v36, %v2255_v19  ;;  %v1104_v44 = vmax.f32 %v990_v37, 0.0 }
 0x1cb   : > { %v992_v39 = vpop.f32.mrf.mxu1 }
 0x1cc   : > { %v1107_v41 = vmax.f32 %v1001_v38, 0.0  ;;  %v993_v42 = vadd.f32 %v2255_v19, %v992_v39 }
 0x1cd   : > { %v1922_v43 = vpop.f32.mrf.mxu1 }
 0x1ce   : > { %v1708_v45 = vpack.c.bf16 %v1107_v41, %v1106_v40  ;;  %v1105_v46 = vmax.f32 %v993_v42, 0.0  ;;  %v1014_v49 = vadd.f32 %v1922_v43, %v2255_v19 }
 0x1cf   : > { %v1005_v47 = vpop.f32.mrf.mxu1 }
 0x1d0   : > { %1787 = vst [vmem:[%s2265_s16 + $0x18] sm:$0xff] %v1708_v45   ;;  %v1703_v48 = vpack.c.bf16 %v1105_v46, %v1104_v44  ;;  %v1006_v51 = vadd.f32 %v2255_v19, %v1005_v47  ;;  %v1110_v54 = vmax.f32 %v1014_v49, 0.0 }
 0x1d1   : > { %v1923_v50 = vpop.f32.mrf.mxu1 }
 0x1d2   : > { %1786 = vst [vmem:[%s2265_s16 + $0x10] sm:$0xff] %v1703_v48   ;;  %v1017_v52 = vadd.f32 %v1923_v50, %v2255_v19  ;;  %v1108_v58 = vmax.f32 %v1006_v51, 0.0 }
 0x1d3   : > { %v1008_v53 = vpop.f32.mrf.mxu1 }
 0x1d4   : > { %v1111_v55 = vmax.f32 %v1017_v52, 0.0  ;;  %v1009_v56 = vadd.f32 %v2255_v19, %v1008_v53 }
 0x1d5   : > { %v1926_v57 = vpop.f32.mrf.mxu1 }
 0x1d6   : > { %v1718_v59 = vpack.c.bf16 %v1111_v55, %v1110_v54  ;;  %v1109_v60 = vmax.f32 %v1009_v56, 0.0  ;;  %v1030_v63 = vadd.f32 %v1926_v57, %v2255_v19 }
 0x1d7   : > { %v1021_v61 = vpop.f32.mrf.mxu1 }
 0x1d8   : > { %1789 = vst [vmem:[%s2265_s16 + $0x28] sm:$0xff] %v1718_v59   ;;  %v1713_v62 = vpack.c.bf16 %v1109_v60, %v1108_v58  ;;  %v1022_v1 = vadd.f32 %v2255_v19, %v1021_v61  ;;  %v1114_v4 = vmax.f32 %v1030_v63, 0.0 }
 0x1d9   : > { %v1927_v0 = vpop.f32.mrf.mxu1 }
 0x1da   : > { %1788 = vst [vmem:[%s2265_s16 + $0x20] sm:$0xff] %v1713_v62   ;;  %v1033_v2 = vadd.f32 %v1927_v0, %v2255_v19  ;;  %v1112_v8 = vmax.f32 %v1022_v1, 0.0 }
 0x1db   : > { %v1024_v3 = vpop.f32.mrf.mxu1 }
 0x1dc   : > { %v1115_v5 = vmax.f32 %v1033_v2, 0.0  ;;  %v1025_v6 = vadd.f32 %v2255_v19, %v1024_v3 }
 0x1dd   : > { %v1930_v7 = vpop.f32.mrf.mxu1 }
 0x1de   : > { %v1728_v9 = vpack.c.bf16 %v1115_v5, %v1114_v4  ;;  %v1113_v10 = vmax.f32 %v1025_v6, 0.0  ;;  %v1046_v13 = vadd.f32 %v1930_v7, %v2255_v19 }
 0x1df   : > { %v1037_v11 = vpop.f32.mrf.mxu1 }
 0x1e0   : > { %1791 = vst [vmem:[%s2265_s16 + $0x38] sm:$0xff] %v1728_v9   ;;  %v1723_v12 = vpack.c.bf16 %v1113_v10, %v1112_v8  ;;  %v1038_v15 = vadd.f32 %v2255_v19, %v1037_v11  ;;  %v1118_v18 = vmax.f32 %v1046_v13, 0.0 }
 0x1e1   : > { %v1931_v14 = vpop.f32.mrf.mxu1 }
 0x1e2   : > { %1790 = vst [vmem:[%s2265_s16 + $0x30] sm:$0xff] %v1723_v12   ;;  %v1049_v16 = vadd.f32 %v1931_v14, %v2255_v19  ;;  %v1116_v33 = vmax.f32 %v1038_v15, 0.0 }
 0x1e3   : > { %v1040_v17 = vpop.f32.mrf.mxu1 }
 0x1e4   : > { %v1119_v20 = vmax.f32 %v1049_v16, 0.0  ;;  %v1041_v21 = vadd.f32 %v2255_v19, %v1040_v17 }
 0x1e5   : > { %v1934_v22 = vpop.f32.mrf.mxu1 }
 0x1e6   : > { %v1738_v23 = vpack.c.bf16 %v1119_v20, %v1118_v18  ;;  %v1117_v24 = vmax.f32 %v1041_v21, 0.0  ;;  %v1062_v27 = vadd.f32 %v1934_v22, %v2255_v19 }
 0x1e7   : > { %v1053_v25 = vpop.f32.mrf.mxu1 }
 0x1e8   : > { %1793 = vst [vmem:[%s2265_s16 + $0x48] sm:$0xff] %v1738_v23   ;;  %v1733_v26 = vpack.c.bf16 %v1117_v24, %v1116_v33  ;;  %v1054_v29 = vadd.f32 %v2255_v19, %v1053_v25  ;;  %v1122_v32 = vmax.f32 %v1062_v27, 0.0 }
 0x1e9   : > { %v1935_v28 = vpop.f32.mrf.mxu1 }
 0x1ea   : > { %1792 = vst [vmem:[%s2265_s16 + $0x40] sm:$0xff] %v1733_v26   ;;  %v1065_v30 = vadd.f32 %v1935_v28, %v2255_v19  ;;  %v1120_v37 = vmax.f32 %v1054_v29, 0.0 }
 0x1eb   : > { %v1056_v31 = vpop.f32.mrf.mxu1 }
 0x1ec   : > { %v1123_v34 = vmax.f32 %v1065_v30, 0.0  ;;  %v1057_v35 = vadd.f32 %v2255_v19, %v1056_v31 }
 0x1ed   : > { %v1938_v36 = vpop.f32.mrf.mxu1 }
 0x1ee   : > { %v1748_v38 = vpack.c.bf16 %v1123_v34, %v1122_v32  ;;  %v1121_v39 = vmax.f32 %v1057_v35, 0.0  ;;  %v1078_v42 = vadd.f32 %v1938_v36, %v2255_v19 }
 0x1ef   : > { %v1069_v40 = vpop.f32.mrf.mxu1 }
 0x1f0   : > { %1795 = vst [vmem:[%s2265_s16 + $0x58] sm:$0xff] %v1748_v38   ;;  %v1743_v41 = vpack.c.bf16 %v1121_v39, %v1120_v37  ;;  %v1070_v44 = vadd.f32 %v2255_v19, %v1069_v40  ;;  %v1126_v47 = vmax.f32 %v1078_v42, 0.0 }
 0x1f1   : > { %v1939_v43 = vpop.f32.mrf.mxu1 }
 0x1f2   : > { %1794 = vst [vmem:[%s2265_s16 + $0x50] sm:$0xff] %v1743_v41   ;;  %v1081_v45 = vadd.f32 %v1939_v43, %v2255_v19  ;;  %v1124_v51 = vmax.f32 %v1070_v44, 0.0 }
 0x1f3   : > { %v1072_v46 = vpop.f32.mrf.mxu1 }
 0x1f4   : > { %v1127_v48 = vmax.f32 %v1081_v45, 0.0  ;;  %v1073_v49 = vadd.f32 %v2255_v19, %v1072_v46 }
 0x1f5   : > { %v1942_v50 = vpop.f32.mrf.mxu1 }
 0x1f6   : > { %v1758_v52 = vpack.c.bf16 %v1127_v48, %v1126_v47  ;;  %v1125_v53 = vmax.f32 %v1073_v49, 0.0  ;;  %v1094_v56 = vadd.f32 %v1942_v50, %v2255_v19 }
 0x1f7   : > { %v1085_v54 = vpop.f32.mrf.mxu1 }
 0x1f8   : > { %1797 = vst [vmem:[%s2265_s16 + $0x68] sm:$0xff] %v1758_v52   ;;  %v1753_v55 = vpack.c.bf16 %v1125_v53, %v1124_v51  ;;  %v1086_v58 = vadd.f32 %v2255_v19, %v1085_v54  ;;  %v1130_v61 = vmax.f32 %v1094_v56, 0.0 }
 0x1f9   : > { %v1943_v57 = vpop.f32.mrf.mxu1 }
 0x1fa   : > { %1796 = vst [vmem:[%s2265_s16 + $0x60] sm:$0xff] %v1753_v55   ;;  %v1097_v59 = vadd.f32 %v1943_v57, %v2255_v19  ;;  %v1128_v0 = vmax.f32 %v1086_v58, 0.0 }
 0x1fb   : > { %v1088_v60 = vpop.f32.mrf.mxu1 }
 0x1fc   : > { %v1131_v62 = vmax.f32 %v1097_v59, 0.0  ;;  %v1089_v63 = vadd.f32 %v2255_v19, %v1088_v60 }
 0x1fe   : > { %v1768_v1 = vpack.c.bf16 %v1131_v62, %v1130_v61  ;;  %v1129_v2 = vmax.f32 %v1089_v63, 0.0 }
 0x200   : > { %1799 = vst [vmem:[%s2265_s16 + $0x78] sm:$0xff] %v1768_v1   ;;  %v1763_v3 = vpack.c.bf16 %v1129_v2, %v1128_v0 }
 0x202   : > { %1798 = vst [vmem:[%s2265_s16 + $0x70] sm:$0xff] %v1763_v3  }
 0x203 PF: > { %s17_s25 = sadd.s32 1, %s2054_s25   ;;  %s2333_s21 = smov %s2046_s23 }
 0x204   : > { %p14_p7 = scmp.ge.s32.totalorder %s17_s25, 10   ;;  %s2334_s22 = smov %s2050_s24 }
 0x205   : > { %s2335_s23 = smov %s2338_s26  ;;  %s2336_s24 = smov %s2342_s27 }
 0x206   :  { %16 = sbr.rel (!%p14_p7) target bundleno = 3 (0x3), region = 82 }

// kernel: _lambda_.5
= control target key start
LH: loop header
LB: loop body
LE: loop exit
PB: predicated region body
PF: predicated region fallthrough
CT: control target
= control target key end

     0   :  { %s4881_s21 = smov 0   ;;  %s4883_s22 = smov 0   ;;  %s5785_s0 = inlined_call_operand.vmem [shape: bf16[2,256,1152], index: 0, kind: input, shape index: {}]   ;;  %s5786_s1 = inlined_call_operand.vmem [shape: bf16[1152,128], index: 1, kind: input, shape index: {}]   ;;  %s5787_s2 = inlined_call_operand.vmem [shape: f32[1,128], index: 2, kind: input, shape index: {}, may-alias: {2,4}]   ;;  %s5788_s3 = inlined_call_operand.vmem [shape: bf16[128,128], index: 3, kind: input, shape index: {}]   ;;  %s5789_s4 = inlined_call_operand.vmem [shape: f32[1,128], index: 4, kind: input, shape index: {}, may-alias: {2,4}]   ;;  %s5790_s5 = inlined_call_operand.vmem [shape: bf16[2,256,128], index: 5, kind: output, shape index: {0}]   ;;  %s5791_s6 = inlined_call_operand.vmem [shape: bf16[2,256,128], index: 6, kind: output, shape index: {1}]  }
   0x1   :  { %s4885_s23 = smov 0  }
   0x2 LB: > { %s29_s24 = sadd.s32 1, %s4840_s22  ;;  %p3363_p0 = scmp.ge.s32.totalorder %s4844_s23, 1  ;;  %s4844_s23 = sphi %s4885_s23, %s17_s23   ;;  %s4840_s22 = sphi %s4883_s22, %s5847_s22   ;;  %s4836_s21 = sphi %s4881_s21, %s5846_s21  }
   0x3   : > { %p31_p1 = scmp.ge.s32.totalorder %s29_s24, 2  ;;  %p239_p2 = scmp.lt.s32.totalorder %s4844_s23, 3 }
   0x5   : > { %s5849_s24 = smov (%p31_p1, %s29_s24), 0  ;;  %p240_p3 = pnand %p3363_p0, %p239_p2 }
   0x7   : > { %243 = sbr.rel (%p240_p3) target bundleno = 769 (0x301), region = 40 }
   0xc   : > { %v4534_v0 = vld [vmem:[%s5786_s1 + $0x78] sm:$0xff]   ;;  %v4538_v4 = vld [vmem:[%s5786_s1 + $0x70] sm:$0xff]   ;;  %v4542_v8 = vld [vmem:[%s5786_s1 + $0x68] sm:$0xff]   ;;  %p288_p4 = scmp.lt.s32.totalorder %s4836_s21, 1 }
   0xd   : > { %v4535_v1 = vld [vmem:[%s5786_s1 + $0x38] sm:$0xff]   ;;  %3917 = vmatprep.subr.bf16.mxu0 %v4534_v0  ;;  %v4539_v5 = vld [vmem:[%s5786_s1 + $0x30] sm:$0xff]   ;;  %v4543_v9 = vld [vmem:[%s5786_s1 + $0x28] sm:$0xff]  }
   0xe   : > { %v4536_v2 = vld [vmem:[%s5786_s1 + $0xf8] sm:$0xff]   ;;  %3918 = vmatpush3.bf16.msra.mxu0 %v4535_v1  ;;  %v4540_v6 = vld [vmem:[%s5786_s1 + $0xf0] sm:$0xff]   ;;  %v4544_v10 = vld [vmem:[%s5786_s1 + $0xe8] sm:$0xff]   ;;  %s5851_s21 = smov (!%p288_p4, %s4836_s21), 1 }
   0xf   : > { %v4537_v3 = vld [vmem:[%s5786_s1 + $0xb8] sm:$0xff]   ;;  %4029 = vmatprep.subr.bf16.mxu1 %v4536_v2  ;;  %3919 = vmatprep.subr.bf16.mxu0 %v4538_v4  ;;  %v4541_v7 = vld [vmem:[%s5786_s1 + $0xb0] sm:$0xff]   ;;  %v4545_v11 = vld [vmem:[%s5786_s1 + $0xa8] sm:$0xff]   ;;  %s4509_s11 = smul.u32 1152, %s5851_s21 }
  0x10   : > { %4030 = vmatpush3.bf16.msra.mxu1 %v4537_v3  ;;  %v4546_v12 = vld [vmem:[%s5786_s1 + $0x60] sm:$0xff]   ;;  %v4550_v16 = vld [vmem:[%s5786_s1 + $0x58] sm:$0xff]   ;;  %v4554_v20 = vld [vmem:[%s5786_s1 + $0x50] sm:$0xff]  }
  0x11   : > { %4031 = vmatprep.subr.bf16.mxu1 %v4540_v6  ;;  %v4547_v13 = vld [vmem:[%s5786_s1 + $0x20] sm:$0xff]   ;;  %v4551_v17 = vld [vmem:[%s5786_s1 + $0x18] sm:$0xff]   ;;  %v4555_v21 = vld [vmem:[%s5786_s1 + $0x10] sm:$0xff]   ;;  %s4996_s26 = scalar_lea.vmem %s5785_s0, %s4509_s11  ;;  %s3661_s11 = sshll.u32 %s5851_s21, 7 }
  0x12   : > { %3920 = vmatpush3.bf16.msra.mxu0 %v4539_v5  ;;  %v4548_v14 = vld [vmem:[%s5786_s1 + $0xe0] sm:$0xff]   ;;  %v4552_v18 = vld [vmem:[%s5786_s1 + $0xd8] sm:$0xff]   ;;  %v4556_v22 = vld [vmem:[%s5786_s1 + $0xd0] sm:$0xff]   ;;  %s5608_s14 = scalar_lea.vmem %s5790_s5, %s3661_s11  ;;  %s5730_s19 = scalar_lea.vmem %s5791_s6, %s3661_s11 }
  0x13   : > { %3921 = vmatprep.subr.bf16.mxu0 %v4542_v8  ;;  %v4549_v15 = vld [vmem:[%s5786_s1 + $0xa0] sm:$0xff]   ;;  %v4553_v19 = vld [vmem:[%s5786_s1 + $0x98] sm:$0xff]   ;;  %v4557_v23 = vld [vmem:[%s5786_s1 + $0x90] sm:$0xff]  }
  0x14   : > { %4032 = vmatpush3.bf16.msra.mxu1 %v4541_v7  ;;  %v4558_v24 = vld [vmem:[%s5786_s1 + $0x48] sm:$0xff]   ;;  %v4562_v28 = vld [vmem:[%s5786_s1 + $0x40] sm:$0xff]   ;;  %v4569_v34 = vld [vmem:[%s5786_s1 + $0x178] sm:$0xff]  }
  0x15   : > { %4033 = vmatprep.subr.bf16.mxu1 %v4544_v10  ;;  %v4559_v25 = vld [vmem:[%s5786_s1 + $0x8] sm:$0xff]   ;;  %v4563_v29 = vld [vmem:[%s5786_s1] sm:$0xff]   ;;  %v4573_v37 = vld [vmem:[%s5786_s1 + $0x138] sm:$0xff]  }
  0x16   : > { %3922 = vmatpush3.bf16.msra.mxu0 %v4543_v9  ;;  %v4560_v26 = vld [vmem:[%s5786_s1 + $0xc8] sm:$0xff]   ;;  %v4564_v30 = vld [vmem:[%s5786_s1 + $0xc0] sm:$0xff]   ;;  %v4577_v39 = vld [vmem:[%s4996_s26 + $0x54] ss:$36 sps:$4 sm:$0xff]  }
  0x17   : > { %3923 = vmatprep.subr.bf16.mxu0 %v4546_v12  ;;  %v4561_v27 = vld [vmem:[%s5786_s1 + $0x88] sm:$0xff]   ;;  %v4565_v31 = vld [vmem:[%s4996_s26] ss:$36 sps:$4 sm:$0xff]   ;;  %v4580_v41 = vld [vmem:[%s4996_s26 + $0x94] ss:$36 sps:$4 sm:$0xff]  }
  0x18   : > { %4034 = vmatpush3.bf16.msra.mxu1 %v4545_v11  ;;  %v4567_v32 = vld [vmem:[%s4996_s26 + $0x4] ss:$36 sps:$4 sm:$0xff]   ;;  %v4572_v36 = vld [vmem:[%s4996_s26 + $0xc] ss:$36 sps:$4 sm:$0xff]   ;;  %v4584_v44 = vld [vmem:[%s4996_s26 + $0x9c] ss:$36 sps:$4 sm:$0xff]  }
  0x19   : > { %4035 = vmatprep.subr.bf16.mxu1 %v4548_v14  ;;  %v4568_v33 = vld [vmem:[%s5786_s1 + $0x80] sm:$0xff]   ;;  %1830 = vmatprep.mubr.bf16.mxu0 %v4567_v32  ;;  %v4570_v35 = vld [vmem:[%s4996_s26 + $0x8] ss:$36 sps:$4 sm:$0xff]   ;;  %v4583_v42 = vld [vmem:[%s5786_s1 + $0x170] sm:$0xff]  }
  0x1a   : > { %3924 = vmatpush3.bf16.msra.mxu0 %v4547_v13  ;;  %1991 = vmatprep.mubr.bf16.mxu1 %v4572_v36  ;;  %v4574_v38 = vld [vmem:[%s4996_s26 + $0x4c] ss:$36 sps:$4 sm:$0xff]   ;;  %v4588_v47 = vld [vmem:[%s4996_s26 + $0xdc] ss:$36 sps:$4 sm:$0xff]   ;;  %v4591_v51 = vld [vmem:[%s4996_s26 + $0xe4] ss:$36 sps:$4 sm:$0xff]  }
  0x1b   : > { %3925 = vmatprep.subr.bf16.mxu0 %v4550_v16  ;;  %v4576_v40 = vld [vmem:[%s4996_s26 + $0x48] ss:$36 sps:$4 sm:$0xff]   ;;  %v4579_v43 = vld [vmem:[%s4996_s26 + $0x50] ss:$36 sps:$4 sm:$0xff]   ;;  %v4587_v49 = vld [vmem:[%s4996_s26 + $0x98] ss:$36 sps:$4 sm:$0xff]  }
  0x1c   : > { %4036 = vmatpush3.bf16.msra.mxu1 %v4549_v15  ;;  %v4586_v45 = vld [vmem:[%s5786_s1 + $0x130] sm:$0xff]   ;;  %v4597_v48 = vld [vmem:[%s5786_s1 + $0x168] sm:$0xff]   ;;  %v4590_v52 = vld [vmem:[%s4996_s26 + $0xd8] ss:$36 sps:$4 sm:$0xff]  }
  0x1d   : > { %4037 = vmatprep.subr.bf16.mxu1 %v4552_v18  ;;  %v4582_v46 = vld [vmem:[%s4996_s26 + $0x90] ss:$36 sps:$4 sm:$0xff]   ;;  %v4600_v50 = vld [vmem:[%s5786_s1 + $0x128] sm:$0xff]   ;;  %v4611_v54 = vld [vmem:[%s5786_s1 + $0x160] sm:$0xff]  }
  0x1e   : > { %3926 = vmatpush3.bf16.msra.mxu0 %v4551_v17  ;;  %v4594_v53 = vld [vmem:[%s4996_s26 + $0x124] ss:$36 sps:$4 sm:$0xff]   ;;  %v4598_v57 = vld [vmem:[%s4996_s26 + $0x12c] ss:$36 sps:$4 sm:$0xff]   ;;  %v4622_v59 = vld [vmem:[%s5786_s1 + $0x1f8] sm:$0xff]  }
  0x1f   : > { %3927 = vmatprep.subr.bf16.mxu0 %v4554_v20  ;;  %v4593_v55 = vld [vmem:[%s4996_s26 + $0xe0] ss:$36 sps:$4 sm:$0xff]   ;;  %v4623_v60 = vld [vmem:[%s5786_s1 + $0x1b8] sm:$0xff]   ;;  %v4602_v61 = vld [vmem:[%s4996_s26 + $0x16c] ss:$36 sps:$4 sm:$0xff]  }
  0x20   : > { %4038 = vmatpush3.bf16.msra.mxu1 %v4553_v19  ;;  %v4614_v56 = vld [vmem:[%s5786_s1 + $0x120] sm:$0xff]   ;;  %v4627_v62 = vld [vmem:[%s5786_s1 + $0x158] sm:$0xff]   ;;  %v4601_v63 = vld [vmem:[%s4996_s26 + $0x128] ss:$36 sps:$4 sm:$0xff]  }
  0x21   : > { %4039 = vmatprep.subr.bf16.mxu1 %v4556_v22  ;;  %v4596_v58 = vld [vmem:[%s4996_s26 + $0x120] ss:$36 sps:$4 sm:$0xff]   ;;  %v4605_v0 = vld [vmem:[%s4996_s26 + $0x174] ss:$36 sps:$4 sm:$0xff]   ;;  %v4604_v2 = vld [vmem:[%s4996_s26 + $0x168] ss:$36 sps:$4 sm:$0xff]  }
  0x22   : > { %3928 = vmatpush3.bf16.msra.mxu0 %v4555_v21  ;;  %v4630_v1 = vld [vmem:[%s5786_s1 + $0x118] sm:$0xff]   ;;  %v4638_v4 = vld [vmem:[%s5786_s1 + $0x1f0] sm:$0xff]   ;;  %v4654_v12 = vld [vmem:[%s5786_s1 + $0x1e8] sm:$0xff]  }
  0x23   : > { %3929 = vmatprep.subr.bf16.mxu0 %v4558_v24  ;;  %v4608_v3 = vld [vmem:[%s4996_s26 + $0x1b4] ss:$36 sps:$4 sm:$0xff]   ;;  %v4612_v8 = vld [vmem:[%s4996_s26 + $0x1bc] ss:$36 sps:$4 sm:$0xff]   ;;  %v4655_v13 = vld [vmem:[%s5786_s1 + $0x1a8] sm:$0xff]  }
  0x24   : > { %4040 = vmatpush3.bf16.msra.mxu1 %v4557_v23  ;;  %v4639_v5 = vld [vmem:[%s5786_s1 + $0x1b0] sm:$0xff]   ;;  %v4616_v11 = vld [vmem:[%s4996_s26 + $0x1fc] ss:$36 sps:$4 sm:$0xff]   ;;  %v4619_v15 = vld [vmem:[%s4996_s26 + $0x204] ss:$36 sps:$4 sm:$0xff]  }
  0x25   : > { %4041 = vmatprep.subr.bf16.mxu1 %v4560_v26  ;;  %v4607_v6 = vld [vmem:[%s4996_s26 + $0x170] ss:$36 sps:$4 sm:$0xff]   ;;  %v4615_v14 = vld [vmem:[%s4996_s26 + $0x1b8] ss:$36 sps:$4 sm:$0xff]   ;;  %v4659_v16 = vld [vmem:[%s5786_s1 + $0x148] sm:$0xff]  }
  0x26   : > { %3930 = vmatpush3.bf16.msra.mxu0 %v4559_v25  ;;  %v4643_v7 = vld [vmem:[%s5786_s1 + $0x150] sm:$0xff]   ;;  %v4662_v17 = vld [vmem:[%s5786_s1 + $0x108] sm:$0xff]   ;;  %v4618_v18 = vld [vmem:[%s4996_s26 + $0x1f8] ss:$36 sps:$4 sm:$0xff]  }
  0x27   : > { %3931 = vmatprep.subr.bf16.mxu0 %v4562_v28  ;;  %v4646_v9 = vld [vmem:[%s5786_s1 + $0x110] sm:$0xff]   ;;  %v4621_v19 = vld [vmem:[%s4996_s26 + $0x200] ss:$36 sps:$4 sm:$0xff]   ;;  %v4631_v28 = vld [vmem:[%s4996_s26 + $0x248] ss:$36 sps:$4 sm:$0xff]  }
  0x28   : > { %4042 = vmatpush3.bf16.msra.mxu1 %v4561_v27  ;;  %v4610_v10 = vld [vmem:[%s4996_s26 + $0x1b0] ss:$36 sps:$4 sm:$0xff]   ;;  %v4624_v20 = vld [vmem:[%s4996_s26 + $0x244] ss:$36 sps:$4 sm:$0xff]  }
  0x29   : > { %4043 = vmatprep.subr.bf16.mxu1 %v4564_v30  ;;  %v4628_v21 = vld [vmem:[%s4996_s26 + $0x24c] ss:$36 sps:$4 sm:$0xff]   ;;  %v4670_v22 = vld [vmem:[%s5786_s1 + $0x1e0] sm:$0xff]   ;;  %v4681_v30 = vld [vmem:[%s5786_s1 + $0x198] sm:$0xff]  }
  0x2a   : > { %3932 = vmatpush3.bf16.msra.mxu0 %v4563_v29  ;;  %v4671_v23 = vld [vmem:[%s5786_s1 + $0x1a0] sm:$0xff]   ;;  %v4632_v26 = vld [vmem:[%s4996_s26 + $0x28c] ss:$36 sps:$4 sm:$0xff]   ;;  %v4680_v29 = vld [vmem:[%s5786_s1 + $0x1d8] sm:$0xff]  }
  0x2b   : > { %4141 = vmatprep.subr.bf16.mxu0 %v4569_v34  ;;  %v4675_v24 = vld [vmem:[%s5786_s1 + $0x140] sm:$0xff]   ;;  %v4635_v32 = vld [vmem:[%s4996_s26 + $0x294] ss:$36 sps:$4 sm:$0xff]   ;;  %v4634_v34 = vld [vmem:[%s4996_s26 + $0x288] ss:$36 sps:$4 sm:$0xff]  }
  0x2c   : > { %4044 = vmatpush3.bf16.msra.mxu1 %v4568_v33  ;;  %v4626_v25 = vld [vmem:[%s4996_s26 + $0x240] ss:$36 sps:$4 sm:$0xff]   ;;  %v4685_v33 = vld [vmem:[%s5786_s1 + $0x190] sm:$0xff]   ;;  %v4690_v36 = vld [vmem:[%s5786_s1 + $0x1c8] sm:$0xff]  }
  0x2d   : > { %1831 = vmatmul.mubr.bf16.vlgmr.msra.gmra.mxu0 %v4565_v31  ;;  %4253 = vmatprep.subr.bf16.mxu1 %v4622_v59  ;;  %v4678_v27 = vld [vmem:[%s5786_s1 + $0x100] sm:$0xff]   ;;  %v4682_v31 = vld [vmem:[%s5786_s1 + $0x1d0] sm:$0xff]  }
  0x2e   : > { %4142 = vmatpush3.bf16.msra.mxu0 %v4573_v37  ;;  %1838 = vmatprep.mubr.bf16.mxu0 %v4574_v38  ;;  %v4691_v37 = vld [vmem:[%s5786_s1 + $0x188] sm:$0xff]   ;;  %v4692_v38 = vld [vmem:[%s5786_s1 + $0x1c0] sm:$0xff]   ;;  %v4674_v59 = vld [vmem:[%s4996_s26 + $0x3f0] ss:$36 sps:$4 sm:$0xff]  }
  0x2f   : > { %1992 = vmatmul.mubr.bf16.vlgmr.msra.gmra.mxu1 %v4570_v35  ;;  %4143 = vmatprep.subr.bf16.mxu0 %v4583_v42  ;;  %v4640_v35 = vld [vmem:[%s4996_s26 + $0x2d4] ss:$36 sps:$4 sm:$0xff]  }
  0x30   : > { %1999 = vmatprep.mubr.bf16.mxu1 %v4577_v39  ;;  %4254 = vmatpush3.bf16.msra.mxu1 %v4623_v60  ;;  %v4637_v39 = vld [vmem:[%s4996_s26 + $0x290] ss:$36 sps:$4 sm:$0xff]   ;;  %v4697_v42 = vld [vmem:[%s5786_s1 + $0x238] sm:$0xff]  }
  0x31   : > { %4255 = vmatprep.subr.bf16.mxu1 %v4638_v4  ;;  %v4683_v60 = vld [vmem:[%s4996_s26 + $0x43c] ss:$36 sps:$4 sm:$0xff]  }
  0x32   : > { %4144 = vmatpush3.bf16.msra.mxu0 %v4586_v45  ;;  %v4647_v45 = vld [vmem:[%s4996_s26 + $0x2d8] ss:$36 sps:$4 sm:$0xff]  }
  0x33   : > { %4145 = vmatprep.subr.bf16.mxu0 %v4597_v48  ;;  %v4656_v48 = vld [vmem:[%s4996_s26 + $0x364] ss:$36 sps:$4 sm:$0xff]   ;;  %v4701_v4 = vld [vmem:[%s4996_s26 + $0x5c] ss:$36 sps:$4 sm:$0xff]  }
  0x34   : > { %4256 = vmatpush3.bf16.msra.mxu1 %v4639_v5  ;;  %v4698_v5 = vld [vmem:[%s4996_s26 + $0x18] ss:$36 sps:$4 sm:$0xff]  }
  0x35   : > { %1839 = vmatmul.mubr.bf16.gmra.mxu0 %v4576_v40  ;;  %4257 = vmatprep.subr.bf16.mxu1 %v4654_v12  ;;  %v4644_v40 = vld [vmem:[%s4996_s26 + $0x2dc] ss:$36 sps:$4 sm:$0xff]  }
  0x36   : > { %1846 = vmatprep.mubr.bf16.mxu0 %v4580_v41  ;;  %4146 = vmatpush3.bf16.msra.mxu0 %v4600_v50  ;;  %v4696_v41 = vld [vmem:[%s5786_s1 + $0x180] sm:$0xff]   ;;  %v4660_v50 = vld [vmem:[%s4996_s26 + $0x36c] ss:$36 sps:$4 sm:$0xff]  }
  0x37   : > { %2000 = vmatmul.mubr.bf16.gmra.mxu1 %v4579_v43  ;;  %4147 = vmatprep.subr.bf16.mxu0 %v4611_v54  ;;  %v4642_v43 = vld [vmem:[%s4996_s26 + $0x2d0] ss:$36 sps:$4 sm:$0xff]   ;;  %v4736_v12 = vld [vmem:[%s5786_s1 + $0x220] sm:$0xff]  }
  0x38   : > { %2007 = vmatprep.mubr.bf16.mxu1 %v4584_v44  ;;  %4258 = vmatpush3.bf16.msra.mxu1 %v4655_v13  ;;  %v4648_v44 = vld [vmem:[%s4996_s26 + $0x31c] ss:$36 sps:$4 sm:$0xff]   ;;  %v4667_v54 = vld [vmem:[%s4996_s26 + $0x3b4] ss:$36 sps:$4 sm:$0xff]   ;;  %v4711_v13 = vld [vmem:[%s4996_s26 + $0xac] ss:$36 sps:$4 sm:$0xff]  }
  0x39   : > { %4259 = vmatprep.subr.bf16.mxu1 %v4670_v22  ;;  %v4720_v22 = vld [vmem:[%s4996_s26 + $0x134] ss:$36 sps:$4 sm:$0xff]  }
  0x3a   : > { %4148 = vmatpush3.bf16.msra.mxu0 %v4614_v56  ;;  %v4672_v56 = vld [vmem:[%s4996_s26 + $0x3f4] ss:$36 sps:$4 sm:$0xff]  }
  0x3b   : > { %4149 = vmatprep.subr.bf16.mxu0 %v4627_v62  ;;  %v4687_v62 = vld [vmem:[%s4996_s26 + $0x444] ss:$36 sps:$4 sm:$0xff]  }
  0x3c   : > { %4260 = vmatpush3.bf16.msra.mxu1 %v4671_v23  ;;  %v4788_v23 = vld [vmem:[%s5786_s1 + $0x200] sm:$0xff]  }
  0x3d   : > { %1847 = vmatmul.mubr.bf16.gmra.mxu0 %v4582_v46  ;;  %4261 = vmatprep.subr.bf16.mxu1 %v4680_v29  ;;  %v4651_v46 = vld [vmem:[%s4996_s26 + $0x324] ss:$36 sps:$4 sm:$0xff]  }
  0x3e   : > { %1854 = vmatprep.mubr.bf16.mxu0 %v4588_v47  ;;  %4150 = vmatpush3.bf16.msra.mxu0 %v4630_v1  ;;  %v4650_v47 = vld [vmem:[%s4996_s26 + $0x318] ss:$36 sps:$4 sm:$0xff]   ;;  %v4689_v1 = vld [vmem:[%s4996_s26 + $0x440] ss:$36 sps:$4 sm:$0xff]  }
  0x3f   : > { %2008 = vmatmul.mubr.bf16.gmra.mxu1 %v4587_v49  ;;  %4151 = vmatprep.subr.bf16.mxu0 %v4643_v7  ;;  %v4653_v49 = vld [vmem:[%s4996_s26 + $0x320] ss:$36 sps:$4 sm:$0xff]  }
  0x40   : > { %2015 = vmatprep.mubr.bf16.mxu1 %v4591_v51  ;;  %4262 = vmatpush3.bf16.msra.mxu1 %v4681_v30  ;;  %v4658_v51 = vld [vmem:[%s4996_s26 + $0x360] ss:$36 sps:$4 sm:$0xff]   ;;  %v4729_v30 = vld [vmem:[%s4996_s26 + $0x178] ss:$36 sps:$4 sm:$0xff]  }
  0x41   : > { %4263 = vmatprep.subr.bf16.mxu1 %v4682_v31  ;;  %v4704_v7 = vld [vmem:[%s4996_s26 + $0x64] ss:$36 sps:$4 sm:$0xff]  }
  0x42   : > { %4152 = vmatpush3.bf16.msra.mxu0 %v4646_v9  ;;  %v4703_v9 = vld [vmem:[%s4996_s26 + $0x58] ss:$36 sps:$4 sm:$0xff]   ;;  %v4730_v29 = vld [vmem:[%s4996_s26 + $0x184] ss:$36 sps:$4 sm:$0xff]  }
  0x43   : > { %4153 = vmatprep.subr.bf16.mxu0 %v4659_v16  ;;  %v4714_v16 = vld [vmem:[%s4996_s26 + $0xec] ss:$36 sps:$4 sm:$0xff]   ;;  %v4733_v31 = vld [vmem:[%s4996_s26 + $0x1c4] ss:$36 sps:$4 sm:$0xff]  }
  0x44   : > { %4264 = vmatpush3.bf16.msra.mxu1 %v4685_v33  ;;  %v4737_v33 = vld [vmem:[%s4996_s26 + $0x1cc] ss:$36 sps:$4 sm:$0xff]  }
  0x45   : > { %1855 = vmatmul.mubr.bf16.gmra.mxu0 %v4590_v52  ;;  %4265 = vmatprep.subr.bf16.mxu1 %v4690_v36  ;;  %v4664_v52 = vld [vmem:[%s4996_s26 + $0x3ac] ss:$36 sps:$4 sm:$0xff]  }
  0x46   : > { %1862 = vmatprep.mubr.bf16.mxu0 %v4594_v53  ;;  %4154 = vmatpush3.bf16.msra.mxu0 %v4662_v17  ;;  %v4663_v53 = vld [vmem:[%s4996_s26 + $0x368] ss:$36 sps:$4 sm:$0xff]   ;;  %v4762_v17 = vld [vmem:[%s5786_s1 + $0x210] sm:$0xff]  }
  0x47   : > { %2016 = vmatmul.mubr.bf16.gmra.mxu1 %v4593_v55  ;;  %4155 = vmatprep.subr.bf16.mxu0 %v4675_v24  ;;  %v4666_v55 = vld [vmem:[%s4996_s26 + $0x3a8] ss:$36 sps:$4 sm:$0xff]   ;;  %v4719_v24 = vld [vmem:[%s4996_s26 + $0xf0] ss:$36 sps:$4 sm:$0xff]  }
  0x48   : > { %2023 = vmatprep.mubr.bf16.mxu1 %v4598_v57  ;;  %4266 = vmatpush3.bf16.msra.mxu1 %v4691_v37  ;;  %v4669_v57 = vld [vmem:[%s4996_s26 + $0x3b0] ss:$36 sps:$4 sm:$0xff]   ;;  %v4739_v36 = vld [vmem:[%s4996_s26 + $0x1c8] ss:$36 sps:$4 sm:$0xff]  }
  0x49   : > { %4267 = vmatprep.subr.bf16.mxu1 %v4692_v38  ;;  %v4743_v37 = vld [vmem:[%s4996_s26 + $0x214] ss:$36 sps:$4 sm:$0xff]   ;;  %v4742_v38 = vld [vmem:[%s4996_s26 + $0x208] ss:$36 sps:$4 sm:$0xff]  }
  0x4a   : > { %4156 = vmatpush3.bf16.msra.mxu0 %v4678_v27  ;;  %v4727_v27 = vld [vmem:[%s4996_s26 + $0x17c] ss:$36 sps:$4 sm:$0xff]  }
  0x4b   : > { %4413 = vmatprep.subr.bf16.mxu0 %v4697_v42 }
  0x4c   : > { %4268 = vmatpush3.bf16.msra.mxu1 %v4696_v41  ;;  %v4750_v41 = vld [vmem:[%s4996_s26 + $0x25c] ss:$36 sps:$4 sm:$0xff]  }
  0x4d   : > { %1863 = vmatmul.mubr.bf16.gmra.mxu0 %v4596_v58  ;;  %v4676_v58 = vld [vmem:[%s4996_s26 + $0x3fc] ss:$36 sps:$4 sm:$0xff]  }
  0x4e   : > { %1870 = vmatprep.mubr.bf16.mxu0 %v4602_v61  ;;  %v4679_v61 = vld [vmem:[%s4996_s26 + $0x3f8] ss:$36 sps:$4 sm:$0xff]  }
  0x4f   : > { %2024 = vmatmul.mubr.bf16.gmra.mxu1 %v4601_v63  ;;  %v4686_v63 = vld [vmem:[%s4996_s26 + $0x438] ss:$36 sps:$4 sm:$0xff]  }
  0x50   : > { %2031 = vmatprep.mubr.bf16.mxu1 %v4605_v0  ;;  %v4695_v0 = vld [vmem:[%s4996_s26 + $0x14] ss:$36 sps:$4 sm:$0xff]  }
  0x55   : > { %1871 = vmatmul.mubr.bf16.gmra.mxu0 %v4604_v2  ;;  %v4700_v2 = vld [vmem:[%s4996_s26 + $0x1c] ss:$36 sps:$4 sm:$0xff]  }
  0x56   : > { %1878 = vmatprep.mubr.bf16.mxu0 %v4608_v3  ;;  %v4693_v3 = vld [vmem:[%s4996_s26 + $0x10] ss:$36 sps:$4 sm:$0xff]  }
  0x57   : > { %2032 = vmatmul.mubr.bf16.gmra.mxu1 %v4607_v6  ;;  %v4710_v6 = vld [vmem:[%s5786_s1 + $0x230] sm:$0xff]  }
  0x58   : > { %2039 = vmatprep.mubr.bf16.mxu1 %v4612_v8  ;;  %v4723_v8 = vld [vmem:[%s5786_s1 + $0x228] sm:$0xff]  }
  0x5d   : > { %1879 = vmatmul.mubr.bf16.gmra.mxu0 %v4610_v10  ;;  %v4707_v10 = vld [vmem:[%s4996_s26 + $0xa4] ss:$36 sps:$4 sm:$0xff]  }
  0x5e   : > { %1886 = vmatprep.mubr.bf16.mxu0 %v4616_v11  ;;  %v4706_v11 = vld [vmem:[%s4996_s26 + $0x60] ss:$36 sps:$4 sm:$0xff]  }
  0x5f   : > { %2040 = vmatmul.mubr.bf16.gmra.mxu1 %v4615_v14  ;;  %v4749_v14 = vld [vmem:[%s5786_s1 + $0x218] sm:$0xff]  }
  0x60   : > { %2047 = vmatprep.mubr.bf16.mxu1 %v4619_v15  ;;  %v4709_v15 = vld [vmem:[%s4996_s26 + $0xa0] ss:$36 sps:$4 sm:$0xff]  }
  0x65   : > { %1887 = vmatmul.mubr.bf16.gmra.mxu0 %v4618_v18  ;;  %v4713_v18 = vld [vmem:[%s4996_s26 + $0xa8] ss:$36 sps:$4 sm:$0xff]  }
  0x66   : > { %1894 = vmatprep.mubr.bf16.mxu0 %v4624_v20  ;;  %v4775_v20 = vld [vmem:[%s5786_s1 + $0x208] sm:$0xff]  }
  0x67   : > { %2048 = vmatmul.mubr.bf16.gmra.mxu1 %v4621_v19  ;;  %v4717_v19 = vld [vmem:[%s4996_s26 + $0xf4] ss:$36 sps:$4 sm:$0xff]  }
  0x68   : > { %2055 = vmatprep.mubr.bf16.mxu1 %v4628_v21  ;;  %v4716_v21 = vld [vmem:[%s4996_s26 + $0xe8] ss:$36 sps:$4 sm:$0xff]  }
  0x6d   : > { %1895 = vmatmul.mubr.bf16.gmra.mxu0 %v4626_v25  ;;  %v4724_v25 = vld [vmem:[%s4996_s26 + $0x13c] ss:$36 sps:$4 sm:$0xff]  }
  0x6e   : > { %1902 = vmatprep.mubr.bf16.mxu0 %v4632_v26  ;;  %v4722_v26 = vld [vmem:[%s4996_s26 + $0x130] ss:$36 sps:$4 sm:$0xff]  }
  0x6f   : > { %2056 = vmatmul.mubr.bf16.gmra.mxu1 %v4631_v28  ;;  %v4726_v28 = vld [vmem:[%s4996_s26 + $0x138] ss:$36 sps:$4 sm:$0xff]  }
  0x70   : > { %2063 = vmatprep.mubr.bf16.mxu1 %v4635_v32  ;;  %v4732_v32 = vld [vmem:[%s4996_s26 + $0x180] ss:$36 sps:$4 sm:$0xff]  }
  0x75   : > { %1903 = vmatmul.mubr.bf16.gmra.mxu0 %v4634_v34  ;;  %v4735_v34 = vld [vmem:[%s4996_s26 + $0x1c0] ss:$36 sps:$4 sm:$0xff]  }
  0x76   : > { %1910 = vmatprep.mubr.bf16.mxu0 %v4640_v35  ;;  %v4740_v35 = vld [vmem:[%s4996_s26 + $0x20c] ss:$36 sps:$4 sm:$0xff]  }
  0x77   : > { %2064 = vmatmul.mubr.bf16.gmra.mxu1 %v4637_v39  ;;  %v4746_v39 = vld [vmem:[%s4996_s26 + $0x254] ss:$36 sps:$4 sm:$0xff]  }
  0x78   : > { %2071 = vmatprep.mubr.bf16.mxu1 %v4644_v40  ;;  %v4745_v40 = vld [vmem:[%s4996_s26 + $0x210] ss:$36 sps:$4 sm:$0xff]  }
  0x7d   : > { %1911 = vmatmul.mubr.bf16.gmra.mxu0 %v4642_v43  ;;  %v4753_v43 = vld [vmem:[%s4996_s26 + $0x29c] ss:$36 sps:$4 sm:$0xff]  }
  0x7e   : > { %1918 = vmatprep.mubr.bf16.mxu0 %v4648_v44  ;;  %v4752_v44 = vld [vmem:[%s4996_s26 + $0x258] ss:$36 sps:$4 sm:$0xff]  }
  0x7f   : > { %2072 = vmatmul.mubr.bf16.gmra.mxu1 %v4647_v45 }
  0x80   : > { %2079 = vmatprep.mubr.bf16.mxu1 %v4651_v46  ;;  %v4756_v46 = vld [vmem:[%s4996_s26 + $0x2a4] ss:$36 sps:$4 sm:$0xff]  }
  0x85   : > { %1919 = vmatmul.mubr.bf16.gmra.mxu0 %v4650_v47  ;;  %v5232_v47 = vld [vmem:[%s5787_s2] ss:$0 sm:$0xff] }
  0x86   : > { %1926 = vmatprep.mubr.bf16.mxu0 %v4656_v48 }
  0x87   : > { %2080 = vmatmul.mubr.bf16.gmra.mxu1 %v4653_v49 }
  0x88   : > { %2087 = vmatprep.mubr.bf16.mxu1 %v4660_v50 }
  0x8d   : > { %1927 = vmatmul.mubr.bf16.gmra.mxu0 %v4658_v51 }
  0x8e   : > { %1934 = vmatprep.mubr.bf16.mxu0 %v4664_v52  ;;  %v4755_v52 = vld [vmem:[%s4996_s26 + $0x298] ss:$36 sps:$4 sm:$0xff]  }
  0x8f   : > { %2088 = vmatmul.mubr.bf16.gmra.mxu1 %v4663_v53 }
  0x90   : > { %2095 = vmatprep.mubr.bf16.mxu1 %v4667_v54 }
  0x95   : > { %1935 = vmatmul.mubr.bf16.gmra.mxu0 %v4666_v55  ;;  %v4759_v55 = vld [vmem:[%s4996_s26 + $0x2e4] ss:$36 sps:$4 sm:$0xff]  }
  0x96   : > { %1942 = vmatprep.mubr.bf16.mxu0 %v4672_v56 }
  0x97   : > { %2096 = vmatmul.mubr.bf16.gmra.mxu1 %v4669_v57 }
  0x98   : > { %2103 = vmatprep.mubr.bf16.mxu1 %v4676_v58 }
  0x9d   : > { %1943 = vmatmul.mubr.bf16.gmra.mxu0 %v4674_v59 }
  0x9e   : > { %1950 = vmatprep.mubr.bf16.mxu0 %v4683_v60  ;;  %v4758_v60 = vld [vmem:[%s4996_s26 + $0x2a0] ss:$36 sps:$4 sm:$0xff]  }
  0x9f   : > { %2104 = vmatmul.mubr.bf16.gmra.mxu1 %v4679_v61 }
  0xa0   : > { %2111 = vmatprep.mubr.bf16.mxu1 %v4687_v62 }
  0xa5   : > { %1951 = vmatmul.mubr.bf16.gmra.mxu0 %v4686_v63  ;;  %v4763_v63 = vld [vmem:[%s4996_s26 + $0x2ec] ss:$36 sps:$4 sm:$0xff]  }
  0xa6   : > { %2152 = vmatprep.mubr.bf16.mxu0 %v4695_v0 }
  0xa7   : > { %2112 = vmatmul.mubr.bf16.gmra.mxu1 %v4689_v1 }
  0xa8   : > { %2313 = vmatprep.mubr.bf16.mxu1 %v4700_v2 }
  0xad   : > { %2153 = vmatmul.mubr.bf16.vlgmr.msra.gmra.mxu0 %v4693_v3 }
  0xae   : > { %4414 = vmatpush3.bf16.msra.mxu0 %v4697_v42  ;;  %2160 = vmatprep.mubr.bf16.mxu0 %v4701_v4  ;;  %v4748_v42 = vld [vmem:[%s4996_s26 + $0x250] ss:$36 sps:$4 sm:$0xff]  }
  0xaf   : > { %4415 = vmatprep.subr.bf16.mxu0 %v4710_v6  ;;  %2314 = vmatmul.mubr.bf16.vlgmr.msra.gmra.mxu1 %v4698_v5 }
  0xb0   : > { %2321 = vmatprep.mubr.bf16.mxu1 %v4704_v7 }
  0xb2   : > { %4416 = vmatpush3.bf16.msra.mxu0 %v4710_v6 }
  0xb3   : > { %4417 = vmatprep.subr.bf16.mxu0 %v4723_v8 }
  0xb5   : > { %2161 = vmatmul.mubr.bf16.gmra.mxu0 %v4703_v9 }
  0xb6   : > { %2168 = vmatprep.mubr.bf16.mxu0 %v4707_v10  ;;  %4418 = vmatpush3.bf16.msra.mxu0 %v4723_v8  ;;  %v4761_v8 = vld [vmem:[%s4996_s26 + $0x2e0] ss:$36 sps:$4 sm:$0xff]  }
  0xb7   : > { %4419 = vmatprep.subr.bf16.mxu0 %v4736_v12  ;;  %2322 = vmatmul.mubr.bf16.gmra.mxu1 %v4706_v11  ;;  %v4766_v11 = vld [vmem:[%s4996_s26 + $0x32c] ss:$36 sps:$4 sm:$0xff]  }
  0xb8   : > { %2329 = vmatprep.mubr.bf16.mxu1 %v4711_v13 }
  0xba   : > { %4420 = vmatpush3.bf16.msra.mxu0 %v4736_v12 }
  0xbb   : > { %4421 = vmatprep.subr.bf16.mxu0 %v4749_v14 }
  0xbd   : > { %2169 = vmatmul.mubr.bf16.gmra.mxu0 %v4709_v15 }
  0xbe   : > { %2176 = vmatprep.mubr.bf16.mxu0 %v4714_v16  ;;  %4422 = vmatpush3.bf16.msra.mxu0 %v4749_v14  ;;  %v4765_v16 = vld [vmem:[%s4996_s26 + $0x2e8] ss:$36 sps:$4 sm:$0xff]  }
  0xbf   : > { %4423 = vmatprep.subr.bf16.mxu0 %v4762_v17  ;;  %2330 = vmatmul.mubr.bf16.gmra.mxu1 %v4713_v18 }
  0xc0   : > { %2337 = vmatprep.mubr.bf16.mxu1 %v4717_v19  ;;  %v4769_v19 = vld [vmem:[%s4996_s26 + $0x334] ss:$36 sps:$4 sm:$0xff]  }
  0xc2   : > { %4424 = vmatpush3.bf16.msra.mxu0 %v4762_v17 }
  0xc3   : > { %4425 = vmatprep.subr.bf16.mxu0 %v4775_v20 }
  0xc5   : > { %2177 = vmatmul.mubr.bf16.gmra.mxu0 %v4716_v21 }
  0xc6   : > { %2184 = vmatprep.mubr.bf16.mxu0 %v4720_v22  ;;  %4426 = vmatpush3.bf16.msra.mxu0 %v4775_v20  ;;  %v4814_v22 = vld [vmem:[%s5788_s3 + $0x38] sm:$0xff]  }
  0xc7   : > { %4427 = vmatprep.subr.bf16.mxu0 %v4788_v23  ;;  %2338 = vmatmul.mubr.bf16.gmra.mxu1 %v4719_v24 }
  0xc8   : > { %2345 = vmatprep.mubr.bf16.mxu1 %v4724_v25  ;;  %4461 = vmatprep.subr.bf16.mxu1 %v4814_v22 }
  0xc9   : > { %4462 = vmatpush3.bf16.msra.mxu1 %v4814_v22 }
  0xca   : > { %4428 = vmatpush3.bf16.msra.mxu0 %v4788_v23 }
  0xcd   : > { %2185 = vmatmul.mubr.bf16.gmra.mxu0 %v4722_v26 }
  0xce   : > { %2192 = vmatprep.mubr.bf16.mxu0 %v4727_v27 }
  0xcf   : > { %2346 = vmatmul.mubr.bf16.gmra.mxu1 %v4726_v28 }
  0xd0   : > { %2353 = vmatprep.mubr.bf16.mxu1 %v4730_v29  ;;  %v4768_v29 = vld [vmem:[%s4996_s26 + $0x328] ss:$36 sps:$4 sm:$0xff]  }
  0xd5   : > { %2193 = vmatmul.mubr.bf16.gmra.mxu0 %v4729_v30 }
  0xd6   : > { %2200 = vmatprep.mubr.bf16.mxu0 %v4733_v31 }
  0xd7   : > { %2354 = vmatmul.mubr.bf16.gmra.mxu1 %v4732_v32  ;;  %v4774_v32 = vld [vmem:[%s4996_s26 + $0x374] ss:$36 sps:$4 sm:$0xff]  }
  0xd8   : > { %2361 = vmatprep.mubr.bf16.mxu1 %v4737_v33 }
  0xdd   : > { %2201 = vmatmul.mubr.bf16.gmra.mxu0 %v4735_v34 }
  0xde   : > { %2208 = vmatprep.mubr.bf16.mxu0 %v4740_v35 }
  0xdf   : > { %2362 = vmatmul.mubr.bf16.gmra.mxu1 %v4739_v36 }
  0xe0   : > { %2369 = vmatprep.mubr.bf16.mxu1 %v4743_v37  ;;  %v4771_v37 = vld [vmem:[%s4996_s26 + $0x330] ss:$36 sps:$4 sm:$0xff]  }
  0xe5   : > { %2209 = vmatmul.mubr.bf16.gmra.mxu0 %v4742_v38 }
  0xe6   : > { %2216 = vmatprep.mubr.bf16.mxu0 %v4746_v39 }
  0xe7   : > { %2370 = vmatmul.mubr.bf16.gmra.mxu1 %v4745_v40  ;;  %v4778_v40 = vld [vmem:[%s4996_s26 + $0x37c] ss:$36 sps:$4 sm:$0xff]  }
  0xe8   : > { %2377 = vmatprep.mubr.bf16.mxu1 %v4750_v41 }
  0xed   : > { %v3933_v45 = vpop.f32.mrf.mxu0  ;;  %2217 = vmatmul.mubr.bf16.gmra.mxu0 %v4748_v42 }
  0xee   : > { %2224 = vmatprep.mubr.bf16.mxu0 %v4753_v43 }
  0xef   : > { %v3934_v48 = vpop.f32.mrf.mxu0  ;;  %v4045_v50 = vpop.f32.mrf.mxu1  ;;  %2378 = vmatmul.mubr.bf16.gmra.mxu1 %v4752_v44 }
  0xf0   : > { %v3935_v49 = vadd.f32 %v3934_v48, %v3933_v45  ;;  %2385 = vmatprep.mubr.bf16.mxu1 %v4756_v46 }
  0xf1   : > { %v3936_v51 = vpop.f32.mrf.mxu0  ;;  %v4046_v54 = vpop.f32.mrf.mxu1 }
  0xf2   : > { %v1833_v53 = vadd.f32 %v3935_v49, %v5232_v47  ;;  %v4047_v56 = vadd.f32 %v4046_v54, %v4045_v50  ;;  %v4772_v50 = vld [vmem:[%s4996_s26 + $0x370] ss:$36 sps:$4 sm:$0xff]  }
  0xf3   : > { %v3937_v57 = vpop.f32.mrf.mxu0  ;;  %v4048_v59 = vpop.f32.mrf.mxu1 }
  0xf4   : > { %v3938_v58 = vadd.f32 %v3937_v57, %v3936_v51  ;;  %v5238_v61 = vadd.f32 %v4047_v56, %v1833_v53  ;;  %v4781_v53 = vld [vmem:[%s4996_s26 + $0x3bc] ss:$36 sps:$4 sm:$0xff]  }
  0xf5   : > { %v3939_v62 = vpop.f32.mrf.mxu0  ;;  %2225 = vmatmul.mubr.bf16.gmra.mxu0 %v4755_v52  ;;  %v4049_v1 = vpop.f32.mrf.mxu1 }
  0xf6   : > { %v1836_v0 = vadd.f32 %v3938_v58, %v5232_v47  ;;  %2232 = vmatprep.mubr.bf16.mxu0 %v4759_v55  ;;  %v4050_v2 = vadd.f32 %v4049_v1, %v4048_v59  ;;  %v4776_v58 = vld [vmem:[%s4996_s26 + $0x378] ss:$36 sps:$4 sm:$0xff]   ;;  %v4815_v1 = vld [vmem:[%s5788_s3 + $0x30] sm:$0xff]  }
  0xf7   : > { %v3940_v3 = vpop.f32.mrf.mxu0  ;;  %v4051_v5 = vpop.f32.mrf.mxu1  ;;  %2386 = vmatmul.mubr.bf16.gmra.mxu1 %v4758_v60  ;;  %4463 = vmatprep.subr.bf16.mxu1 %v4815_v1 }
  0xf8   : > { %v3941_v4 = vadd.f32 %v3940_v3, %v3939_v62  ;;  %v5242_v6 = vadd.f32 %v4050_v2, %v1836_v0  ;;  %2393 = vmatprep.mubr.bf16.mxu1 %v4763_v63  ;;  %v4784_v62 = vld [vmem:[%s4996_s26 + $0x3c4] ss:$36 sps:$4 sm:$0xff]   ;;  %4464 = vmatpush3.bf16.msra.mxu1 %v4815_v1  ;;  %v4795_v1 = vld [vmem:[%s4996_s26 + $0x450] ss:$36 sps:$4 sm:$0xff]  }
  0xf9   : > { %v3942_v7 = vpop.f32.mrf.mxu0  ;;  %v4052_v10 = vpop.f32.mrf.mxu1 }
  0xfa   : > { %v1841_v9 = vadd.f32 %v3941_v4, %v5232_v47  ;;  %v4053_v12 = vadd.f32 %v4052_v10, %v4051_v5 }
  0xfb   : > { %v3943_v13 = vpop.f32.mrf.mxu0  ;;  %v4054_v15 = vpop.f32.mrf.mxu1 }
  0xfc   : > { %v3944_v14 = vadd.f32 %v3943_v13, %v3942_v7  ;;  %v5248_v17 = vadd.f32 %v4053_v12, %v1841_v9  ;;  %v4779_v9 = vld [vmem:[%s4996_s26 + $0x3b8] ss:$36 sps:$4 sm:$0xff]   ;;  %v4787_v12 = vld [vmem:[%s4996_s26 + $0x404] ss:$36 sps:$4 sm:$0xff]  }
  0xfd   : > { %v3945_v18 = vpop.f32.mrf.mxu0  ;;  %2233 = vmatmul.mubr.bf16.gmra.mxu0 %v4761_v8  ;;  %v4055_v21 = vpop.f32.mrf.mxu1 }
  0xfe   : > { %v1844_v20 = vadd.f32 %v3944_v14, %v5232_v47  ;;  %2240 = vmatprep.mubr.bf16.mxu0 %v4766_v11  ;;  %v4056_v23 = vadd.f32 %v4055_v21, %v4054_v15  ;;  %v4791_v21 = vld [vmem:[%s4996_s26 + $0x40c] ss:$36 sps:$4 sm:$0xff]  }
  0xff   : > { %v3946_v24 = vpop.f32.mrf.mxu0  ;;  %v4057_v26 = vpop.f32.mrf.mxu1  ;;  %2394 = vmatmul.mubr.bf16.gmra.mxu1 %v4765_v16 }
 0x100   : > { %v3947_v25 = vadd.f32 %v3946_v24, %v3945_v18  ;;  %v5255_v27 = vadd.f32 %v4056_v23, %v1844_v20  ;;  %2401 = vmatprep.mubr.bf16.mxu1 %v4769_v19  ;;  %v4782_v18 = vld [vmem:[%s4996_s26 + $0x3c0] ss:$36 sps:$4 sm:$0xff]  }
 0x101   : > { %v3948_v28 = vpop.f32.mrf.mxu0  ;;  %v4058_v31 = vpop.f32.mrf.mxu1 }
 0x102   : > { %v1849_v30 = vadd.f32 %v3947_v25, %v5232_v47  ;;  %v4059_v33 = vadd.f32 %v4058_v31, %v4057_v26  ;;  %v4785_v31 = vld [vmem:[%s4996_s26 + $0x400] ss:$36 sps:$4 sm:$0xff]  }
 0x103   : > { %v3949_v34 = vpop.f32.mrf.mxu0  ;;  %v4060_v36 = vpop.f32.mrf.mxu1 }
 0x104   : > { %v3950_v35 = vadd.f32 %v3949_v34, %v3948_v28  ;;  %v5261_v38 = vadd.f32 %v4059_v33, %v1849_v30  ;;  %v4794_v34 = vld [vmem:[%s4996_s26 + $0x44c] ss:$36 sps:$4 sm:$0xff]  }
 0x105   : > { %v3951_v39 = vpop.f32.mrf.mxu0  ;;  %2241 = vmatmul.mubr.bf16.gmra.mxu0 %v4768_v29  ;;  %v4061_v42 = vpop.f32.mrf.mxu1 }
 0x106   : > { %v1852_v41 = vadd.f32 %v3950_v35, %v5232_v47  ;;  %2248 = vmatprep.mubr.bf16.mxu0 %v4774_v32  ;;  %v4062_v43 = vadd.f32 %v4061_v42, %v4060_v36 }
 0x107   : > { %v3952_v44 = vpop.f32.mrf.mxu0  ;;  %v4063_v46 = vpop.f32.mrf.mxu1  ;;  %2402 = vmatmul.mubr.bf16.gmra.mxu1 %v4771_v37 }
 0x108   : > { %v3953_v45 = vadd.f32 %v3952_v44, %v3951_v39  ;;  %v5265_v48 = vadd.f32 %v4062_v43, %v1852_v41  ;;  %2409 = vmatprep.mubr.bf16.mxu1 %v4778_v40  ;;  %v4789_v40 = vld [vmem:[%s4996_s26 + $0x408] ss:$36 sps:$4 sm:$0xff]   ;;  %v4797_v43 = vld [vmem:[%s4996_s26 + $0x454] ss:$36 sps:$4 sm:$0xff]  }
 0x109   : > { %v3954_v49 = vpop.f32.mrf.mxu0  ;;  %v4064_v52 = vpop.f32.mrf.mxu1 }
 0x10a   : > { %v1857_v51 = vadd.f32 %v3953_v45, %v5232_v47  ;;  %v4065_v54 = vadd.f32 %v4064_v52, %v4063_v46  ;;  %v4816_v46 = vld [vmem:[%s5788_s3 + $0x28] sm:$0xff]  }
 0x10b   : > { %v3955_v55 = vpop.f32.mrf.mxu0  ;;  %v4066_v57 = vpop.f32.mrf.mxu1  ;;  %4465 = vmatprep.subr.bf16.mxu1 %v4816_v46 }
 0x10c   : > { %v3956_v56 = vadd.f32 %v3955_v55, %v3954_v49  ;;  %v5271_v59 = vadd.f32 %v4065_v54, %v1857_v51  ;;  %v4792_v55 = vld [vmem:[%s4996_s26 + $0x448] ss:$36 sps:$4 sm:$0xff]   ;;  %4466 = vmatpush3.bf16.msra.mxu1 %v4816_v46 }
 0x10d   : > { %v3957_v60 = vpop.f32.mrf.mxu0  ;;  %2249 = vmatmul.mubr.bf16.gmra.mxu0 %v4772_v50  ;;  %v4067_v0 = vpop.f32.mrf.mxu1 }
 0x10e   : > { %v1860_v63 = vadd.f32 %v3956_v56, %v5232_v47  ;;  %2256 = vmatprep.mubr.bf16.mxu0 %v4781_v53  ;;  %v4068_v2 = vadd.f32 %v4067_v0, %v4066_v57 }
 0x10f   : > { %v3958_v3 = vpop.f32.mrf.mxu0  ;;  %v4069_v5 = vpop.f32.mrf.mxu1  ;;  %2410 = vmatmul.mubr.bf16.gmra.mxu1 %v4776_v58  ;;  %v4798_v58 = vld [vmem:[%s4996_s26 + $0x20] ss:$36 sps:$4 sm:$0xff]  }
 0x110   : > { %v3959_v4 = vadd.f32 %v3958_v3, %v3957_v60  ;;  %v5278_v7 = vadd.f32 %v4068_v2, %v1860_v63  ;;  %2417 = vmatprep.mubr.bf16.mxu1 %v4784_v62 }
 0x111   : > { %v3960_v8 = vpop.f32.mrf.mxu0  ;;  %v4070_v11 = vpop.f32.mrf.mxu1 }
 0x112   : > { %v1865_v10 = vadd.f32 %v3959_v4, %v5232_v47  ;;  %v4071_v13 = vadd.f32 %v4070_v11, %v4069_v5 }
 0x113   : > { %v3961_v14 = vpop.f32.mrf.mxu0  ;;  %v4072_v16 = vpop.f32.mrf.mxu1 }
 0x114   : > { %v3962_v15 = vadd.f32 %v3961_v14, %v3960_v8  ;;  %v5284_v19 = vadd.f32 %v4071_v13, %v1865_v10  ;;  %v4799_v14 = vld [vmem:[%s4996_s26 + $0x68] ss:$36 sps:$4 sm:$0xff]  }
 0x115   : > { %v3963_v20 = vpop.f32.mrf.mxu0  ;;  %2257 = vmatmul.mubr.bf16.gmra.mxu0 %v4779_v9  ;;  %v4073_v23 = vpop.f32.mrf.mxu1 }
 0x116   : > { %v1868_v22 = vadd.f32 %v3962_v15, %v5232_v47  ;;  %2264 = vmatprep.mubr.bf16.mxu0 %v4787_v12  ;;  %v4074_v24 = vadd.f32 %v4073_v23, %v4072_v16 }
 0x117   : > { %v3964_v25 = vpop.f32.mrf.mxu0  ;;  %v4075_v28 = vpop.f32.mrf.mxu1  ;;  %2418 = vmatmul.mubr.bf16.gmra.mxu1 %v4782_v18  ;;  %v4800_v18 = vld [vmem:[%s4996_s26 + $0xb0] ss:$36 sps:$4 sm:$0xff]  }
 0x118   : > { %v3965_v26 = vadd.f32 %v3964_v25, %v3963_v20  ;;  %v5288_v29 = vadd.f32 %v4074_v24, %v1868_v22  ;;  %2425 = vmatprep.mubr.bf16.mxu1 %v4791_v21 }
 0x119   : > { %v3966_v30 = vpop.f32.mrf.mxu0  ;;  %v4076_v33 = vpop.f32.mrf.mxu1 }
 0x11a   : > { %v1873_v32 = vadd.f32 %v3965_v26, %v5232_v47  ;;  %v4077_v35 = vadd.f32 %v4076_v33, %v4075_v28 }
 0x11b   : > { %v3967_v36 = vpop.f32.mrf.mxu0  ;;  %v4078_v39 = vpop.f32.mrf.mxu1 }
 0x11c   : > { %v3968_v37 = vadd.f32 %v3967_v36, %v3966_v30  ;;  %v5294_v41 = vadd.f32 %v4077_v35, %v1873_v32  ;;  %v4817_v30 = vld [vmem:[%s5788_s3 + $0x20] sm:$0xff]  }
 0x11d   : > { %v3969_v42 = vpop.f32.mrf.mxu0  ;;  %2265 = vmatmul.mubr.bf16.gmra.mxu0 %v4785_v31  ;;  %v4079_v45 = vpop.f32.mrf.mxu1  ;;  %4467 = vmatprep.subr.bf16.mxu1 %v4817_v30 }
 0x11e   : > { %v1876_v44 = vadd.f32 %v3968_v37, %v5232_v47  ;;  %2272 = vmatprep.mubr.bf16.mxu0 %v4794_v34  ;;  %v4080_v49 = vadd.f32 %v4079_v45, %v4078_v39  ;;  %v4801_v37 = vld [vmem:[%s4996_s26 + $0xf8] ss:$36 sps:$4 sm:$0xff]   ;;  %4468 = vmatpush3.bf16.msra.mxu1 %v4817_v30 }
 0x11f   : > { %v3970_v50 = vpop.f32.mrf.mxu0  ;;  %v4081_v52 = vpop.f32.mrf.mxu1  ;;  %2426 = vmatmul.mubr.bf16.gmra.mxu1 %v4789_v40 }
 0x120   : > { %v3971_v51 = vadd.f32 %v3970_v50, %v3969_v42  ;;  %v5301_v53 = vadd.f32 %v4080_v49, %v1876_v44  ;;  %2433 = vmatprep.mubr.bf16.mxu1 %v4797_v43  ;;  %v4802_v42 = vld [vmem:[%s4996_s26 + $0x140] ss:$36 sps:$4 sm:$0xff]  }
 0x121   : > { %v3972_v54 = vpop.f32.mrf.mxu0  ;;  %v4082_v57 = vpop.f32.mrf.mxu1 }
 0x122   : > { %v1881_v56 = vadd.f32 %v3971_v51, %v5232_v47  ;;  %v4083_v60 = vadd.f32 %v4082_v57, %v4081_v52 }
 0x123   : > { %v3973_v62 = vpop.f32.mrf.mxu0  ;;  %v4084_v0 = vpop.f32.mrf.mxu1 }
 0x124   : > { %v3974_v63 = vadd.f32 %v3973_v62, %v3972_v54  ;;  %v5307_v2 = vadd.f32 %v4083_v60, %v1881_v56  ;;  %v4803_v62 = vld [vmem:[%s4996_s26 + $0x188] ss:$36 sps:$4 sm:$0xff]  }
 0x125   : > { %v3975_v3 = vpop.f32.mrf.mxu0  ;;  %2273 = vmatmul.mubr.bf16.gmra.mxu0 %v4792_v55  ;;  %v4085_v5 = vpop.f32.mrf.mxu1 }
 0x126   : > { %v1884_v4 = vadd.f32 %v3974_v63, %v5232_v47  ;;  %4429 = vmatprep.mubr.bf16.mxu0 %v4798_v58  ;;  %v4086_v8 = vadd.f32 %v4085_v5, %v4084_v0 }
 0x127   : > { %v3976_v9 = vpop.f32.mrf.mxu0  ;;  %v4087_v11 = vpop.f32.mrf.mxu1  ;;  %2434 = vmatmul.mubr.bf16.gmra.mxu1 %v4795_v1  ;;  %v4804_v1 = vld [vmem:[%s4996_s26 + $0x1d0] ss:$36 sps:$4 sm:$0xff]  }
 0x128   : > { %v3977_v10 = vadd.f32 %v3976_v9, %v3975_v3  ;;  %v5310_v12 = vadd.f32 %v4086_v8, %v1884_v4 }
 0x129   : > { %v3978_v13 = vpop.f32.mrf.mxu0  ;;  %v4088_v16 = vpop.f32.mrf.mxu1 }
 0x12a   : > { %v1889_v15 = vadd.f32 %v3977_v10, %v5232_v47  ;;  %v4089_v20 = vadd.f32 %v4088_v16, %v4087_v11 }
 0x12b   : > { %v3979_v21 = vpop.f32.mrf.mxu0  ;;  %v4090_v23 = vpop.f32.mrf.mxu1 }
 0x12c   : > { %v3980_v22 = vadd.f32 %v3979_v21, %v3978_v13  ;;  %v5315_v24 = vadd.f32 %v4089_v20, %v1889_v15 }
 0x12d   : > { %v3981_v25 = vpop.f32.mrf.mxu0  ;;  %4430 = vmatmul.mubr.bf16.vlgmr.msra.gmra.mxu0 %v4799_v14  ;;  %v4091_v28 = vpop.f32.mrf.mxu1  ;;  %v4818_v14 = vld [vmem:[%s5788_s3 + $0x18] sm:$0xff]  }
 0x12e   : > { %v1892_v26 = vadd.f32 %v3980_v22, %v5232_v47  ;;  %4433 = vmatprep.mubr.bf16.mxu0 %v4800_v18  ;;  %v4092_v31 = vadd.f32 %v4091_v28, %v4090_v23  ;;  %4469 = vmatprep.subr.bf16.mxu1 %v4818_v14  ;;  %v4805_v23 = vld [vmem:[%s4996_s26 + $0x218] ss:$36 sps:$4 sm:$0xff]   ;;  %v4806_v28 = vld [vmem:[%s4996_s26 + $0x260] ss:$36 sps:$4 sm:$0xff]  }
 0x12f   : > { %v3982_v32 = vpop.f32.mrf.mxu0  ;;  %v4093_v34 = vpop.f32.mrf.mxu1  ;;  %4470 = vmatpush3.bf16.msra.mxu1 %v4818_v14  ;;  %v4809_v14 = vld [vmem:[%s4996_s26 + $0x338] ss:$36 sps:$4 sm:$0xff]  }
 0x130   : > { %v3983_v33 = vadd.f32 %v3982_v32, %v3981_v25  ;;  %v5321_v35 = vadd.f32 %v4092_v31, %v1892_v26 }
 0x131   : > { %v3984_v36 = vpop.f32.mrf.mxu0  ;;  %v4094_v40 = vpop.f32.mrf.mxu1 }
 0x132   : > { %v1897_v39 = vadd.f32 %v3983_v33, %v5232_v47  ;;  %v4095_v43 = vadd.f32 %v4094_v40, %v4093_v34 }
 0x133   : > { %v3985_v44 = vpop.f32.mrf.mxu0  ;;  %v4096_v46 = vpop.f32.mrf.mxu1 }
 0x134   : > { %v3986_v45 = vadd.f32 %v3985_v44, %v3984_v36  ;;  %v5326_v49 = vadd.f32 %v4095_v43, %v1897_v39 }
 0x135   : > { %v3987_v50 = vpop.f32.mrf.mxu0  ;;  %4434 = vmatmul.mubr.bf16.gmra.mxu0 %v4801_v37  ;;  %v4097_v52 = vpop.f32.mrf.mxu1 }
 0x136   : > { %v1900_v51 = vadd.f32 %v3986_v45, %v5232_v47  ;;  %4437 = vmatprep.mubr.bf16.mxu0 %v4802_v42  ;;  %v4098_v54 = vadd.f32 %v4097_v52, %v4096_v46 }
 0x137   : > { %v3988_v55 = vpop.f32.mrf.mxu0  ;;  %v4099_v57 = vpop.f32.mrf.mxu1 }
 0x138   : > { %v3989_v56 = vadd.f32 %v3988_v55, %v3987_v50  ;;  %v5329_v58 = vadd.f32 %v4098_v54, %v1900_v51  ;;  %v4807_v50 = vld [vmem:[%s4996_s26 + $0x2a8] ss:$36 sps:$4 sm:$0xff]   ;;  %v4808_v54 = vld [vmem:[%s4996_s26 + $0x2f0] ss:$36 sps:$4 sm:$0xff]  }
 0x139   : > { %v3990_v60 = vpop.f32.mrf.mxu0  ;;  %v4100_v0 = vpop.f32.mrf.mxu1 }
 0x13a   : > { %v1905_v63 = vadd.f32 %v3989_v56, %v5232_v47  ;;  %v4101_v3 = vadd.f32 %v4100_v0, %v4099_v57 }
 0x13b   : > { %v3991_v4 = vpop.f32.mrf.mxu0  ;;  %v4102_v8 = vpop.f32.mrf.mxu1 }
 0x13c   : > { %v3992_v5 = vadd.f32 %v3991_v4, %v3990_v60  ;;  %v5334_v9 = vadd.f32 %v4101_v3, %v1905_v63  ;;  %v4819_v3 = vld [vmem:[%s5788_s3 + $0x10] sm:$0xff]  }
 0x13d   : > { %v3993_v10 = vpop.f32.mrf.mxu0  ;;  %4438 = vmatmul.mubr.bf16.gmra.mxu0 %v4803_v62  ;;  %v4103_v13 = vpop.f32.mrf.mxu1  ;;  %4471 = vmatprep.subr.bf16.mxu1 %v4819_v3 }
 0x13e   : > { %v1908_v11 = vadd.f32 %v3992_v5, %v5232_v47  ;;  %4441 = vmatprep.mubr.bf16.mxu0 %v4804_v1  ;;  %v4104_v15 = vadd.f32 %v4103_v13, %v4102_v8  ;;  %4472 = vmatpush3.bf16.msra.mxu1 %v4819_v3 }
 0x13f   : > { %v3994_v16 = vpop.f32.mrf.mxu0  ;;  %v4105_v20 = vpop.f32.mrf.mxu1 }
 0x140   : > { %v3995_v18 = vadd.f32 %v3994_v16, %v3993_v10  ;;  %v5340_v21 = vadd.f32 %v4104_v15, %v1908_v11 }
 0x141   : > { %v3996_v22 = vpop.f32.mrf.mxu0  ;;  %v4106_v26 = vpop.f32.mrf.mxu1 }
 0x142   : > { %v1913_v25 = vadd.f32 %v3995_v18, %v5232_v47  ;;  %v4107_v30 = vadd.f32 %v4106_v26, %v4105_v20  ;;  %v4810_v18 = vld [vmem:[%s4996_s26 + $0x380] ss:$36 sps:$4 sm:$0xff]  }
 0x143   : > { %v3997_v31 = vpop.f32.mrf.mxu0  ;;  %v4108_v33 = vpop.f32.mrf.mxu1 }
 0x144   : > { %v3998_v32 = vadd.f32 %v3997_v31, %v3996_v22  ;;  %v5345_v34 = vadd.f32 %v4107_v30, %v1913_v25 }
 0x145   : > { %v3999_v36 = vpop.f32.mrf.mxu0  ;;  %4442 = vmatmul.mubr.bf16.gmra.mxu0 %v4805_v23  ;;  %v4109_v39 = vpop.f32.mrf.mxu1 }
 0x146   : > { %v1916_v37 = vadd.f32 %v3998_v32, %v5232_v47  ;;  %4445 = vmatprep.mubr.bf16.mxu0 %v4806_v28  ;;  %v4110_v40 = vadd.f32 %v4109_v39, %v4108_v33 }
 0x147   : > { %v4000_v42 = vpop.f32.mrf.mxu0  ;;  %v4111_v44 = vpop.f32.mrf.mxu1 }
 0x148   : > { %v4001_v43 = vadd.f32 %v4000_v42, %v3999_v36  ;;  %v5348_v45 = vadd.f32 %v4110_v40, %v1916_v37  ;;  %v4811_v42 = vld [vmem:[%s4996_s26 + $0x3c8] ss:$36 sps:$4 sm:$0xff]  }
 0x149   : > { %v4002_v46 = vpop.f32.mrf.mxu0  ;;  %v4112_v52 = vpop.f32.mrf.mxu1 }
 0x14a   : > { %v1921_v51 = vadd.f32 %v4001_v43, %v5232_v47  ;;  %v4113_v55 = vadd.f32 %v4112_v52, %v4111_v44 }
 0x14b   : > { %v4003_v56 = vpop.f32.mrf.mxu0  ;;  %v4114_v60 = vpop.f32.mrf.mxu1 }
 0x14c   : > { %v4004_v57 = vadd.f32 %v4003_v56, %v4002_v46  ;;  %v5353_v62 = vadd.f32 %v4113_v55, %v1921_v51  ;;  %v4812_v46 = vld [vmem:[%s4996_s26 + $0x410] ss:$36 sps:$4 sm:$0xff]  }
 0x14d   : > { %v4005_v63 = vpop.f32.mrf.mxu0  ;;  %4446 = vmatmul.mubr.bf16.gmra.mxu0 %v4807_v50  ;;  %v4115_v1 = vpop.f32.mrf.mxu1 }
 0x14e   : > { %v1924_v0 = vadd.f32 %v4004_v57, %v5232_v47  ;;  %4449 = vmatprep.mubr.bf16.mxu0 %v4808_v54  ;;  %v4116_v4 = vadd.f32 %v4115_v1, %v4114_v60 }
 0x14f   : > { %v4006_v5 = vpop.f32.mrf.mxu0  ;;  %v4117_v10 = vpop.f32.mrf.mxu1 }
 0x150   : > { %v4007_v8 = vadd.f32 %v4006_v5, %v4005_v63  ;;  %v5359_v11 = vadd.f32 %v4116_v4, %v1924_v0  ;;  %v4820_v63 = vld [vmem:[%s5788_s3 + $0x8] sm:$0xff]  }
 0x151   : > { %v4008_v13 = vpop.f32.mrf.mxu0  ;;  %v4118_v16 = vpop.f32.mrf.mxu1  ;;  %4473 = vmatprep.subr.bf16.mxu1 %v4820_v63 }
 0x152   : > { %v1929_v15 = vadd.f32 %v4007_v8, %v5232_v47  ;;  %v4119_v20 = vadd.f32 %v4118_v16, %v4117_v10  ;;  %v4813_v10 = vld [vmem:[%s4996_s26 + $0x458] ss:$36 sps:$4 sm:$0xff]   ;;  %4474 = vmatpush3.bf16.msra.mxu1 %v4820_v63 }
 0x153   : > { %v4009_v22 = vpop.f32.mrf.mxu0  ;;  %v4120_v25 = vpop.f32.mrf.mxu1 }
 0x154   : > { %v4010_v23 = vadd.f32 %v4009_v22, %v4008_v13  ;;  %v5364_v26 = vadd.f32 %v4119_v20, %v1929_v15 }
 0x155   : > { %v4011_v28 = vpop.f32.mrf.mxu0  ;;  %4450 = vmatmul.mubr.bf16.gmra.mxu0 %v4809_v14  ;;  %v4121_v31 = vpop.f32.mrf.mxu1 }
 0x156   : > { %v1932_v30 = vadd.f32 %v4010_v23, %v5232_v47  ;;  %4453 = vmatprep.mubr.bf16.mxu0 %v4810_v18  ;;  %v4122_v32 = vadd.f32 %v4121_v31, %v4120_v25 }
 0x157   : > { %v4012_v33 = vpop.f32.mrf.mxu0  ;;  %v4123_v37 = vpop.f32.mrf.mxu1 }
 0x158   : > { %v4013_v36 = vadd.f32 %v4012_v33, %v4011_v28  ;;  %v5367_v39 = vadd.f32 %v4122_v32, %v1932_v30 }
 0x159   : > { %v4014_v40 = vpop.f32.mrf.mxu0  ;;  %v4124_v44 = vpop.f32.mrf.mxu1 }
 0x15a   : > { %v1937_v43 = vadd.f32 %v4013_v36, %v5232_v47  ;;  %v4125_v50 = vadd.f32 %v4124_v44, %v4123_v37 }
 0x15b   : > { %v4015_v51 = vpop.f32.mrf.mxu0  ;;  %v4126_v54 = vpop.f32.mrf.mxu1 }
 0x15c   : > { %v4016_v52 = vadd.f32 %v4015_v51, %v4014_v40  ;;  %v5372_v55 = vadd.f32 %v4125_v50, %v1937_v43 }
 0x15d   : > { %v4017_v56 = vpop.f32.mrf.mxu0  ;;  %4454 = vmatmul.mubr.bf16.gmra.mxu0 %v4811_v42  ;;  %v4127_v60 = vpop.f32.mrf.mxu1 }
 0x15e   : > { %v1940_v57 = vadd.f32 %v4016_v52, %v5232_v47  ;;  %4457 = vmatprep.mubr.bf16.mxu0 %v4812_v46  ;;  %v4128_v0 = vadd.f32 %v4127_v60, %v4126_v54 }
 0x15f   : > { %v4018_v1 = vpop.f32.mrf.mxu0  ;;  %v4129_v4 = vpop.f32.mrf.mxu1 }
 0x160   : > { %v4019_v3 = vadd.f32 %v4018_v1, %v4017_v56  ;;  %v5378_v5 = vadd.f32 %v4128_v0, %v1940_v57  ;;  %v4821_v57 = vld [vmem:[%s5788_s3] sm:$0xff]  }
 0x161   : > { %v4020_v8 = vpop.f32.mrf.mxu0  ;;  %v4130_v14 = vpop.f32.mrf.mxu1  ;;  %4475 = vmatprep.subr.bf16.mxu1 %v4821_v57 }
 0x162   : > { %v1945_v13 = vadd.f32 %v4019_v3, %v5232_v47  ;;  %v4131_v15 = vadd.f32 %v4130_v14, %v4129_v4  ;;  %4476 = vmatpush3.bf16.msra.mxu1 %v4821_v57 }
 0x163   : > { %v4021_v16 = vpop.f32.mrf.mxu0  ;;  %v4132_v20 = vpop.f32.mrf.mxu1 }
 0x164   : > { %v4022_v18 = vadd.f32 %v4021_v16, %v4020_v8  ;;  %v5382_v22 = vadd.f32 %v4131_v15, %v1945_v13 }
 0x165   : > { %v4023_v23 = vpop.f32.mrf.mxu0  ;;  %4458 = vmatmul.mubr.bf16.gmra.mxu0 %v4813_v10  ;;  %v4133_v28 = vpop.f32.mrf.mxu1 }
 0x166   : > { %v1948_v25 = vadd.f32 %v4022_v18, %v5232_v47  ;;  %v4134_v30 = vadd.f32 %v4133_v28, %v4132_v20 }
 0x167   : > { %v4024_v31 = vpop.f32.mrf.mxu0  ;;  %v4135_v33 = vpop.f32.mrf.mxu1 }
 0x168   : > { %v4025_v32 = vadd.f32 %v4024_v31, %v4023_v23  ;;  %v5385_v36 = vadd.f32 %v4134_v30, %v1948_v25 }
 0x169   : > { %v4026_v37 = vpop.f32.mrf.mxu0  ;;  %v4136_v42 = vpop.f32.mrf.mxu1 }
 0x16a   : > { %v1953_v40 = vadd.f32 %v4025_v32, %v5232_v47  ;;  %v4137_v43 = vadd.f32 %v4136_v42, %v4135_v33 }
 0x16b   : > { %v4027_v44 = vpop.f32.mrf.mxu0  ;;  %v4138_v50 = vpop.f32.mrf.mxu1 }
 0x16c   : > { %v4028_v46 = vadd.f32 %v4027_v44, %v4026_v37  ;;  %v5388_v51 = vadd.f32 %v4137_v43, %v1953_v40 }
 0x16d   : > { %v4157_v52 = vpop.f32.mrf.mxu0  ;;  %v4139_v56 = vpop.f32.mrf.mxu1 }
 0x16e   : > { %5792 = vst [vmem:[#allocation2_spill] sm:$0xff] %v5388_v51  ;;  %v1956_v54 = vadd.f32 %v4028_v46, %v5232_v47  ;;  %v4140_v60 = vadd.f32 %v4139_v56, %v4138_v50 }
 0x16f   : > { %v4158_v63 = vpop.f32.mrf.mxu0  ;;  %v4269_v1 = vpop.f32.mrf.mxu1 }
 0x170   : > { %v4159_v0 = vadd.f32 %v4158_v63, %v4157_v52  ;;  %v5394_v3 = vadd.f32 %v4140_v60, %v1956_v54 }
 0x171   : > { %v4160_v4 = vpop.f32.mrf.mxu0  ;;  %v4270_v10 = vpop.f32.mrf.mxu1 }
 0x172   : > { %5793 = vst [vmem:[#allocation3_spill] sm:$0xff] %v5394_v3  ;;  %v2155_v8 = vadd.f32 %v4159_v0, %v5238_v61  ;;  %v4271_v13 = vadd.f32 %v4270_v10, %v4269_v1 }
 0x173   : > { %v4161_v14 = vpop.f32.mrf.mxu0  ;;  %v4272_v15 = vpop.f32.mrf.mxu1 }
 0x174   : > { %v4162_v47 = vadd.f32 %v4161_v14, %v4160_v4  ;;  %v5397_v18 = vadd.f32 %v4271_v13, %v2155_v8 }
 0x175   : > { %v4163_v16 = vpop.f32.mrf.mxu0  ;;  %v4273_v23 = vpop.f32.mrf.mxu1 }
 0x176   : > { %v2158_v20 = vadd.f32 %v4162_v47, %v5242_v6  ;;  %v4274_v25 = vadd.f32 %v4273_v23, %v4272_v15 }
 0x177   : > { %v4164_v28 = vpop.f32.mrf.mxu0  ;;  %v5400_v31 = vpop.f32.mrf.mxu1 }
 0x178   : > { %v4165_v30 = vadd.f32 %v4164_v28, %v4163_v16  ;;  %v5402_v33 = vadd.f32 %v4274_v25, %v2158_v20 }
 0x179   : > { %v4166_v32 = vpop.f32.mrf.mxu0  ;;  %v5407_v37 = vpop.f32.mrf.mxu1 }
 0x17a   : > { %v5405_v61 = vadd.f32 %v4165_v30, %v5248_v17 }
 0x17b   : > { %v4167_v40 = vpop.f32.mrf.mxu0  ;;  %v5409_v43 = vpop.f32.mrf.mxu1 }
 0x17c   : > { %v4168_v42 = vadd.f32 %v4167_v40, %v4166_v32 }
 0x17d   : > { %v4169_v44 = vpop.f32.mrf.mxu0  ;;  %v5414_v46 = vpop.f32.mrf.mxu1 }
 0x17e   : > { %v5412_v6 = vadd.f32 %v4168_v42, %v5255_v27 }
 0x17f   : > { %v4170_v50 = vpop.f32.mrf.mxu0  ;;  %v4281_v54 = vpop.f32.mrf.mxu1 }
 0x180   : > { %v4171_v52 = vadd.f32 %v4170_v50, %v4169_v44 }
 0x181   : > { %v4172_v56 = vpop.f32.mrf.mxu0  ;;  %v4282_v17 = vpop.f32.mrf.mxu1 }
 0x182   : > { %v2171_v57 = vadd.f32 %v4171_v52, %v5261_v38  ;;  %v4283_v60 = vadd.f32 %v4282_v17, %v4281_v54 }
 0x183   : > { %v4173_v63 = vpop.f32.mrf.mxu0  ;;  %v5417_v1 = vpop.f32.mrf.mxu1 }
 0x184   : > { %v4174_v0 = vadd.f32 %v4173_v63, %v4172_v56  ;;  %v5419_v8 = vadd.f32 %v4283_v60, %v2171_v57 }
 0x185   : > { %v4175_v4 = vpop.f32.mrf.mxu0  ;;  %v5424_v10 = vpop.f32.mrf.mxu1 }
 0x186   : > { %v5422_v27 = vadd.f32 %v4174_v0, %v5265_v48 }
 0x187   : > { %v4176_v13 = vpop.f32.mrf.mxu0  ;;  %v5426_v47 = vpop.f32.mrf.mxu1 }
 0x188   : > { %v4177_v14 = vadd.f32 %v4176_v13, %v4175_v4 }
 0x189   : > { %v4178_v15 = vpop.f32.mrf.mxu0  ;;  %v5431_v16 = vpop.f32.mrf.mxu1 }
 0x18a   : > { %v5429_v38 = vadd.f32 %v4177_v14, %v5271_v59 }
 0x18b   : > { %v4179_v20 = vpop.f32.mrf.mxu0  ;;  %v5433_v25 = vpop.f32.mrf.mxu1 }
 0x18c   : > { %v4180_v23 = vadd.f32 %v4179_v20, %v4178_v15 }
 0x18d   : > { %v4181_v28 = vpop.f32.mrf.mxu0  ;;  %v5438_v30 = vpop.f32.mrf.mxu1 }
 0x18e   : > { %v5436_v48 = vadd.f32 %v4180_v23, %v5278_v7 }
 0x18f   : > { %v4182_v32 = vpop.f32.mrf.mxu0  ;;  %v5440_v42 = vpop.f32.mrf.mxu1 }
 0x190   : > { %v4183_v40 = vadd.f32 %v4182_v32, %v4181_v28 }
 0x191   : > { %v4184_v44 = vpop.f32.mrf.mxu0  ;;  %v5445_v50 = vpop.f32.mrf.mxu1 }
 0x192   : > { %v5443_v59 = vadd.f32 %v4183_v40, %v5284_v19 }
 0x193   : > { %v4185_v52 = vpop.f32.mrf.mxu0  ;;  %v5447_v56 = vpop.f32.mrf.mxu1 }
 0x194   : > { %v4186_v54 = vadd.f32 %v4185_v52, %v4184_v44 }
 0x195   : > { %v4187_v57 = vpop.f32.mrf.mxu0  ;;  %v5452_v17 = vpop.f32.mrf.mxu1 }
 0x196   : > { %v5450_v7 = vadd.f32 %v4186_v54, %v5288_v29 }
 0x197   : > { %v4188_v60 = vpop.f32.mrf.mxu0  ;;  %v5454_v0 = vpop.f32.mrf.mxu1 }
 0x198   : > { %v4189_v63 = vadd.f32 %v4188_v60, %v4187_v57 }
 0x199   : > { %v4190_v4 = vpop.f32.mrf.mxu0  ;;  %v5459_v13 = vpop.f32.mrf.mxu1 }
 0x19a   : > { %v5457_v19 = vadd.f32 %v4189_v63, %v5294_v41 }
 0x19b   : > { %v4191_v14 = vpop.f32.mrf.mxu0  ;;  %v5461_v20 = vpop.f32.mrf.mxu1 }
 0x19c   : > { %v4192_v15 = vadd.f32 %v4191_v14, %v4190_v4 }
 0x19d   : > { %v4193_v23 = vpop.f32.mrf.mxu0  ;;  %v5466_v28 = vpop.f32.mrf.mxu1 }
 0x19e   : > { %v5464_v29 = vadd.f32 %v4192_v15, %v5301_v53 }
 0x19f   : > { %v4194_v32 = vpop.f32.mrf.mxu0  ;;  %v5468_v44 = vpop.f32.mrf.mxu1 }
 0x1a0   : > { %v4195_v40 = vadd.f32 %v4194_v32, %v4193_v23 }
 0x1a1   : > { %v4196_v52 = vpop.f32.mrf.mxu0  ;;  %v5473_v54 = vpop.f32.mrf.mxu1 }
 0x1a2   : > { %v5471_v41 = vadd.f32 %v4195_v40, %v5307_v2 }
 0x1a3   : > { %v4197_v57 = vpop.f32.mrf.mxu0  ;;  %v5475_v63 = vpop.f32.mrf.mxu1 }
 0x1a4   : > { %5794 = vst [vmem:[#allocation4_spill] sm:$0xff] %v5471_v41  ;;  %v4198_v60 = vadd.f32 %v4197_v57, %v4196_v52  ;;  %5795 = vst [vmem:[#allocation5_spill] sm:$0xff] %v5475_v63 }
 0x1a5   : > { %v4199_v4 = vpop.f32.mrf.mxu0  ;;  %v5480_v14 = vpop.f32.mrf.mxu1 }
 0x1a6   : > { %v5478_v53 = vadd.f32 %v4198_v60, %v5310_v12  ;;  %5797 = vst [vmem:[#allocation7_spill] sm:$0xff] %v5480_v14 }
 0x1a7   : > { %v4200_v15 = vpop.f32.mrf.mxu0  ;;  %v5482_v32 = vpop.f32.mrf.mxu1 }
 0x1a8   : > { %5796 = vst [vmem:[#allocation6_spill] sm:$0xff] %v5478_v53  ;;  %v4201_v23 = vadd.f32 %v4200_v15, %v4199_v4 }
 0x1a9   : > { %v4202_v3 = vpop.f32.mrf.mxu0  ;;  %v5487_v40 = vpop.f32.mrf.mxu1 }
 0x1aa   : > { %v5485_v2 = vadd.f32 %v4201_v23, %v5315_v24 }
 0x1ab   : > { %v4203_v51 = vpop.f32.mrf.mxu0  ;;  %v5489_v57 = vpop.f32.mrf.mxu1 }
 0x1ac   : > { %5798 = vst [vmem:[#allocation8_spill] sm:$0xff] %v5485_v2  ;;  %v4204_v52 = vadd.f32 %v4203_v51, %v4202_v3 }
 0x1ad   : > { %v4205_v41 = vpop.f32.mrf.mxu0  ;;  %v5494_v60 = vpop.f32.mrf.mxu1 }
 0x1ae   : > { %v5492_v12 = vadd.f32 %v4204_v52, %v5321_v35 }
 0x1af   : > { %v4206_v53 = vpop.f32.mrf.mxu0  ;;  %v5496_v15 = vpop.f32.mrf.mxu1 }
 0x1b0   : > { %5799 = vst [vmem:[#allocation9_spill] sm:$0xff] %v5492_v12  ;;  %v4207_v4 = vadd.f32 %v4206_v53, %v4205_v41  ;;  %5800 = vst [vmem:[#allocation10_spill] sm:$0xff] %v5496_v15 }
 0x1b1   : > { %v4208_v14 = vpop.f32.mrf.mxu0  ;;  %v5501_v23 = vpop.f32.mrf.mxu1 }
 0x1b2   : > { %v5499_v24 = vadd.f32 %v4207_v4, %v5326_v49  ;;  %5802 = vst [vmem:[#allocation12_spill] sm:$0xff] %v5501_v23 }
 0x1b3   : > { %v4209_v2 = vpop.f32.mrf.mxu0  ;;  %v5503_v3 = vpop.f32.mrf.mxu1 }
 0x1b4   : > { %5801 = vst [vmem:[#allocation11_spill] sm:$0xff] %v5499_v24  ;;  %v4210_v51 = vadd.f32 %v4209_v2, %v4208_v14  ;;  %5803 = vst [vmem:[#allocation13_spill] sm:$0xff] %v5503_v3 }
 0x1b5   : > { %v4211_v63 = vpop.f32.mrf.mxu0  ;;  %v5508_v52 = vpop.f32.mrf.mxu1 }
 0x1b6   : > { %v5506_v35 = vadd.f32 %v4210_v51, %v5329_v58  ;;  %5805 = vst [vmem:[#allocation15_spill] sm:$0xff] %v5508_v52 }
 0x1b7   : > { %v4212_v12 = vpop.f32.mrf.mxu0  ;;  %v5510_v53 = vpop.f32.mrf.mxu1 }
 0x1b8   : > { %5804 = vst [vmem:[#allocation14_spill] sm:$0xff] %v5506_v35  ;;  %v4213_v41 = vadd.f32 %v4212_v12, %v4211_v63 }
 0x1b9   : > { %v4214_v15 = vpop.f32.mrf.mxu0  ;;  %v5515_v4 = vpop.f32.mrf.mxu1 }
 0x1ba   : > { %v5513_v49 = vadd.f32 %v4213_v41, %v5334_v9 }
 0x1bb   : > { %v4215_v24 = vpop.f32.mrf.mxu0  ;;  %v5517_v2 = vpop.f32.mrf.mxu1 }
 0x1bc   : > { %5806 = vst [vmem:[#allocation16_spill] sm:$0xff] %v5513_v49  ;;  %v4216_v14 = vadd.f32 %v4215_v24, %v4214_v15  ;;  %5807 = vst [vmem:[#allocation17_spill] sm:$0xff] %v5517_v2 }
 0x1bd   : > { %v4217_v3 = vpop.f32.mrf.mxu0  ;;  %v5522_v52 = vpop.f32.mrf.mxu1 }
 0x1be   : > { %v5520_v58 = vadd.f32 %v4216_v14, %v5340_v21 }
 0x1bf   : > { %v4218_v51 = vpop.f32.mrf.mxu0  ;;  %v5527_v49 = vpop.f32.mrf.mxu1 }
 0x1c0   : > { %5808 = vst [vmem:[#allocation18_spill] sm:$0xff] %v5520_v58  ;;  %v4219_v35 = vadd.f32 %v4218_v51, %v4217_v3 }
 0x1c1   : > { %v4220_v63 = vpop.f32.mrf.mxu0  ;;  %v5532_v21 = vpop.f32.mrf.mxu1 }
 0x1c2   : > { %v5525_v12 = vadd.f32 %v4219_v35, %v5345_v34 }
 0x1c3   : > { %v4221_v9 = vpop.f32.mrf.mxu0  ;;  %v5537_v34 = vpop.f32.mrf.mxu1 }
 0x1c4   : > { %5809 = vst [vmem:[#allocation19_spill] sm:$0xff] %v5525_v12  ;;  %v4222_v41 = vadd.f32 %v4221_v9, %v4220_v63 }
 0x1c5   : > { %v4223_v23 = vpop.f32.mrf.mxu0 }
 0x1c6   : > { %v5530_v15 = vadd.f32 %v4222_v41, %v5348_v45  ;;  %v5542_v45 = vpop.f32.mrf.mxu1 }
 0x1c7   : > { %v4224_v24 = vpop.f32.mrf.mxu0 }
 0x1c8   : > { %5810 = vst [vmem:[#allocation20_spill] sm:$0xff] %v5530_v15  ;;  %v4225_v2 = vadd.f32 %v4224_v24, %v4223_v23 }
 0x1c9   : > { %v4226_v14 = vpop.f32.mrf.mxu0 }
 0x1ca   : > { %v5535_v3 = vadd.f32 %v4225_v2, %v5353_v62  ;;  %v5547_v62 = vpop.f32.mrf.mxu1 }
 0x1cb   : > { %v4227_v51 = vpop.f32.mrf.mxu0 }
 0x1cc   : > { %5811 = vst [vmem:[#allocation21_spill] sm:$0xff] %v5535_v3  ;;  %v4228_v58 = vadd.f32 %v4227_v51, %v4226_v14 }
 0x1cd   : > { %v4229_v35 = vpop.f32.mrf.mxu0 }
 0x1ce   : > { %v5540_v63 = vadd.f32 %v4228_v58, %v5359_v11  ;;  %v5552_v11 = vpop.f32.mrf.mxu1 }
 0x1cf   : > { %v4230_v9 = vpop.f32.mrf.mxu0 }
 0x1d0   : > { %5812 = vst [vmem:[#allocation22_spill] sm:$0xff] %v5540_v63  ;;  %v4231_v12 = vadd.f32 %v4230_v9, %v4229_v35 }
 0x1d1   : > { %v4232_v41 = vpop.f32.mrf.mxu0 }
 0x1d2   : > { %v5545_v23 = vadd.f32 %v4231_v12, %v5364_v26  ;;  %v5557_v26 = vpop.f32.mrf.mxu1 }
 0x1d3   : > { %v4233_v24 = vpop.f32.mrf.mxu0 }
 0x1d4   : > { %5813 = vst [vmem:[#allocation23_spill] sm:$0xff] %v5545_v23  ;;  %v4234_v15 = vadd.f32 %v4233_v24, %v4232_v41 }
 0x1d5   : > { %v4235_v2 = vpop.f32.mrf.mxu0 }
 0x1d6   : > { %v5550_v14 = vadd.f32 %v4234_v15, %v5367_v39  ;;  %v5562_v39 = vpop.f32.mrf.mxu1 }
 0x1d7   : > { %v4236_v51 = vpop.f32.mrf.mxu0 }
 0x1d8   : > { %5814 = vst [vmem:[#allocation24_spill] sm:$0xff] %v5550_v14  ;;  %v4237_v3 = vadd.f32 %v4236_v51, %v4235_v2 }
 0x1d9   : > { %v4238_v58 = vpop.f32.mrf.mxu0 }
 0x1da   : > { %v5555_v35 = vadd.f32 %v4237_v3, %v5372_v55  ;;  %v5567_v55 = vpop.f32.mrf.mxu1 }
 0x1db   : > { %v4239_v9 = vpop.f32.mrf.mxu0 }
 0x1dc   : > { %v4240_v63 = vadd.f32 %v4239_v9, %v4238_v58 }
 0x1dd   : > { %v4241_v12 = vpop.f32.mrf.mxu0 }
 0x1de   : > { %v5560_v41 = vadd.f32 %v4240_v63, %v5378_v5  ;;  %v5576_v5 = vpop.f32.mrf.mxu1 }
 0x1df   : > { %v4242_v24 = vpop.f32.mrf.mxu0 }
 0x1e0   : > { %5815 = vst [vmem:[#allocation25_spill] sm:$0xff] %v5560_v41  ;;  %v4243_v23 = vadd.f32 %v4242_v24, %v4241_v12  ;;  %v4280_v12 = vadd.f32 %v5414_v46, %v5409_v43  ;;  %v5586_v24 = vpop.f32.mrf.mxu1 }
 0x1e1   : > { %v4244_v15 = vpop.f32.mrf.mxu0 }
 0x1e2   : > { %v5565_v2 = vadd.f32 %v4243_v23, %v5382_v22  ;;  %v4277_v22 = vadd.f32 %v5407_v37, %v5400_v31  ;;  %v4289_v31 = vadd.f32 %v5431_v16, %v5426_v47 }
 0x1e3   : > { %v4245_v51 = vpop.f32.mrf.mxu0 }
 0x1e4   : > { %5816 = vst [vmem:[#allocation26_spill] sm:$0xff] %v5565_v2  ;;  %v4246_v14 = vadd.f32 %v4245_v51, %v4244_v15  ;;  %v5590_v2 = vpop.f32.mrf.mxu1 }
 0x1e5   : > { %v5569_v3 = vpop.f32.mrf.mxu0 }
 0x1e6   : > { %v5572_v58 = vadd.f32 %v4246_v14, %v5385_v36  ;;  %v2324_v36 = vadd.f32 %v4277_v22, %v5405_v61 }
 0x1e7   : > { %v5574_v9 = vpop.f32.mrf.mxu0 }
 0x1e8   : > { %5817 = vst [vmem:[#allocation27_spill] sm:$0xff] %v5572_v58  ;;  %v2327_v58 = vadd.f32 %v4280_v12, %v5412_v6  ;;  %v4286_v6 = vadd.f32 %v5424_v10, %v5417_v1  ;;  %v5601_v12 = vpop.f32.mrf.mxu1 }
 0x1e9   : > { %v5578_v63 = vpop.f32.mrf.mxu0 }
 0x1eb   : > { %v5582_v23 = vpop.f32.mrf.mxu0 }
 0x1ec   : > { %5818 = vst [vmem:[#allocation28_spill] sm:$0xff] %v5582_v23  ;;  %v4292_v23 = vadd.f32 %v5438_v30, %v5433_v25  ;;  %v2340_v30 = vadd.f32 %v4289_v31, %v5429_v38  ;;  %v4295_v38 = vadd.f32 %v5445_v50, %v5440_v42 }
 0x1ed   : > { %v4431_v15 = vpop.f32.mrf.mxu0 }
 0x1ee   : > { %v2485_v51 = vadd.f32 %v4431_v15, %v2324_v36  ;;  %v2343_v10 = vadd.f32 %v4292_v23, %v5436_v48  ;;  %v4304_v48 = vadd.f32 %v5466_v28, %v5461_v20  ;;  %v2348_v20 = vadd.f32 %v4295_v38, %v5443_v59 }
 0x1ef   : > { %v2476_v14 = vpop.f32.mrf.mxu0  ;;  %v4316_v59 = vadd.f32 %v5494_v60, %v5489_v57  ;;  %v5822_v57 = vld [vmem:[#allocation4_spill] sm:$0xff] }
 0x1f0   : > { %v2477_v37 = vadd.f32 %v2476_v14, %v5397_v18  ;;  %v2605_v61 = vmax.f32 %v2485_v51, 0.0  ;;  %v4301_v14 = vadd.f32 %v5459_v13, %v5454_v0  ;;  %v4298_v0 = vadd.f32 %v5452_v17, %v5447_v56 }
 0x1f1   : > { %v4432_v41 = vpop.f32.mrf.mxu0  ;;  %v2359_v28 = vadd.f32 %v4304_v48, %v5464_v29  ;;  %v4313_v17 = vadd.f32 %v5487_v40, %v5482_v32  ;;  %v5820_v32 = vld [vmem:[#allocation7_spill] sm:$0xff]  ;;  %v5823_v48 = vld [vmem:[#allocation9_spill] sm:$0xff] }
 0x1f2   : > { %v2488_v43 = vadd.f32 %v4432_v41, %v2327_v58  ;;  %v2603_v47 = vmax.f32 %v2477_v37, 0.0  ;;  %v5613_v58 = vpop.f32.mrf.mxu1  ;;  %v2356_v42 = vadd.f32 %v4301_v14, %v5457_v19  ;;  %v2351_v19 = vadd.f32 %v4298_v0, %v5450_v7 }
 0x1f3   : > { %v2479_v46 = vpop.f32.mrf.mxu0  ;;  %v4325_v0 = vadd.f32 %v5515_v4, %v5510_v53  ;;  %v5829_v53 = vld [vmem:[#allocation15_spill] sm:$0xff] }
 0x1f4   : > { %v2606_v22 = vmax.f32 %v2488_v43, 0.0  ;;  %v2480_v15 = vadd.f32 %v2479_v46, %v5402_v33  ;;  %v2335_v43 = vadd.f32 %v4286_v6, %v5422_v27 }
 0x1f5   : > { %v4435_v18 = vpop.f32.mrf.mxu0 }
 0x1f6   : > { %v2636_v16 = vpack.c.bf16 %v2606_v22, %v2605_v61  ;;  %v2604_v25 = vmax.f32 %v2480_v15, 0.0  ;;  %v2501_v1 = vadd.f32 %v4435_v18, %v2340_v30  ;;  %v4307_v30 = vadd.f32 %v5473_v54, %v5468_v44 }
 0x1f7   : > { %v2492_v33 = vpop.f32.mrf.mxu0 }
 0x1f8   : > { %3887 = vst [vmem:[%s5608_s14 + $0x8] sm:$0xff] %v2636_v16   ;;  %v2635_v41 = vpack.c.bf16 %v2604_v25, %v2603_v47  ;;  %v2493_v51 = vadd.f32 %v2492_v33, %v5419_v8  ;;  %v2609_v23 = vmax.f32 %v2501_v1, 0.0  ;;  %v5626_v8 = vpop.f32.mrf.mxu1  ;;  %v2364_v60 = vadd.f32 %v4307_v30, %v5822_v57 }
 0x1f9   : > { %v4436_v36 = vpop.f32.mrf.mxu0 }
 0x1fa   : > { %3731 = vst [vmem:[%s5608_s14] sm:$0xff] %v2635_v41   ;;  %v2504_v37 = vadd.f32 %v4436_v36, %v2343_v10  ;;  %4477 = vmatprep.mubr.bf16.mxu1 %v2635_v41  ;;  %v2607_v27 = vmax.f32 %v2493_v51, 0.0  ;;  %v5632_v47 = vpop.f32.mrf.mxu1  ;;  %v5819_v10 = vld [vmem:[#allocation5_spill] sm:$0xff] }
 0x1fb   : > { %v2495_v31 = vpop.f32.mrf.mxu0  ;;  %4478 = vmatmul.mubr.bf16.vlgmr.msra.gmra.mxu1 %v2636_v16  ;;  %v4310_v40 = vadd.f32 %v5820_v32, %v5819_v10 }
 0x1fc   : > { %v2610_v46 = vmax.f32 %v2504_v37, 0.0  ;;  %v2496_v61 = vadd.f32 %v2495_v31, %v2335_v43  ;;  %v5644_v36 = vpop.f32.mrf.mxu1  ;;  %v5821_v43 = vld [vmem:[#allocation8_spill] sm:$0xff] }
 0x1fd   : > { %v4439_v13 = vpop.f32.mrf.mxu0  ;;  %v2372_v44 = vadd.f32 %v4313_v17, %v5821_v43 }
 0x1fe   : > { %v2638_v22 = vpack.c.bf16 %v2610_v46, %v2609_v23  ;;  %v2608_v15 = vmax.f32 %v2496_v61, 0.0  ;;  %v2517_v18 = vadd.f32 %v4439_v13, %v2356_v42  ;;  %v2375_v23 = vadd.f32 %v4316_v59, %v5823_v48  ;;  %v5650_v46 = vpop.f32.mrf.mxu1  ;;  %v5825_v42 = vld [vmem:[#allocation10_spill] sm:$0xff] }
 0x1ff   : > { %v2508_v50 = vpop.f32.mrf.mxu0 }
 0x200   : > { %3889 = vst [vmem:[%s5608_s14 + $0x18] sm:$0xff] %v2638_v22   ;;  %v2637_v6 = vpack.c.bf16 %v2608_v15, %v2607_v27  ;;  %v2509_v16 = vadd.f32 %v2508_v50, %v2348_v20  ;;  %v2613_v29 = vmax.f32 %v2517_v18, 0.0  ;;  %v5826_v50 = vld [vmem:[#allocation12_spill] sm:$0xff]  ;;  %v5827_v20 = vld [vmem:[#allocation17_spill] sm:$0xff] }
 0x201   : > { %v4440_v56 = vpop.f32.mrf.mxu0 }
 0x202   : > { %3888 = vst [vmem:[%s5608_s14 + $0x10] sm:$0xff] %v2637_v6   ;;  %v2520_v25 = vadd.f32 %v4440_v56, %v2359_v28  ;;  %4481 = vmatprep.mubr.bf16.mxu1 %v2637_v6  ;;  %v2611_v7 = vmax.f32 %v2509_v16, 0.0  ;;  %v4319_v6 = vadd.f32 %v5826_v50, %v5825_v42  ;;  %v4328_v28 = vadd.f32 %v5522_v52, %v5827_v20  ;;  %v5831_v52 = vld [vmem:[#allocation11_spill] sm:$0xff]  ;;  %v5834_v50 = vld [vmem:[#allocation21_spill] sm:$0xff] }
 0x203   : > { %v2511_v33 = vpop.f32.mrf.mxu0  ;;  %4482 = vmatmul.mubr.bf16.gmra.mxu1 %v2638_v22  ;;  %v5824_v22 = vld [vmem:[#allocation6_spill] sm:$0xff]  ;;  %v5835_v20 = vld [vmem:[#allocation19_spill] sm:$0xff] }
 0x204   : > { %v2614_v41 = vmax.f32 %v2520_v25, 0.0  ;;  %v2512_v1 = vadd.f32 %v2511_v33, %v2351_v19  ;;  %v2367_v15 = vadd.f32 %v4310_v40, %v5824_v22  ;;  %v5828_v25 = vld [vmem:[#allocation13_spill] sm:$0xff]  ;;  %v5662_v19 = vpop.f32.mrf.mxu1 }
 0x205   : > { %v4443_v14 = vpop.f32.mrf.mxu0  ;;  %v4322_v4 = vadd.f32 %v5829_v53, %v5828_v25  ;;  %v5837_v25 = vld [vmem:[#allocation20_spill] sm:$0xff] }
 0x206   : > { %v2640_v51 = vpack.c.bf16 %v2614_v41, %v2613_v29  ;;  %v2612_v37 = vmax.f32 %v2512_v1, 0.0  ;;  %v2533_v31 = vadd.f32 %v4443_v14, %v2372_v44  ;;  %v5830_v41 = vld [vmem:[#allocation16_spill] sm:$0xff]  ;;  %v2380_v14 = vadd.f32 %v4319_v6, %v5831_v52 }
 0x207   : > { %v2524_v54 = vpop.f32.mrf.mxu0  ;;  %v2388_v1 = vadd.f32 %v4325_v0, %v5830_v41  ;;  %v4337_v44 = vadd.f32 %v5552_v11, %v5547_v62  ;;  %v4334_v62 = vadd.f32 %v5542_v45, %v5537_v34  ;;  %v5838_v52 = vld [vmem:[#allocation28_spill] sm:$0xff] }
 0x208   : > { %3891 = vst [vmem:[%s5608_s14 + $0x28] sm:$0xff] %v2640_v51   ;;  %v2639_v38 = vpack.c.bf16 %v2612_v37, %v2611_v7  ;;  %v2525_v13 = vadd.f32 %v2524_v54, %v2364_v60  ;;  %v2617_v56 = vmax.f32 %v2533_v31, 0.0  ;;  %v5832_v7 = vld [vmem:[#allocation18_spill] sm:$0xff]  ;;  %v5668_v37 = vpop.f32.mrf.mxu1  ;;  %v4331_v60 = vadd.f32 %v5532_v21, %v5527_v49 }
 0x209   : > { %v4444_v61 = vpop.f32.mrf.mxu0  ;;  %v5833_v31 = vld [vmem:[#allocation14_spill] sm:$0xff]  ;;  %v2404_v6 = vadd.f32 %v4337_v44, %v5834_v50  ;;  %v2399_v53 = vadd.f32 %v4334_v62, %v5837_v25 }
 0x20a   : > { %3890 = vst [vmem:[%s5608_s14 + $0x20] sm:$0xff] %v2639_v38   ;;  %v2536_v27 = vadd.f32 %v4444_v61, %v2375_v23  ;;  %4485 = vmatprep.mubr.bf16.mxu1 %v2639_v38  ;;  %v2615_v33 = vmax.f32 %v2525_v13, 0.0  ;;  %v2383_v57 = vadd.f32 %v4322_v4, %v5833_v31  ;;  %v4340_v23 = vadd.f32 %v5562_v39, %v5557_v26  ;;  %v4359_v11 = vpop.f32.mrf.mxu1  ;;  %v5836_v39 = vld [vmem:[#allocation22_spill] sm:$0xff] }
 0x20b   : > { %v2527_v18 = vpop.f32.mrf.mxu0  ;;  %4486 = vmatmul.mubr.bf16.gmra.mxu1 %v2640_v51  ;;  %v2391_v51 = vadd.f32 %v4328_v28, %v5832_v7  ;;  %v2396_v26 = vadd.f32 %v4331_v60, %v5835_v20  ;;  %v4343_v4 = vadd.f32 %v5576_v5, %v5567_v55 }
 0x20c   : > { %v2618_v17 = vmax.f32 %v2536_v27, 0.0  ;;  %v2528_v16 = vadd.f32 %v2527_v18, %v2367_v15  ;;  %v2407_v28 = vadd.f32 %v4340_v23, %v5836_v39  ;;  %v4360_v34 = vpop.f32.mrf.mxu1 }
 0x20d   : > { %v4447_v30 = vpop.f32.mrf.mxu0  ;;  %v4361_v31 = vadd.f32 %v4360_v34, %v4359_v11  ;;  %v4358_v11 = vadd.f32 %v5668_v37, %v5662_v19  ;;  %v5845_v19 = vld [vmem:[#allocation27_spill] sm:$0xff] }
 0x20e   : > { %v2642_v59 = vpack.c.bf16 %v2618_v17, %v2617_v56  ;;  %v2616_v29 = vmax.f32 %v2528_v16, 0.0  ;;  %v2549_v40 = vadd.f32 %v4447_v30, %v2388_v1  ;;  %v4349_v56 = vadd.f32 %v5613_v58, %v5601_v12  ;;  %v4362_v41 = vpop.f32.mrf.mxu1 }
 0x20f   : > { %v2540_v10 = vpop.f32.mrf.mxu0  ;;  %v4346_v58 = vadd.f32 %v5590_v2, %v5586_v24  ;;  %v5840_v24 = vld [vmem:[#allocation25_spill] sm:$0xff]  ;;  %v2431_v37 = vadd.f32 %v4358_v11, %v5845_v19 }
 0x210   : > { %3893 = vst [vmem:[%s5608_s14 + $0x38] sm:$0xff] %v2642_v59   ;;  %v2641_v32 = vpack.c.bf16 %v2616_v29, %v2615_v33  ;;  %v2541_v54 = vadd.f32 %v2540_v10, %v2380_v14  ;;  %v2621_v61 = vmax.f32 %v2549_v40, 0.0  ;;  %v4352_v33 = vadd.f32 %v5632_v47, %v5626_v8 }
 0x211   : > { %v4448_v43 = vpop.f32.mrf.mxu0  ;;  %v2420_v1 = vadd.f32 %v4349_v56, %v5555_v35  ;;  %v4252_v8 = vadd.f32 %v5838_v52, %v5578_v63  ;;  %v4363_v35 = vpop.f32.mrf.mxu1  ;;  %v4355_v63 = vadd.f32 %v5650_v46, %v5644_v36 }
 0x212   : > { %3892 = vst [vmem:[%s5608_s14 + $0x30] sm:$0xff] %v2641_v32   ;;  %v2552_v38 = vadd.f32 %v4448_v43, %v2391_v51  ;;  %4489 = vmatprep.mubr.bf16.mxu1 %v2641_v32  ;;  %v2619_v22 = vmax.f32 %v2541_v54, 0.0  ;;  %v4249_v32 = vadd.f32 %v5574_v9, %v5569_v3  ;;  %v5839_v51 = vld [vmem:[#allocation23_spill] sm:$0xff]  ;;  %v2423_v43 = vadd.f32 %v4352_v33, %v5840_v24  ;;  %v5841_v54 = vld [vmem:[#allocation24_spill] sm:$0xff]  ;;  %v5842_v3 = vld [vmem:[#allocation2_spill] sm:$0xff] }
 0x213   : > { %v2543_v48 = vpop.f32.mrf.mxu0  ;;  %4490 = vmatmul.mubr.bf16.gmra.mxu1 %v2642_v59  ;;  %v2412_v2 = vadd.f32 %v4343_v4, %v5839_v51  ;;  %v5719_v33 = vld [vmem:[%s5789_s4] ss:$0 sm:$0xff] }
 0x214   : > { %v2622_v0 = vmax.f32 %v2552_v38, 0.0  ;;  %v2544_v13 = vadd.f32 %v2543_v48, %v2383_v57  ;;  %v2415_v38 = vadd.f32 %v4346_v58, %v5841_v54  ;;  %v2275_v9 = vadd.f32 %v4249_v32, %v5842_v3  ;;  %v5843_v48 = vld [vmem:[#allocation3_spill] sm:$0xff] }
 0x215   : > { %v4451_v27 = vpop.f32.mrf.mxu0  ;;  %v2278_v23 = vadd.f32 %v4252_v8, %v5843_v48 }
 0x216   : > { %v2644_v15 = vpack.c.bf16 %v2622_v0, %v2621_v61  ;;  %v2620_v42 = vmax.f32 %v2544_v13, 0.0  ;;  %v2565_v18 = vadd.f32 %v4451_v27, %v2404_v6  ;;  %v4364_v0 = vadd.f32 %v4363_v35, %v4362_v41 }
 0x217   : > { %v2556_v49 = vpop.f32.mrf.mxu0  ;;  %v2436_v6 = vadd.f32 %v4361_v31, %v2275_v9 }
 0x218   : > { %3895 = vst [vmem:[%s5608_s14 + $0x48] sm:$0xff] %v2644_v15   ;;  %v2643_v21 = vpack.c.bf16 %v2620_v42, %v2619_v22  ;;  %v2557_v17 = vadd.f32 %v2556_v49, %v2396_v26  ;;  %v2625_v59 = vmax.f32 %v2565_v18, 0.0  ;;  %v2439_v20 = vadd.f32 %v4364_v0, %v2278_v23 }
 0x219   : > { %v4452_v45 = vpop.f32.mrf.mxu0 }
 0x21a   : > { %3894 = vst [vmem:[%s5608_s14 + $0x40] sm:$0xff] %v2643_v21   ;;  %v2568_v16 = vadd.f32 %v4452_v45, %v2407_v28  ;;  %4493 = vmatprep.mubr.bf16.mxu1 %v2643_v21  ;;  %v2623_v55 = vmax.f32 %v2557_v17, 0.0  ;;  %v5844_v21 = vld [vmem:[#allocation26_spill] sm:$0xff] }
 0x21b   : > { %v2559_v30 = vpop.f32.mrf.mxu0  ;;  %4494 = vmatmul.mubr.bf16.gmra.mxu1 %v2644_v15  ;;  %v2428_v18 = vadd.f32 %v4355_v63, %v5844_v21 }
 0x21c   : > { %v2626_v29 = vmax.f32 %v2568_v16, 0.0  ;;  %v2560_v12 = vadd.f32 %v2559_v30, %v2399_v53 }
 0x21d   : > { %v4455_v10 = vpop.f32.mrf.mxu0 }
 0x21e   : > { %v2646_v5 = vpack.c.bf16 %v2626_v29, %v2625_v59  ;;  %v2624_v40 = vmax.f32 %v2560_v12, 0.0  ;;  %v2581_v7 = vadd.f32 %v4455_v10, %v2420_v1 }
 0x21f   : > { %v2572_v47 = vpop.f32.mrf.mxu0 }
 0x220   : > { %3897 = vst [vmem:[%s5608_s14 + $0x58] sm:$0xff] %v2646_v5   ;;  %v2645_v14 = vpack.c.bf16 %v2624_v40, %v2623_v55  ;;  %v2573_v57 = vadd.f32 %v2572_v47, %v2412_v2  ;;  %v2629_v13 = vmax.f32 %v2581_v7, 0.0 }
 0x221   : > { %v4456_v44 = vpop.f32.mrf.mxu0 }
 0x222   : > { %3896 = vst [vmem:[%s5608_s14 + $0x50] sm:$0xff] %v2645_v14   ;;  %v2584_v60 = vadd.f32 %v4456_v44, %v2423_v43  ;;  %4497 = vmatprep.mubr.bf16.mxu1 %v2645_v14  ;;  %v2627_v15 = vmax.f32 %v2573_v57, 0.0 }
 0x223   : > { %v2575_v61 = vpop.f32.mrf.mxu0  ;;  %4498 = vmatmul.mubr.bf16.gmra.mxu1 %v2646_v5 }
 0x224   : > { %v2630_v62 = vmax.f32 %v2584_v60, 0.0  ;;  %v2576_v27 = vadd.f32 %v2575_v61, %v2415_v38 }
 0x225   : > { %v4459_v22 = vpop.f32.mrf.mxu0 }
 0x226   : > { %v2648_v42 = vpack.c.bf16 %v2630_v62, %v2629_v13  ;;  %v2628_v50 = vmax.f32 %v2576_v27, 0.0  ;;  %v2597_v46 = vadd.f32 %v4459_v22, %v2436_v6 }
 0x227   : > { %v2588_v49 = vpop.f32.mrf.mxu0 }
 0x228   : > { %3899 = vst [vmem:[%s5608_s14 + $0x68] sm:$0xff] %v2648_v42   ;;  %v2647_v36 = vpack.c.bf16 %v2628_v50, %v2627_v15  ;;  %v2589_v39 = vadd.f32 %v2588_v49, %v2428_v18  ;;  %v2633_v34 = vmax.f32 %v2597_v46, 0.0 }
 0x229   : > { %v4460_v26 = vpop.f32.mrf.mxu0 }
 0x22a   : > { %3898 = vst [vmem:[%s5608_s14 + $0x60] sm:$0xff] %v2647_v36   ;;  %v2600_v28 = vadd.f32 %v4460_v26, %v2439_v20  ;;  %4501 = vmatprep.mubr.bf16.mxu1 %v2647_v36  ;;  %v2631_v16 = vmax.f32 %v2589_v39, 0.0 }
 0x22b   : > { %v2591_v56 = vpop.f32.mrf.mxu0  ;;  %4502 = vmatmul.mubr.bf16.gmra.mxu1 %v2648_v42 }
 0x22c   : > { %v2634_v45 = vmax.f32 %v2600_v28, 0.0  ;;  %v2592_v17 = vadd.f32 %v2591_v56, %v2431_v37 }
 0x22e   : > { %v2650_v25 = vpack.c.bf16 %v2634_v45, %v2633_v34  ;;  %v2632_v53 = vmax.f32 %v2592_v17, 0.0 }
 0x230   : > { %3901 = vst [vmem:[%s5608_s14 + $0x78] sm:$0xff] %v2650_v25   ;;  %v2649_v4 = vpack.c.bf16 %v2632_v53, %v2631_v16 }
 0x232   : > { %3900 = vst [vmem:[%s5608_s14 + $0x70] sm:$0xff] %v2649_v4   ;;  %4505 = vmatprep.mubr.bf16.mxu1 %v2649_v4 }
 0x233   : > { %4506 = vmatmul.mubr.bf16.gmra.mxu1 %v2650_v25 }
 0x2bb   : > { %v4479_v30 = vpop.f32.mrf.mxu1 }
 0x2bc   : > { %v2909_v29 = vadd.f32 %v4479_v30, %v5719_v33 }
 0x2bd   : > { %v2900_v59 = vpop.f32.mrf.mxu1 }
 0x2be   : > { %v2901_v58 = vadd.f32 %v5719_v33, %v2900_v59  ;;  %v3029_v10 = vmax.f32 %v2909_v29, 0.0 }
 0x2bf   : > { %v4480_v12 = vpop.f32.mrf.mxu1 }
 0x2c0   : > { %v2912_v41 = vadd.f32 %v4480_v12, %v5719_v33  ;;  %v3027_v40 = vmax.f32 %v2901_v58, 0.0 }
 0x2c1   : > { %v2903_v1 = vpop.f32.mrf.mxu1 }
 0x2c2   : > { %v3030_v32 = vmax.f32 %v2912_v41, 0.0  ;;  %v2904_v55 = vadd.f32 %v5719_v33, %v2903_v1 }
 0x2c3   : > { %v4483_v5 = vpop.f32.mrf.mxu1 }
 0x2c4   : > { %v3815_v52 = vpack.c.bf16 %v3030_v32, %v3029_v10  ;;  %v3028_v8 = vmax.f32 %v2904_v55, 0.0  ;;  %v2925_v7 = vadd.f32 %v4483_v5, %v5719_v33 }
 0x2c5   : > { %v2916_v47 = vpop.f32.mrf.mxu1 }
 0x2c6   : > { %3902 = vst [vmem:[%s5730_s19 + $0x8] sm:$0xff] %v3815_v52   ;;  %v3810_v14 = vpack.c.bf16 %v3028_v8, %v3027_v40  ;;  %v2917_v2 = vadd.f32 %v5719_v33, %v2916_v47  ;;  %v3033_v35 = vmax.f32 %v2925_v7, 0.0 }
 0x2c7   : > { %v4484_v51 = vpop.f32.mrf.mxu1 }
 0x2c8   : > { %3811 = vst [vmem:[%s5730_s19] sm:$0xff] %v3810_v14   ;;  %v2928_v24 = vadd.f32 %v4484_v51, %v5719_v33  ;;  %v3031_v3 = vmax.f32 %v2917_v2, 0.0 }
 0x2c9   : > { %v2919_v43 = vpop.f32.mrf.mxu1 }
 0x2ca   : > { %v3034_v44 = vmax.f32 %v2928_v24, 0.0  ;;  %v2920_v54 = vadd.f32 %v5719_v33, %v2919_v43 }
 0x2cb   : > { %v4487_v38 = vpop.f32.mrf.mxu1 }
 0x2cc   : > { %v3825_v9 = vpack.c.bf16 %v3034_v44, %v3033_v35  ;;  %v3032_v31 = vmax.f32 %v2920_v54, 0.0  ;;  %v2941_v63 = vadd.f32 %v4487_v38, %v5719_v33 }
 0x2cd   : > { %v2932_v57 = vpop.f32.mrf.mxu1 }
 0x2ce   : > { %3904 = vst [vmem:[%s5730_s19 + $0x18] sm:$0xff] %v3825_v9   ;;  %v3820_v60 = vpack.c.bf16 %v3032_v31, %v3031_v3  ;;  %v2933_v23 = vadd.f32 %v5719_v33, %v2932_v57  ;;  %v3037_v13 = vmax.f32 %v2941_v63, 0.0 }
 0x2cf   : > { %v4488_v48 = vpop.f32.mrf.mxu1 }
 0x2d0   : > { %3903 = vst [vmem:[%s5730_s19 + $0x10] sm:$0xff] %v3820_v60   ;;  %v2944_v61 = vadd.f32 %v4488_v48, %v5719_v33  ;;  %v3035_v22 = vmax.f32 %v2933_v23, 0.0 }
 0x2d1   : > { %v2935_v0 = vpop.f32.mrf.mxu1 }
 0x2d2   : > { %v3038_v62 = vmax.f32 %v2944_v61, 0.0  ;;  %v2936_v27 = vadd.f32 %v5719_v33, %v2935_v0 }
 0x2d3   : > { %v4491_v11 = vpop.f32.mrf.mxu1 }
 0x2d4   : > { %v3835_v15 = vpack.c.bf16 %v3038_v62, %v3037_v13  ;;  %v3036_v42 = vmax.f32 %v2936_v27, 0.0  ;;  %v2957_v49 = vadd.f32 %v4491_v11, %v5719_v33 }
 0x2d5   : > { %v2948_v50 = vpop.f32.mrf.mxu1 }
 0x2d6   : > { %3906 = vst [vmem:[%s5730_s19 + $0x28] sm:$0xff] %v3835_v15   ;;  %v3830_v6 = vpack.c.bf16 %v3036_v42, %v3035_v22  ;;  %v2949_v46 = vadd.f32 %v5719_v33, %v2948_v50  ;;  %v3041_v20 = vmax.f32 %v2957_v49, 0.0 }
 0x2d7   : > { %v4492_v36 = vpop.f32.mrf.mxu1 }
 0x2d8   : > { %3905 = vst [vmem:[%s5730_s19 + $0x20] sm:$0xff] %v3830_v6   ;;  %v2960_v21 = vadd.f32 %v4492_v36, %v5719_v33  ;;  %v3039_v19 = vmax.f32 %v2949_v46, 0.0 }
 0x2d9   : > { %v2951_v18 = vpop.f32.mrf.mxu1 }
 0x2da   : > { %v3042_v26 = vmax.f32 %v2960_v21, 0.0  ;;  %v2952_v39 = vadd.f32 %v5719_v33, %v2951_v18 }
 0x2db   : > { %v4495_v28 = vpop.f32.mrf.mxu1 }
 0x2dc   : > { %v3845_v37 = vpack.c.bf16 %v3042_v26, %v3041_v20  ;;  %v3040_v56 = vmax.f32 %v2952_v39, 0.0  ;;  %v2973_v17 = vadd.f32 %v4495_v28, %v5719_v33 }
 0x2dd   : > { %v2964_v34 = vpop.f32.mrf.mxu1 }
 0x2de   : > { %3908 = vst [vmem:[%s5730_s19 + $0x38] sm:$0xff] %v3845_v37   ;;  %v3840_v45 = vpack.c.bf16 %v3040_v56, %v3039_v19  ;;  %v2965_v25 = vadd.f32 %v5719_v33, %v2964_v34  ;;  %v3045_v30 = vmax.f32 %v2973_v17, 0.0 }
 0x2df   : > { %v4496_v16 = vpop.f32.mrf.mxu1 }
 0x2e0   : > { %3907 = vst [vmem:[%s5730_s19 + $0x30] sm:$0xff] %v3840_v45   ;;  %v2976_v53 = vadd.f32 %v4496_v16, %v5719_v33  ;;  %v3043_v58 = vmax.f32 %v2965_v25, 0.0 }
 0x2e1   : > { %v2967_v4 = vpop.f32.mrf.mxu1 }
 0x2e2   : > { %v3046_v59 = vmax.f32 %v2976_v53, 0.0  ;;  %v2968_v29 = vadd.f32 %v5719_v33, %v2967_v4 }
 0x2e3   : > { %v4499_v12 = vpop.f32.mrf.mxu1 }
 0x2e4   : > { %v3855_v41 = vpack.c.bf16 %v3046_v59, %v3045_v30  ;;  %v3044_v1 = vmax.f32 %v2968_v29, 0.0  ;;  %v2989_v55 = vadd.f32 %v4499_v12, %v5719_v33 }
 0x2e5   : > { %v2980_v10 = vpop.f32.mrf.mxu1 }
 0x2e6   : > { %3910 = vst [vmem:[%s5730_s19 + $0x48] sm:$0xff] %v3855_v41   ;;  %v3850_v32 = vpack.c.bf16 %v3044_v1, %v3043_v58  ;;  %v2981_v40 = vadd.f32 %v5719_v33, %v2980_v10  ;;  %v3049_v47 = vmax.f32 %v2989_v55, 0.0 }
 0x2e7   : > { %v4500_v5 = vpop.f32.mrf.mxu1 }
 0x2e8   : > { %3909 = vst [vmem:[%s5730_s19 + $0x40] sm:$0xff] %v3850_v32   ;;  %v2992_v52 = vadd.f32 %v4500_v5, %v5719_v33  ;;  %v3047_v2 = vmax.f32 %v2981_v40, 0.0 }
 0x2e9   : > { %v2983_v8 = vpop.f32.mrf.mxu1 }
 0x2ea   : > { %v3050_v14 = vmax.f32 %v2992_v52, 0.0  ;;  %v2984_v7 = vadd.f32 %v5719_v33, %v2983_v8 }
 0x2eb   : > { %v4503_v51 = vpop.f32.mrf.mxu1 }
 0x2ec   : > { %v3865_v24 = vpack.c.bf16 %v3050_v14, %v3049_v47  ;;  %v3048_v43 = vmax.f32 %v2984_v7, 0.0  ;;  %v3005_v54 = vadd.f32 %v4503_v51, %v5719_v33 }
 0x2ed   : > { %v2996_v35 = vpop.f32.mrf.mxu1 }
 0x2ee   : > { %3912 = vst [vmem:[%s5730_s19 + $0x58] sm:$0xff] %v3865_v24   ;;  %v3860_v44 = vpack.c.bf16 %v3048_v43, %v3047_v2  ;;  %v2997_v3 = vadd.f32 %v5719_v33, %v2996_v35  ;;  %v3053_v57 = vmax.f32 %v3005_v54, 0.0 }
 0x2ef   : > { %v4504_v38 = vpop.f32.mrf.mxu1 }
 0x2f0   : > { %3911 = vst [vmem:[%s5730_s19 + $0x50] sm:$0xff] %v3860_v44   ;;  %v3008_v9 = vadd.f32 %v4504_v38, %v5719_v33  ;;  %v3051_v23 = vmax.f32 %v2997_v3, 0.0 }
 0x2f1   : > { %v2999_v31 = vpop.f32.mrf.mxu1 }
 0x2f2   : > { %v3054_v60 = vmax.f32 %v3008_v9, 0.0  ;;  %v3000_v63 = vadd.f32 %v5719_v33, %v2999_v31 }
 0x2f3   : > { %v4507_v48 = vpop.f32.mrf.mxu1 }
 0x2f4   : > { %v3875_v61 = vpack.c.bf16 %v3054_v60, %v3053_v57  ;;  %v3052_v0 = vmax.f32 %v3000_v63, 0.0  ;;  %v3021_v27 = vadd.f32 %v4507_v48, %v5719_v33 }
 0x2f5   : > { %v3012_v13 = vpop.f32.mrf.mxu1 }
 0x2f6   : > { %3914 = vst [vmem:[%s5730_s19 + $0x68] sm:$0xff] %v3875_v61   ;;  %v3870_v62 = vpack.c.bf16 %v3052_v0, %v3051_v23  ;;  %v3013_v22 = vadd.f32 %v5719_v33, %v3012_v13  ;;  %v3057_v50 = vmax.f32 %v3021_v27, 0.0 }
 0x2f7   : > { %v4508_v11 = vpop.f32.mrf.mxu1 }
 0x2f8   : > { %3913 = vst [vmem:[%s5730_s19 + $0x60] sm:$0xff] %v3870_v62   ;;  %v3024_v15 = vadd.f32 %v4508_v11, %v5719_v33  ;;  %v3055_v36 = vmax.f32 %v3013_v22, 0.0 }
 0x2f9   : > { %v3015_v42 = vpop.f32.mrf.mxu1 }
 0x2fa   : > { %v3058_v6 = vmax.f32 %v3024_v15, 0.0  ;;  %v3016_v49 = vadd.f32 %v5719_v33, %v3015_v42 }
 0x2fc   : > { %v3885_v46 = vpack.c.bf16 %v3058_v6, %v3057_v50  ;;  %v3056_v21 = vmax.f32 %v3016_v49, 0.0 }
 0x2fe   : > { %3916 = vst [vmem:[%s5730_s19 + $0x78] sm:$0xff] %v3885_v46   ;;  %v3880_v18 = vpack.c.bf16 %v3056_v21, %v3055_v36 }
 0x300   : > { %3915 = vst [vmem:[%s5730_s19 + $0x70] sm:$0xff] %v3880_v18  }
 0x301 PF: > { %s17_s23 = sadd.s32 1, %s4844_s23   ;;  %s5846_s21 = smov %s4840_s22 }
 0x302   : > { %p14_p5 = scmp.ge.s32.totalorder %s17_s23, 4   ;;  %s5847_s22 = smov %s5849_s24 }
 0x304   :  { %16 = sbr.rel (!%p14_p5) target bundleno = 2 (0x2), region = 82 }

// kernel: _lambda_.6
= control target key start
LH: loop header
LB: loop body
LE: loop exit
PB: predicated region body
PF: predicated region fallthrough
CT: control target
= control target key end

     0   :  { %12 = vsyncpa [#allocation3], 0  ;;  %s3025_s0 = inlined_call_operand.vmem [shape: bf16[2,64,1152], index: 0, kind: input, shape index: {}]   ;;  %s3026_s1 = inlined_call_operand.vmem [shape: bf16[1152,128], index: 1, kind: input, shape index: {}]   ;;  %s3027_s2 = inlined_call_operand.vmem [shape: f32[1,128], index: 2, kind: input, shape index: {}, may-alias: {2,4}]   ;;  %s3028_s3 = inlined_call_operand.vmem [shape: bf16[128,128], index: 3, kind: input, shape index: {}]   ;;  %s3029_s4 = inlined_call_operand.vmem [shape: f32[1,128], index: 4, kind: input, shape index: {}, may-alias: {2,4}]   ;;  %s3030_s5 = inlined_call_operand.hbm [shape: bf16[2,64,128], index: 5, kind: output, shape index: {0}]   ;;  %s3031_s6 = inlined_call_operand.vmem [shape: bf16[2,64,128], index: 6, kind: output, shape index: {1}]  }
   0x1   :  { %14 = vsyncpa [#allocation3 + $0x1], 0  ;;  %s2571_s21 = smov 0   ;;  %s2573_s22 = smov 0  }
   0x2   :  { %s2575_s23 = smov 0   ;;  %s2577_s24 = smov 0  }
   0x3   :  { %s2579_s25 = smov 0   ;;  %s2581_s26 = smov 0  }
   0x4 LB: > { %s1821_s27 = sadd.s32 4294967295, %s2531_s26   ;;  %s1822_s28 = sadd.s32 4294967294, %s2531_s26   ;;  %s2531_s26 = sphi %s2581_s26, %s20_s26   ;;  %s2527_s25 = sphi %s2579_s25, %s3052_s25   ;;  %s2523_s24 = sphi %s2577_s24, %s3051_s24   ;;  %s2519_s23 = sphi %s2575_s23, %s3050_s23   ;;  %s2515_s22 = sphi %s2573_s22, %s3049_s22   ;;  %s2511_s21 = sphi %s2571_s21, %s3048_s21  }
   0x5   : > { %s32_s29 = sadd.s32 1, %s2527_s25  ;;  %s153_s30 = sadd.s32 1, %s2519_s23 }
   0x6   : > { %p34_p0 = scmp.ge.s32.totalorder %s32_s29, 2  ;;  %p163_p1 = scmp.ne.s32.totalorder %s2519_s23, %s2515_s22 }
   0x7   : > { %p164_p2 = scmp.eq.s32.totalorder %s1821_s27, 1  ;;  %p169_p3 = scmp.ne.s32.totalorder %s2515_s22, %s2511_s21 }
   0x8   : > { %s3054_s29 = smov (%p34_p0, %s32_s29), 0  ;;  %p170_p5 = scmp.eq.s32.totalorder %s1822_s28, 1 }
   0x9   : > { %p2611_p4 = por %p164_p2, %p163_p1  ;;  %s148_s8 = ssub.s32 %s2527_s25, %s3054_s29 }
   0xa   : > { %p1825_p6 = scmp.ge.s32.totalorder %s2531_s26, 1  ;;  %p151_p7 = scmp.eq.s32.totalorder %s148_s8, 0 }
   0xb   : > { %p2618_p8 = por %p170_p5, %p169_p3  ;;  %p242_p9 = scmp.lt.s32.totalorder %s2531_s26, 3 }
   0xc   : > { %s2624_s10 = scalar_select %p151_p7, %s2519_s23, %s153_s30  }
   0xd   : > { %p243_p10 = pnand %p1825_p6, %p242_p9 }
   0xf   : > { %246 = sbr.rel (%p243_p10) target bundleno = 537 (0x219), region = 40 }
  0x14   : > { %v2323_v0 = vld [vmem:[%s3026_s1 + $0x78] sm:$0xff]   ;;  %v2327_v4 = vld [vmem:[%s3026_s1 + $0x70] sm:$0xff]   ;;  %v2331_v8 = vld [vmem:[%s3026_s1 + $0x68] sm:$0xff]   ;;  %p287_p11 = scmp.lt.s32.totalorder %s2523_s24, 1  ;;  %s272_s13 = sand.u32 1, %s2515_s22  }
  0x15   : > { %v2324_v1 = vld [vmem:[%s3026_s1 + $0x38] sm:$0xff]   ;;  %2033 = vmatprep.subr.bf16.mxu0 %v2323_v0  ;;  %v2328_v5 = vld [vmem:[%s3026_s1 + $0x30] sm:$0xff]   ;;  %v2332_v9 = vld [vmem:[%s3026_s1 + $0x28] sm:$0xff]   ;;  %s1986_s16 = sshll.u32 %s2523_s24, 9  ;;  %s2973_s28 = scalar_lea.sflag [#allocation3], %s272_s13 }
  0x16   : > { %v2325_v2 = vld [vmem:[%s3026_s1 + $0xf8] sm:$0xff]   ;;  %2034 = vmatpush3.bf16.msra.mxu0 %v2324_v1  ;;  %v2329_v6 = vld [vmem:[%s3026_s1 + $0xf0] sm:$0xff]   ;;  %v2333_v10 = vld [vmem:[%s3026_s1 + $0xe8] sm:$0xff]   ;;  %s2691_s11 = scalar_select %p287_p11, %s2523_s24, 1 }
  0x17   : > { %v2326_v3 = vld [vmem:[%s3026_s1 + $0xb8] sm:$0xff]   ;;  %2073 = vmatprep.subr.bf16.mxu1 %v2325_v2  ;;  %2035 = vmatprep.subr.bf16.mxu0 %v2327_v4  ;;  %v2330_v7 = vld [vmem:[%s3026_s1 + $0xb0] sm:$0xff]   ;;  %v2334_v11 = vld [vmem:[%s3026_s1 + $0xa8] sm:$0xff]   ;;  %s2969_s27 = scalar_lea.hbm %s3030_s5, %s1986_s16 }
  0x18   : > { %2074 = vmatpush3.bf16.msra.mxu1 %v2326_v3  ;;  %v2335_v12 = vld [vmem:[%s3026_s1 + $0x60] sm:$0xff]   ;;  %v2339_v16 = vld [vmem:[%s3026_s1 + $0x58] sm:$0xff]   ;;  %v2343_v20 = vld [vmem:[%s3026_s1 + $0x50] sm:$0xff]   ;;  %s2265_s20 = smul.u32 288, %s2691_s11 }
  0x19   : > { %2075 = vmatprep.subr.bf16.mxu1 %v2329_v6  ;;  %v2336_v13 = vld [vmem:[%s3026_s1 + $0x20] sm:$0xff]   ;;  %v2340_v17 = vld [vmem:[%s3026_s1 + $0x18] sm:$0xff]   ;;  %v2344_v21 = vld [vmem:[%s3026_s1 + $0x10] sm:$0xff]  }
  0x1a   : > { %2036 = vmatpush3.bf16.msra.mxu0 %v2328_v5  ;;  %v2337_v14 = vld [vmem:[%s3026_s1 + $0xe0] sm:$0xff]   ;;  %v2341_v18 = vld [vmem:[%s3026_s1 + $0xd8] sm:$0xff]   ;;  %v2345_v22 = vld [vmem:[%s3026_s1 + $0xd0] sm:$0xff]   ;;  %s2721_s18 = scalar_lea.vmem %s3025_s0, %s2265_s20  ;;  %s2533_s20 = smov [#allocation2]  }
  0x1b   : > { %2037 = vmatprep.subr.bf16.mxu0 %v2331_v8  ;;  %v2338_v15 = vld [vmem:[%s3026_s1 + $0xa0] sm:$0xff]   ;;  %v2342_v19 = vld [vmem:[%s3026_s1 + $0x98] sm:$0xff]   ;;  %v2346_v23 = vld [vmem:[%s3026_s1 + $0x90] sm:$0xff]   ;;  %s2459_s8 = sshll.u32 %s2533_s20, 4  ;;  %s2460_s8 = int_to_ptr.vmem [resolvable:$false] %s2459_s8 }
  0x1c   : > { %2076 = vmatpush3.bf16.msra.mxu1 %v2330_v7  ;;  %v2347_v24 = vld [vmem:[%s3026_s1 + $0x48] sm:$0xff]   ;;  %v2351_v28 = vld [vmem:[%s3026_s1 + $0x40] sm:$0xff]   ;;  %v2358_v34 = vld [vmem:[%s3026_s1 + $0x178] sm:$0xff]   ;;  %s2461_s12 = scalar_lea.vmem %s2460_s8, 1024 }
  0x1d   : > { %2077 = vmatprep.subr.bf16.mxu1 %v2333_v10  ;;  %v2348_v25 = vld [vmem:[%s3026_s1 + $0x8] sm:$0xff]   ;;  %v2352_v29 = vld [vmem:[%s3026_s1] sm:$0xff]   ;;  %v2362_v37 = vld [vmem:[%s3026_s1 + $0x138] sm:$0xff]  }
  0x1e   : > { %2038 = vmatpush3.bf16.msra.mxu0 %v2332_v9  ;;  %v2349_v26 = vld [vmem:[%s3026_s1 + $0xc8] sm:$0xff]   ;;  %v2353_v30 = vld [vmem:[%s3026_s1 + $0xc0] sm:$0xff]   ;;  %v2363_v38 = vld [vmem:[%s3026_s1 + $0x1f8] sm:$0xff]  }
  0x1f   : > { %2039 = vmatprep.subr.bf16.mxu0 %v2335_v12  ;;  %v2350_v27 = vld [vmem:[%s3026_s1 + $0x88] sm:$0xff]   ;;  %v2354_v31 = vld [vmem:[%s2721_s18] ss:$36 sps:$4 sm:$0xff]   ;;  %v2364_v39 = vld [vmem:[%s3026_s1 + $0x1b8] sm:$0xff]  }
  0x20   : > { %2078 = vmatpush3.bf16.msra.mxu1 %v2334_v11  ;;  %v2356_v32 = vld [vmem:[%s2721_s18 + $0x4] ss:$36 sps:$4 sm:$0xff]   ;;  %v2361_v36 = vld [vmem:[%s2721_s18 + $0xc] ss:$36 sps:$4 sm:$0xff]   ;;  %v2373_v47 = vld [vmem:[%s2721_s18 + $0x54] ss:$36 sps:$4 sm:$0xff]  }
  0x21   : > { %2079 = vmatprep.subr.bf16.mxu1 %v2337_v14  ;;  %v2357_v33 = vld [vmem:[%s3026_s1 + $0x80] sm:$0xff]   ;;  %1148 = vmatprep.mubr.bf16.mxu0 %v2356_v32  ;;  %v2359_v35 = vld [vmem:[%s2721_s18 + $0x8] ss:$36 sps:$4 sm:$0xff]   ;;  %v2365_v40 = vld [vmem:[%s3026_s1 + $0x170] sm:$0xff]  }
  0x22   : > { %2040 = vmatpush3.bf16.msra.mxu0 %v2336_v13  ;;  %1213 = vmatprep.mubr.bf16.mxu1 %v2361_v36  ;;  %v2366_v41 = vld [vmem:[%s3026_s1 + $0x130] sm:$0xff]   ;;  %v2371_v45 = vld [vmem:[%s2721_s18 + $0x48] ss:$36 sps:$4 sm:$0xff]   ;;  %v2379_v52 = vld [vmem:[%s3026_s1 + $0x160] sm:$0xff]  }
  0x23   : > { %2041 = vmatprep.subr.bf16.mxu0 %v2339_v16  ;;  %v2367_v42 = vld [vmem:[%s3026_s1 + $0x1f0] sm:$0xff]   ;;  %v2372_v46 = vld [vmem:[%s3026_s1 + $0x168] sm:$0xff]   ;;  %v2380_v53 = vld [vmem:[%s3026_s1 + $0x120] sm:$0xff]  }
  0x24   : > { %2080 = vmatpush3.bf16.msra.mxu1 %v2338_v15  ;;  %v2368_v43 = vld [vmem:[%s2721_s18 + $0x4c] ss:$36 sps:$4 sm:$0xff]   ;;  %v2381_v54 = vld [vmem:[%s3026_s1 + $0x1e0] sm:$0xff]   ;;  %v2382_v55 = vld [vmem:[%s2721_s18 + $0x94] ss:$36 sps:$4 sm:$0xff]  }
  0x25   : > { %2081 = vmatprep.subr.bf16.mxu1 %v2341_v18  ;;  %v2370_v44 = vld [vmem:[%s3026_s1 + $0x1b0] sm:$0xff]   ;;  %v2375_v48 = vld [vmem:[%s3026_s1 + $0x128] sm:$0xff]   ;;  %v2384_v56 = vld [vmem:[%s3026_s1 + $0x1a0] sm:$0xff]  }
  0x26   : > { %2042 = vmatpush3.bf16.msra.mxu0 %v2340_v17  ;;  %v2376_v49 = vld [vmem:[%s2721_s18 + $0x50] ss:$36 sps:$4 sm:$0xff]   ;;  %v2377_v50 = vld [vmem:[%s3026_s1 + $0x1e8] sm:$0xff]   ;;  %v2386_v58 = vld [vmem:[%s3026_s1 + $0x158] sm:$0xff]  }
  0x27   : > { %2043 = vmatprep.subr.bf16.mxu0 %v2343_v20  ;;  %v2378_v51 = vld [vmem:[%s3026_s1 + $0x1a8] sm:$0xff]   ;;  %v2385_v57 = vld [vmem:[%s2721_s18 + $0x90] ss:$36 sps:$4 sm:$0xff]   ;;  %v2387_v59 = vld [vmem:[%s2721_s18 + $0x9c] ss:$36 sps:$4 sm:$0xff]  }
  0x28   : > { %2082 = vmatpush3.bf16.msra.mxu1 %v2342_v19  ;;  %v2389_v60 = vld [vmem:[%s3026_s1 + $0x118] sm:$0xff]   ;;  %v2393_v0 = vld [vmem:[%s3026_s1 + $0x150] sm:$0xff]   ;;  %v2400_v6 = vld [vmem:[%s3026_s1 + $0x148] sm:$0xff]  }
  0x29   : > { %2083 = vmatprep.subr.bf16.mxu1 %v2345_v22  ;;  %v2390_v61 = vld [vmem:[%s2721_s18 + $0x98] ss:$36 sps:$4 sm:$0xff]   ;;  %v2394_v1 = vld [vmem:[%s3026_s1 + $0x110] sm:$0xff]   ;;  %v2401_v7 = vld [vmem:[%s2721_s18 + $0xe4] ss:$36 sps:$4 sm:$0xff]  }
  0x2a   : > { %2044 = vmatpush3.bf16.msra.mxu0 %v2344_v21  ;;  %v2391_v62 = vld [vmem:[%s3026_s1 + $0x1d8] sm:$0xff]   ;;  %v2395_v2 = vld [vmem:[%s3026_s1 + $0x1d0] sm:$0xff]   ;;  %v2403_v8 = vld [vmem:[%s3026_s1 + $0x108] sm:$0xff]  }
  0x2b   : > { %2045 = vmatprep.subr.bf16.mxu0 %v2347_v24  ;;  %v2392_v63 = vld [vmem:[%s3026_s1 + $0x198] sm:$0xff]   ;;  %v2398_v4 = vld [vmem:[%s3026_s1 + $0x190] sm:$0xff]   ;;  %v2404_v9 = vld [vmem:[%s2721_s18 + $0xe0] ss:$36 sps:$4 sm:$0xff]  }
  0x2c   : > { %2084 = vmatpush3.bf16.msra.mxu1 %v2346_v23  ;;  %v2396_v3 = vld [vmem:[%s2721_s18 + $0xdc] ss:$36 sps:$4 sm:$0xff]   ;;  %v2405_v10 = vld [vmem:[%s3026_s1 + $0x1c8] sm:$0xff]   ;;  %v2410_v15 = vld [vmem:[%s2721_s18 + $0x10] ss:$36 sps:$4 sm:$0xff]  }
  0x2d   : > { %2085 = vmatprep.subr.bf16.mxu1 %v2349_v26  ;;  %v2399_v5 = vld [vmem:[%s2721_s18 + $0xd8] ss:$36 sps:$4 sm:$0xff]   ;;  %v2406_v11 = vld [vmem:[%s3026_s1 + $0x188] sm:$0xff]   ;;  %v2407_v12 = vld [vmem:[%s3026_s1 + $0x140] sm:$0xff]  }
  0x2e   : > { %2046 = vmatpush3.bf16.msra.mxu0 %v2348_v25  ;;  %v2408_v13 = vld [vmem:[%s3026_s1 + $0x100] sm:$0xff]   ;;  %v2412_v16 = vld [vmem:[%s2721_s18 + $0x14] ss:$36 sps:$4 sm:$0xff]   ;;  %v2422_v24 = vld [vmem:[%s3026_s1 + $0x228] sm:$0xff]  }
  0x2f   : > { %2047 = vmatprep.subr.bf16.mxu0 %v2351_v28  ;;  %v2409_v14 = vld [vmem:[%s3026_s1 + $0x1c0] sm:$0xff]   ;;  %v2414_v18 = vld [vmem:[%s3026_s1 + $0x238] sm:$0xff]   ;;  %v2418_v21 = vld [vmem:[%s3026_s1 + $0x230] sm:$0xff]  }
  0x30   : > { %2086 = vmatpush3.bf16.msra.mxu1 %v2350_v27  ;;  %v2413_v17 = vld [vmem:[%s3026_s1 + $0x180] sm:$0xff]   ;;  %v2415_v19 = vld [vmem:[%s2721_s18 + $0x18] ss:$36 sps:$4 sm:$0xff]   ;;  %v2435_v32 = vld [vmem:[%s2721_s18 + $0xec] ss:$36 sps:$4 sm:$0xff]  }
  0x31   : > { %2087 = vmatprep.subr.bf16.mxu1 %v2353_v30  ;;  %v2417_v20 = vld [vmem:[%s2721_s18 + $0x1c] ss:$36 sps:$4 sm:$0xff]   ;;  %v2423_v25 = vld [vmem:[%s2721_s18 + $0x64] ss:$36 sps:$4 sm:$0xff]  }
  0x32   : > { %2048 = vmatpush3.bf16.msra.mxu0 %v2352_v29  ;;  %v2419_v22 = vld [vmem:[%s2721_s18 + $0x5c] ss:$36 sps:$4 sm:$0xff]   ;;  %v2427_v27 = vld [vmem:[%s2721_s18 + $0xa4] ss:$36 sps:$4 sm:$0xff]   ;;  %v2431_v29 = vld [vmem:[%s2721_s18 + $0xac] ss:$36 sps:$4 sm:$0xff]  }
  0x33   : > { %2113 = vmatprep.subr.bf16.mxu0 %v2358_v34  ;;  %v2421_v23 = vld [vmem:[%s2721_s18 + $0x58] ss:$36 sps:$4 sm:$0xff]   ;;  %v2426_v26 = vld [vmem:[%s3026_s1 + $0x220] sm:$0xff]   ;;  %v2433_v34 = vld [vmem:[%s2721_s18 + $0xa8] ss:$36 sps:$4 sm:$0xff]  }
  0x34   : > { %2088 = vmatpush3.bf16.msra.mxu1 %v2357_v33  ;;  %v2425_v28 = vld [vmem:[%s2721_s18 + $0x60] ss:$36 sps:$4 sm:$0xff]   ;;  %v2430_v30 = vld [vmem:[%s3026_s1 + $0x218] sm:$0xff]   ;;  %v2434_v33 = vld [vmem:[%s3026_s1 + $0x210] sm:$0xff]  }
  0x35   : > { %1149 = vmatmul.mubr.bf16.vlgmr.msra.gmra.mxu0 %v2354_v31  ;;  %2153 = vmatprep.subr.bf16.mxu1 %v2363_v38  ;;  %v2429_v31 = vld [vmem:[%s2721_s18 + $0xa0] ss:$36 sps:$4 sm:$0xff]   ;;  %v2437_v36 = vld [vmem:[%s2721_s18 + $0xe8] ss:$36 sps:$4 sm:$0xff]  }
  0x36   : > { %2114 = vmatpush3.bf16.msra.mxu0 %v2362_v37  ;;  %1156 = vmatprep.mubr.bf16.mxu0 %v2368_v43  ;;  %v2438_v37 = vld [vmem:[%s3026_s1 + $0x208] sm:$0xff]   ;;  %v2443_v38 = vld [vmem:[%s2721_s18 + $0x20] ss:$36 sps:$4 sm:$0xff]   ;;  %v2446_v43 = vld [vmem:[%s2721_s18 + $0xf8] ss:$36 sps:$4 sm:$0xff]  }
  0x37   : > { %1214 = vmatmul.mubr.bf16.vlgmr.msra.gmra.mxu1 %v2359_v35  ;;  %2115 = vmatprep.subr.bf16.mxu0 %v2365_v40  ;;  %v2439_v35 = vld [vmem:[%s2721_s18 + $0xf4] ss:$36 sps:$4 sm:$0xff]   ;;  %v2442_v40 = vld [vmem:[%s3026_s1 + $0x200] sm:$0xff]  }
  0x38   : > { %2154 = vmatpush3.bf16.msra.mxu1 %v2364_v39  ;;  %1221 = vmatprep.mubr.bf16.mxu1 %v2373_v47  ;;  %v2441_v39 = vld [vmem:[%s2721_s18 + $0xf0] ss:$36 sps:$4 sm:$0xff]   ;;  %v2450_v47 = vld [vmem:[%s3028_s3 + $0x20] sm:$0xff]  }
  0x39   : > { %2155 = vmatprep.subr.bf16.mxu1 %v2367_v42  ;;  %v2445_v42 = vld [vmem:[%s2721_s18 + $0xb0] ss:$36 sps:$4 sm:$0xff]  }
  0x3a   : > { %2116 = vmatpush3.bf16.msra.mxu0 %v2366_v41  ;;  %v2444_v41 = vld [vmem:[%s2721_s18 + $0x68] ss:$36 sps:$4 sm:$0xff]   ;;  %s1826_s18 = sshll.u32 %s272_s13, 5 }
  0x3b   : > { %2117 = vmatprep.subr.bf16.mxu0 %v2372_v46  ;;  %v2449_v46 = vld [vmem:[%s3028_s3 + $0x28] sm:$0xff]   ;;  %s274_s14 = scalar_lea.vmem [#allocation2], %s1826_s18 }
  0x3c   : > { %2156 = vmatpush3.bf16.msra.mxu1 %v2370_v44  ;;  %v2447_v44 = vld [vmem:[%s3028_s3 + $0x38] sm:$0xff]   ;;  %s1698_s15 = sshll.u32 %s274_s14, 4  ;;  %s2963_s15 = int_to_ptr.vmem [resolvable:$true] %s1698_s15 }
  0x3d   : > { %1157 = vmatmul.mubr.bf16.gmra.mxu0 %v2371_v45  ;;  %2157 = vmatprep.subr.bf16.mxu1 %v2377_v50  ;;  %v2448_v45 = vld [vmem:[%s3028_s3 + $0x30] sm:$0xff]   ;;  %v2453_v50 = vld [vmem:[%s3028_s3 + $0x8] sm:$0xff]   ;;  %s2455_s30 = scalar_lea.vmem %s2963_s15, 512  ;;  %p2462_p1 = scmp.lt.s32.totalorder %s2963_s15, %s2460_s8 }
  0x3e   : > { %2118 = vmatpush3.bf16.msra.mxu0 %v2375_v48  ;;  %1164 = vmatprep.mubr.bf16.mxu0 %v2382_v55  ;;  %v2451_v48 = vld [vmem:[%s3028_s3 + $0x18] sm:$0xff]   ;;  %p2456_p12 = scmp.ne.s32.totalorder %s2963_s15, %s2455_s30  ;;  %p2463_p2 = scmp.lt.s32.totalorder %s2461_s12, %s2455_s30 }
  0x3f   : > { %1222 = vmatmul.mubr.bf16.gmra.mxu1 %v2376_v49  ;;  %2119 = vmatprep.subr.bf16.mxu0 %v2379_v52  ;;  %v2452_v49 = vld [vmem:[%s3028_s3 + $0x10] sm:$0xff]  }
  0x40   : > { %2158 = vmatpush3.bf16.msra.mxu1 %v2378_v51  ;;  %1229 = vmatprep.mubr.bf16.mxu1 %v2387_v59  ;;  %v2454_v51 = vld [vmem:[%s3028_s3] sm:$0xff]   ;;  %p2457_p13 = pnand %p2456_p12, %p2611_p4  ;;  %p2464_p3 = por %p2463_p2, %p2462_p1 }
  0x41   : > { %2159 = vmatprep.subr.bf16.mxu1 %v2381_v54 }
  0x42   : > { %2120 = vmatpush3.bf16.msra.mxu0 %v2380_v53  ;;  %p2458_p0 = pneg %p2457_p13 }
  0x43   : > { %2121 = vmatprep.subr.bf16.mxu0 %v2386_v58 }
  0x44   : > { %2160 = vmatpush3.bf16.msra.mxu1 %v2384_v56  ;;  %p2465_p5 = pnand %p2464_p3, %p2458_p0 }
  0x45   : > { %1165 = vmatmul.mubr.bf16.gmra.mxu0 %v2385_v57  ;;  %2161 = vmatprep.subr.bf16.mxu1 %v2391_v62 }
  0x46   : > { %2122 = vmatpush3.bf16.msra.mxu0 %v2389_v60  ;;  %1172 = vmatprep.mubr.bf16.mxu0 %v2396_v3 }
  0x47   : > { %1230 = vmatmul.mubr.bf16.gmra.mxu1 %v2390_v61  ;;  %2123 = vmatprep.subr.bf16.mxu0 %v2393_v0 }
  0x48   : > { %2162 = vmatpush3.bf16.msra.mxu1 %v2392_v63  ;;  %1237 = vmatprep.mubr.bf16.mxu1 %v2401_v7 }
  0x49   : > { %2163 = vmatprep.subr.bf16.mxu1 %v2395_v2 }
  0x4a   : > { %2124 = vmatpush3.bf16.msra.mxu0 %v2394_v1 }
  0x4b   : > { %2125 = vmatprep.subr.bf16.mxu0 %v2400_v6 }
  0x4c   : > { %2164 = vmatpush3.bf16.msra.mxu1 %v2398_v4 }
  0x4d   : > { %1173 = vmatmul.mubr.bf16.gmra.mxu0 %v2399_v5  ;;  %2165 = vmatprep.subr.bf16.mxu1 %v2405_v10 }
  0x4e   : > { %2126 = vmatpush3.bf16.msra.mxu0 %v2403_v8  ;;  %1278 = vmatprep.mubr.bf16.mxu0 %v2412_v16 }
  0x4f   : > { %1238 = vmatmul.mubr.bf16.gmra.mxu1 %v2404_v9  ;;  %2127 = vmatprep.subr.bf16.mxu0 %v2407_v12 }
  0x50   : > { %2166 = vmatpush3.bf16.msra.mxu1 %v2406_v11  ;;  %1343 = vmatprep.mubr.bf16.mxu1 %v2417_v20 }
  0x51   : > { %2167 = vmatprep.subr.bf16.mxu1 %v2409_v14 }
  0x52   : > { %2128 = vmatpush3.bf16.msra.mxu0 %v2408_v13 }
  0x53   : > { %2217 = vmatprep.subr.bf16.mxu0 %v2414_v18 }
  0x54   : > { %2168 = vmatpush3.bf16.msra.mxu1 %v2413_v17 }
  0x55   : > { %1279 = vmatmul.mubr.bf16.vlgmr.msra.gmra.mxu0 %v2410_v15  ;;  %2241 = vmatprep.subr.bf16.mxu1 %v2447_v44 }
  0x56   : > { %2218 = vmatpush3.bf16.msra.mxu0 %v2414_v18  ;;  %1286 = vmatprep.mubr.bf16.mxu0 %v2419_v22 }
  0x57   : > { %1344 = vmatmul.mubr.bf16.vlgmr.msra.gmra.mxu1 %v2415_v19  ;;  %2219 = vmatprep.subr.bf16.mxu0 %v2418_v21 }
  0x58   : > { %1351 = vmatprep.mubr.bf16.mxu1 %v2423_v25  ;;  %2242 = vmatpush3.bf16.msra.mxu1 %v2447_v44 }
  0x59   : > { %2243 = vmatprep.subr.bf16.mxu1 %v2448_v45 }
  0x5a   : > { %2220 = vmatpush3.bf16.msra.mxu0 %v2418_v21 }
  0x5b   : > { %2221 = vmatprep.subr.bf16.mxu0 %v2422_v24 }
  0x5c   : > { %2244 = vmatpush3.bf16.msra.mxu1 %v2448_v45 }
  0x5d   : > { %1287 = vmatmul.mubr.bf16.gmra.mxu0 %v2421_v23  ;;  %2245 = vmatprep.subr.bf16.mxu1 %v2449_v46 }
  0x5e   : > { %1294 = vmatprep.mubr.bf16.mxu0 %v2427_v27  ;;  %2222 = vmatpush3.bf16.msra.mxu0 %v2422_v24 }
  0x5f   : > { %2223 = vmatprep.subr.bf16.mxu0 %v2426_v26  ;;  %1352 = vmatmul.mubr.bf16.gmra.mxu1 %v2425_v28 }
  0x60   : > { %1359 = vmatprep.mubr.bf16.mxu1 %v2431_v29  ;;  %2246 = vmatpush3.bf16.msra.mxu1 %v2449_v46 }
  0x61   : > { %2247 = vmatprep.subr.bf16.mxu1 %v2450_v47 }
  0x62   : > { %2224 = vmatpush3.bf16.msra.mxu0 %v2426_v26 }
  0x63   : > { %2225 = vmatprep.subr.bf16.mxu0 %v2430_v30 }
  0x64   : > { %2248 = vmatpush3.bf16.msra.mxu1 %v2450_v47 }
  0x65   : > { %1295 = vmatmul.mubr.bf16.gmra.mxu0 %v2429_v31  ;;  %2249 = vmatprep.subr.bf16.mxu1 %v2451_v48 }
  0x66   : > { %1302 = vmatprep.mubr.bf16.mxu0 %v2435_v32  ;;  %2226 = vmatpush3.bf16.msra.mxu0 %v2430_v30 }
  0x67   : > { %2227 = vmatprep.subr.bf16.mxu0 %v2434_v33  ;;  %1360 = vmatmul.mubr.bf16.gmra.mxu1 %v2433_v34 }
  0x68   : > { %1367 = vmatprep.mubr.bf16.mxu1 %v2439_v35  ;;  %2250 = vmatpush3.bf16.msra.mxu1 %v2451_v48 }
  0x69   : > { %2251 = vmatprep.subr.bf16.mxu1 %v2452_v49 }
  0x6a   : > { %2228 = vmatpush3.bf16.msra.mxu0 %v2434_v33 }
  0x6b   : > { %2229 = vmatprep.subr.bf16.mxu0 %v2438_v37 }
  0x6c   : > { %2252 = vmatpush3.bf16.msra.mxu1 %v2452_v49 }
  0x6d   : > { %1303 = vmatmul.mubr.bf16.gmra.mxu0 %v2437_v36  ;;  %2253 = vmatprep.subr.bf16.mxu1 %v2453_v50 }
  0x6e   : > { %2233 = vmatprep.mubr.bf16.mxu0 %v2443_v38  ;;  %2230 = vmatpush3.bf16.msra.mxu0 %v2438_v37 }
  0x6f   : > { %2231 = vmatprep.subr.bf16.mxu0 %v2442_v40  ;;  %1368 = vmatmul.mubr.bf16.gmra.mxu1 %v2441_v39 }
  0x70   : > { %2254 = vmatpush3.bf16.msra.mxu1 %v2453_v50 }
  0x71   : > { %2255 = vmatprep.subr.bf16.mxu1 %v2454_v51 }
  0x72   : > { %2232 = vmatpush3.bf16.msra.mxu0 %v2442_v40 }
  0x74   : > { %2256 = vmatpush3.bf16.msra.mxu1 %v2454_v51 }
  0x75   : > { %2234 = vmatmul.mubr.bf16.vlgmr.msra.gmra.mxu0 %v2444_v41 }
  0x76   : > { %2237 = vmatprep.mubr.bf16.mxu0 %v2445_v42 }
  0x7d   : > { %2238 = vmatmul.mubr.bf16.gmra.mxu0 %v2446_v43  ;;  %v1830_v43 = vld [vmem:[%s3027_s2] ss:$0 sm:$0xff] }
  0xf5   : > { %v2049_v52 = vpop.f32.mrf.mxu0 }
  0xf7   : > { %v2050_v53 = vpop.f32.mrf.mxu0  ;;  %v2089_v54 = vpop.f32.mrf.mxu1 }
  0xf8   : > { %v2051_v41 = vadd.f32 %v2050_v53, %v2049_v52 }
  0xf9   : > { %v2052_v55 = vpop.f32.mrf.mxu0  ;;  %v2090_v56 = vpop.f32.mrf.mxu1 }
  0xfa   : > { %v1151_v51 = vadd.f32 %v2051_v41, %v1830_v43 }
  0xfb   : > { %v2053_v57 = vpop.f32.mrf.mxu0  ;;  %v2092_v58 = vpop.f32.mrf.mxu1 }
  0xfc   : > { %v2054_v42 = vadd.f32 %v2053_v57, %v2052_v55 }
  0xfd   : > { %v2055_v59 = vpop.f32.mrf.mxu0  ;;  %v2093_v60 = vpop.f32.mrf.mxu1 }
  0xff   : > { %v2056_v61 = vpop.f32.mrf.mxu0  ;;  %v2095_v62 = vpop.f32.mrf.mxu1 }
 0x100   : > { %v2057_v38 = vadd.f32 %v2056_v61, %v2055_v59  ;;  %v2091_v59 = vadd.f32 %v2090_v56, %v2089_v54  ;;  %v1154_v61 = vadd.f32 %v2054_v42, %v1830_v43 }
 0x101   : > { %v2058_v63 = vpop.f32.mrf.mxu0  ;;  %v2096_v0 = vpop.f32.mrf.mxu1 }
 0x102   : > { %v1159_v47 = vadd.f32 %v2057_v38, %v1830_v43  ;;  %v2097_v48 = vadd.f32 %v2096_v0, %v2095_v62  ;;  %v1216_v0 = vadd.f32 %v2091_v59, %v1151_v51 }
 0x103   : > { %v2059_v1 = vpop.f32.mrf.mxu0  ;;  %v2098_v2 = vpop.f32.mrf.mxu1 }
 0x104   : > { %v2060_v44 = vadd.f32 %v2059_v1, %v2058_v63  ;;  %v1224_v1 = vadd.f32 %v2097_v48, %v1159_v47 }
 0x105   : > { %v2099_v3 = vpop.f32.mrf.mxu1  ;;  %v2061_v4 = vpop.f32.mrf.mxu0 }
 0x106   : > { %v2100_v52 = vadd.f32 %v2099_v3, %v2098_v2 }
 0x107   : > { %v2062_v5 = vpop.f32.mrf.mxu0  ;;  %v2912_v6 = vpop.f32.mrf.mxu1 }
 0x108   : > { %v2063_v53 = vadd.f32 %v2062_v5, %v2061_v4 }
 0x109   : > { %v2914_v7 = vpop.f32.mrf.mxu0  ;;  %v2916_v8 = vpop.f32.mrf.mxu1 }
 0x10a   : > { %v1167_v56 = vadd.f32 %v2063_v53, %v1830_v43  ;;  %v2103_v4 = vadd.f32 %v2916_v8, %v2912_v6 }
 0x10b   : > { %v2918_v9 = vpop.f32.mrf.mxu0  ;;  %v2920_v10 = vpop.f32.mrf.mxu1 }
 0x10c   : > { %3034 = vst [vmem:[#allocation5_spill] sm:$0xff] %v2920_v10  ;;  %v2066_v5 = vadd.f32 %v2918_v9, %v2914_v7 }
 0x10d   : > { %v2922_v11 = vpop.f32.mrf.mxu1  ;;  %v2067_v12 = vpop.f32.mrf.mxu0 }
 0x10e   : > { %3035 = vst [vmem:[#allocation6_spill] sm:$0xff] %v2922_v11  ;;  %v1170_v7 = vadd.f32 %v2066_v5, %v1830_v43 }
 0x10f   : > { %v2068_v13 = vpop.f32.mrf.mxu0  ;;  %v2924_v14 = vpop.f32.mrf.mxu1 }
 0x110   : > { %v2069_v63 = vadd.f32 %v2068_v13, %v2067_v12 }
 0x111   : > { %v2070_v15 = vpop.f32.mrf.mxu0  ;;  %v2926_v16 = vpop.f32.mrf.mxu1 }
 0x112   : > { %v1175_v12 = vadd.f32 %v2069_v63, %v1830_v43  ;;  %v2109_v13 = vadd.f32 %v2926_v16, %v2924_v14 }
 0x113   : > { %v2071_v17 = vpop.f32.mrf.mxu0  ;;  %v2928_v18 = vpop.f32.mrf.mxu1  ;;  %v3042_v9 = vld [vmem:[#allocation5_spill] sm:$0xff] }
 0x115   : > { %v2930_v19 = vpop.f32.mrf.mxu1  ;;  %v2129_v20 = vpop.f32.mrf.mxu0 }
 0x116   : > { %3036 = vst [vmem:[#allocation7_spill] sm:$0xff] %v2930_v19  ;;  %v2072_v19 = vadd.f32 %v2071_v17, %v2070_v15 }
 0x117   : > { %v2130_v21 = vpop.f32.mrf.mxu0  ;;  %v2169_v22 = vpop.f32.mrf.mxu1 }
 0x119   : > { %v2132_v23 = vpop.f32.mrf.mxu0  ;;  %v2170_v24 = vpop.f32.mrf.mxu1 }
 0x11b   : > { %v2133_v25 = vpop.f32.mrf.mxu0  ;;  %v2172_v26 = vpop.f32.mrf.mxu1 }
 0x11c   : > { %v2134_v41 = vadd.f32 %v2133_v25, %v2132_v23  ;;  %v1178_v23 = vadd.f32 %v2072_v19, %v1830_v43 }
 0x11d   : > { %v2135_v27 = vpop.f32.mrf.mxu0  ;;  %v2173_v28 = vpop.f32.mrf.mxu1  ;;  %v3041_v25 = vld [vmem:[#allocation7_spill] sm:$0xff] }
 0x11f   : > { %v2136_v29 = vpop.f32.mrf.mxu0  ;;  %v2175_v30 = vpop.f32.mrf.mxu1 }
 0x120   : > { %v2137_v55 = vadd.f32 %v2136_v29, %v2135_v27  ;;  %v2112_v27 = vadd.f32 %v3041_v25, %v2928_v18  ;;  %v1232_v18 = vadd.f32 %v2103_v4, %v1167_v56 }
 0x121   : > { %v2138_v31 = vpop.f32.mrf.mxu0  ;;  %v2176_v32 = vpop.f32.mrf.mxu1 }
 0x123   : > { %v2139_v33 = vpop.f32.mrf.mxu0  ;;  %v2178_v34 = vpop.f32.mrf.mxu1 }
 0x124   : > { %v2140_v10 = vadd.f32 %v2139_v33, %v2138_v31  ;;  %v3043_v33 = vld [vmem:[#allocation6_spill] sm:$0xff] }
 0x125   : > { %v2141_v35 = vpop.f32.mrf.mxu0  ;;  %v2179_v36 = vpop.f32.mrf.mxu1 }
 0x126   : > { %v2180_v17 = vadd.f32 %v2179_v36, %v2178_v34  ;;  %v1243_v36 = vadd.f32 %v2112_v27, %v1178_v23 }
 0x127   : > { %v2142_v37 = vpop.f32.mrf.mxu0  ;;  %v2932_v39 = vpop.f32.mrf.mxu1 }
 0x128   : > { %3037 = vst [vmem:[#allocation8_spill] sm:$0xff] %v2932_v39  ;;  %v2094_v39 = vadd.f32 %v2093_v60, %v2092_v58  ;;  %v1289_v58 = vadd.f32 %v2137_v55, %v1224_v1  ;;  %v2177_v60 = vadd.f32 %v2176_v32, %v2175_v30  ;;  %v2174_v30 = vadd.f32 %v2173_v28, %v2172_v26 }
 0x129   : > { %v2934_v40 = vpop.f32.mrf.mxu0  ;;  %v2939_v45 = vpop.f32.mrf.mxu1  ;;  %v2143_v14 = vadd.f32 %v2142_v37, %v2141_v35 }
 0x12a   : > { %3038 = vst [vmem:[#allocation9_spill] sm:$0xff] %v2934_v40  ;;  %3039 = vst [vmem:[#allocation10_spill] sm:$0xff] %v2939_v45  ;;  %v1162_v40 = vadd.f32 %v2060_v44, %v1830_v43  ;;  %v2131_v45 = vadd.f32 %v2130_v21, %v2129_v20  ;;  %v2171_v21 = vadd.f32 %v2170_v24, %v2169_v22 }
 0x12b   : > { %v2145_v46 = vpop.f32.mrf.mxu0  ;;  %v2941_v49 = vpop.f32.mrf.mxu1  ;;  %v1354_v32 = vadd.f32 %v2177_v60, %v1289_v58  ;;  %v1297_v47 = vadd.f32 %v2143_v14, %v1232_v18 }
 0x12c   : > { %3040 = vst [vmem:[#allocation11_spill] sm:$0xff] %v2941_v49  ;;  %v1219_v49 = vadd.f32 %v2094_v39, %v1154_v61  ;;  %v1227_v54 = vadd.f32 %v2100_v52, %v1162_v40  ;;  %v1281_v20 = vadd.f32 %v2131_v45, %v1216_v0  ;;  %v2106_v39 = vadd.f32 %v3043_v33, %v3042_v9 }
 0x12d   : > { %v2147_v50 = vpop.f32.mrf.mxu0  ;;  %v2943_v57 = vpop.f32.mrf.mxu1 }
 0x12e   : > { %v1292_v15 = vadd.f32 %v2140_v10, %v1227_v54  ;;  %v1284_v29 = vadd.f32 %v2134_v41, %v1219_v49  ;;  %v1240_v10 = vadd.f32 %v2109_v13, %v1175_v12  ;;  %v1346_v24 = vadd.f32 %v2171_v21, %v1281_v20 }
 0x12f   : > { %v2148_v11 = vpop.f32.mrf.mxu0  ;;  %v2187_v38 = vpop.f32.mrf.mxu1  ;;  %v1235_v37 = vadd.f32 %v2106_v39, %v1170_v7  ;;  %v3045_v48 = vld [vmem:[#allocation8_spill] sm:$0xff] }
 0x130   : > { %v2149_v8 = vadd.f32 %v2148_v11, %v2147_v50  ;;  %v1357_v34 = vadd.f32 %v2180_v17, %v1292_v15  ;;  %v1349_v42 = vadd.f32 %v2174_v30, %v1284_v29 }
 0x131   : > { %v2150_v62 = vpop.f32.mrf.mxu0  ;;  %v2188_v2 = vpop.f32.mrf.mxu1  ;;  %v3044_v26 = vld [vmem:[#allocation9_spill] sm:$0xff]  ;;  %v3046_v49 = vld [vmem:[#allocation10_spill] sm:$0xff] }
 0x132   : > { %v2146_v28 = vadd.f32 %v2145_v46, %v3044_v26  ;;  %v1305_v43 = vadd.f32 %v2149_v8, %v1240_v10  ;;  %v2189_v44 = vadd.f32 %v2188_v2, %v2187_v38  ;;  %v2183_v50 = vadd.f32 %v3046_v49, %v3045_v48 }
 0x133   : > { %v2151_v3 = vpop.f32.mrf.mxu0  ;;  %v2190_v31 = vpop.f32.mrf.mxu1  ;;  %v3047_v63 = vld [vmem:[#allocation11_spill] sm:$0xff] }
 0x134   : > { %v2152_v16 = vadd.f32 %v2151_v3, %v2150_v62  ;;  %v1300_v55 = vadd.f32 %v2146_v28, %v1235_v37  ;;  %v2186_v1 = vadd.f32 %v2943_v57, %v3047_v63  ;;  %v1370_v54 = vadd.f32 %v2189_v44, %v1305_v43 }
 0x135   : > { %v2235_v6 = vpop.f32.mrf.mxu0  ;;  %v2191_v40 = vpop.f32.mrf.mxu1  ;;  %v1362_v2 = vadd.f32 %v2183_v50, %v1297_v47 }
 0x136   : > { %v1419_v19 = vadd.f32 %v2235_v6, %v1354_v32  ;;  %v1308_v51 = vadd.f32 %v2152_v16, %v1243_v36  ;;  %v2192_v61 = vadd.f32 %v2191_v40, %v2190_v31  ;;  %v1365_v13 = vadd.f32 %v2186_v1, %v1300_v55 }
 0x137   : > { %v1410_v22 = vpop.f32.mrf.mxu0 }
 0x138   : > { %v1411_v45 = vadd.f32 %v1410_v22, %v1346_v24  ;;  %v1443_v52 = vmax.f32 %v1419_v19, 0.0  ;;  %v1373_v3 = vadd.f32 %v2192_v61, %v1308_v51 }
 0x139   : > { %v2236_v11 = vpop.f32.mrf.mxu0 }
 0x13a   : > { %v1422_v35 = vadd.f32 %v2236_v11, %v1357_v34  ;;  %v1441_v62 = vmax.f32 %v1411_v45, 0.0 }
 0x13b   : > { %v1413_v59 = vpop.f32.mrf.mxu0 }
 0x13c   : > { %v1444_v53 = vmax.f32 %v1422_v35, 0.0  ;;  %v1414_v46 = vadd.f32 %v1413_v59, %v1349_v42 }
 0x13d   : > { %v2239_v38 = vpop.f32.mrf.mxu0 }
 0x13e   : > { %v1450_v0 = vpack.c.bf16 %v1444_v53, %v1443_v52  ;;  %v1442_v41 = vmax.f32 %v1414_v46, 0.0  ;;  %v1435_v60 = vadd.f32 %v2239_v38, %v1370_v54 }
 0x13f   : > { %v1426_v56 = vpop.f32.mrf.mxu0 }
 0x140   : > { %2027 = vst [vmem:[%s274_s14 + $0x8] sm:$0xff] %v1450_v0   ;;  %v1449_v58 = vpack.c.bf16 %v1442_v41, %v1441_v62  ;;  %v1427_v5 = vadd.f32 %v1426_v56, %v1362_v2  ;;  %v1447_v20 = vmax.f32 %v1435_v60, 0.0 }
 0x141   : > { %v2240_v4 = vpop.f32.mrf.mxu0 }
 0x142   : > { %1991 = vst [vmem:[%s274_s14] sm:$0xff] %v1449_v58   ;;  %v1438_v12 = vadd.f32 %v2240_v4, %v1373_v3  ;;  %2257 = vmatprep.mubr.bf16.mxu1 %v1449_v58  ;;  %v1445_v17 = vmax.f32 %v1427_v5, 0.0 }
 0x143   : > { %v1429_v57 = vpop.f32.mrf.mxu0  ;;  %2258 = vmatmul.mubr.bf16.vlgmr.msra.gmra.mxu1 %v1450_v0 }
 0x144   : > { %v1448_v21 = vmax.f32 %v1438_v12, 0.0  ;;  %v1430_v15 = vadd.f32 %v1429_v57, %v1365_v13 }
 0x146   : > { %v1452_v23 = vpack.c.bf16 %v1448_v21, %v1447_v20  ;;  %v1446_v25 = vmax.f32 %v1430_v15, 0.0 }
 0x148   : > { %2029 = vst [vmem:[%s274_s14 + $0x18] sm:$0xff] %v1452_v23   ;;  %v1451_v27 = vpack.c.bf16 %v1446_v25, %v1445_v17 }
 0x14a   : > { %2028 = vst [vmem:[%s274_s14 + $0x10] sm:$0xff] %v1451_v27   ;;  %2261 = vmatprep.mubr.bf16.mxu1 %v1451_v27 }
 0x14b   : > { %2262 = vmatmul.mubr.bf16.gmra.mxu1 %v1452_v23 }
 0x14c   : > { %2468 = shalt.err (!%p2465_p5)
}
 0x14d   : > { %s2469_s24 = scalar_lea.hbm %s2969_s27, 512  ;;  %s2473_s14 = scalar_lea.hbm %s3030_s5, 1024 }
 0x14e   : > { %p2470_p6 = scmp.ne.s32.totalorder %s2969_s27, %s2469_s24  ;;  %p2474_p10 = scmp.lt.s32.totalorder %s2969_s27, %s3030_s5 }
 0x14f   : > { %p2475_p11 = scmp.lt.s32.totalorder %s2473_s14, %s2469_s24 }
 0x150   : > { %p2471_p7 = pnand %p2470_p6, %p2611_p4 }
 0x151   : > { %p2476_p12 = por %p2475_p11, %p2474_p10 }
 0x152   : > { %p2472_p9 = pneg %p2471_p7 }
 0x154   : > { %p2477_p13 = pnand %p2476_p12, %p2472_p9 }
 0x156   : > { %2480 = shalt.err (!%p2477_p13)
}
 0x157   : > { %s2534_s19 = smov 64   ;;  %s2535_s30 = smov 4   ;;  %v1947_v30 = vld [vmem:[%s3029_s4] ss:$0 sm:$0xff] }
 0x158   : > { %2266 = dma.vmem_to_hbm [thread:$0]  (%p2611_p4), %s2963_s15, 512, %s2969_s27, %s2973_s28, %s2534_s19, %s2534_s19, %s2535_s30  }
 0x159   : > { %s1969_s12 = sshll.u32 %s2691_s11, 5 }
 0x15a   : > { %s306_s7 = scalar_lea.vmem %s3031_s6, %s1969_s12 }
 0x203   : > { %v2259_v29 = vpop.f32.mrf.mxu1 }
 0x204   : > { %v1603_v6 = vadd.f32 %v2259_v29, %v1947_v30 }
 0x205   : > { %v1594_v31 = vpop.f32.mrf.mxu1 }
 0x206   : > { %v1595_v32 = vadd.f32 %v1947_v30, %v1594_v31  ;;  %v1627_v33 = vmax.f32 %v1603_v6, 0.0 }
 0x207   : > { %v2260_v8 = vpop.f32.mrf.mxu1 }
 0x208   : > { %v1606_v7 = vadd.f32 %v2260_v8, %v1947_v30  ;;  %v1625_v22 = vmax.f32 %v1595_v32, 0.0 }
 0x209   : > { %v1597_v9 = vpop.f32.mrf.mxu1 }
 0x20a   : > { %v1628_v39 = vmax.f32 %v1606_v7, 0.0  ;;  %v1598_v14 = vadd.f32 %v1947_v30, %v1597_v9 }
 0x20b   : > { %v2263_v16 = vpop.f32.mrf.mxu1 }
 0x20c   : > { %v2015_v10 = vpack.c.bf16 %v1628_v39, %v1627_v33  ;;  %v1626_v19 = vmax.f32 %v1598_v14, 0.0  ;;  %v1619_v18 = vadd.f32 %v2263_v16, %v1947_v30 }
 0x20d   : > { %v1610_v24 = vpop.f32.mrf.mxu1 }
 0x20e   : > { %2030 = vst [vmem:[%s306_s7 + $0x8] sm:$0xff] %v2015_v10   ;;  %v2010_v34 = vpack.c.bf16 %v1626_v19, %v1625_v22  ;;  %v1611_v26 = vadd.f32 %v1947_v30, %v1610_v24  ;;  %v1631_v11 = vmax.f32 %v1619_v18, 0.0 }
 0x20f   : > { %v2264_v36 = vpop.f32.mrf.mxu1 }
 0x210   : > { %2011 = vst [vmem:[%s306_s7] sm:$0xff] %v2010_v34   ;;  %v1622_v28 = vadd.f32 %v2264_v36, %v1947_v30  ;;  %v1629_v44 = vmax.f32 %v1611_v26, 0.0 }
 0x211   : > { %v1613_v40 = vpop.f32.mrf.mxu1 }
 0x212   : > { %v1632_v42 = vmax.f32 %v1622_v28, 0.0  ;;  %v1614_v43 = vadd.f32 %v1947_v30, %v1613_v40 }
 0x214   : > { %v2025_v45 = vpack.c.bf16 %v1632_v42, %v1631_v11  ;;  %v1630_v35 = vmax.f32 %v1614_v43, 0.0 }
 0x216   : > { %2032 = vst [vmem:[%s306_s7 + $0x18] sm:$0xff] %v2025_v45   ;;  %v2020_v37 = vpack.c.bf16 %v1630_v35, %v1629_v44 }
 0x218   : > { %2031 = vst [vmem:[%s306_s7 + $0x10] sm:$0xff] %v2020_v37  }
 0x219 PF: > { %p2272_p4 = scmp.ge.s32.totalorder %s2531_s26, 2  ;;  %s1717_s11 = sand.u32 1, %s2511_s21  }
 0x21a   : > { %s1718_s15 = scalar_lea.sflag [#allocation3], %s1717_s11 }
 0x21b   : > { %p2269_p0 = pnand %p2272_p4, %p2618_p8 }
 0x21d   : > { %p2270_p1 = pneg %p2269_p0 }
 0x21f   : > { %2506 = dma.done.wait (%p2270_p1), %s1718_s15, 512  }
 0x220   : > { %2508 = vsyncadd (%p2270_p1), %s1718_s15, 4294966784  ;;  %s20_s26 = sadd.s32 1, %s2531_s26   ;;  %s3048_s21 = smov %s2515_s22 }
 0x221   : > { %p17_p2 = scmp.ge.s32.totalorder %s20_s26, 4   ;;  %s3049_s22 = smov %s2519_s23 }
 0x222   : > { %s3050_s23 = smov %s2624_s10  ;;  %s3051_s24 = smov %s2527_s25 }
 0x223   : > { %s3052_s25 = smov %s3054_s29  ;;  %19 = sbr.rel (!%p17_p2) target bundleno = 4 (0x4), region = 87 }
 0x228   :  { %1735 = vsyncpa [#allocation3], 1 }
 0x229   :  { %1737 = vsyncpa [#allocation3 + $0x1], 1 }

// kernel: _lambda_.7
= control target key start
LH: loop header
LB: loop body
LE: loop exit
PB: predicated region body
PF: predicated region fallthrough
CT: control target
= control target key end

     0   :  { %s2905_s21 = smov 0   ;;  %s2907_s22 = smov 0   ;;  %s3648_s0 = inlined_call_operand.vmem [shape: bf16[2,1536,128], index: 0, kind: input, shape index: {}]   ;;  %s3649_s1 = inlined_call_operand.vmem [shape: bf16[8,128], index: 1, kind: input, shape index: {}]   ;;  %s3650_s2 = inlined_call_operand.vmem [shape: bf16[128,128], index: 2, kind: input, shape index: {}]   ;;  %s3651_s3 = inlined_call_operand.vmem [shape: f32[1,128], index: 3, kind: input, shape index: {}, may-alias: {3,5,7,9,11}]   ;;  %s3652_s4 = inlined_call_operand.vmem [shape: bf16[128,128], index: 4, kind: input, shape index: {}]   ;;  %s3653_s5 = inlined_call_operand.vmem [shape: f32[1,128], index: 5, kind: input, shape index: {}, may-alias: {3,5,7,9,11}]   ;;  %s3654_s6 = inlined_call_operand.vmem [shape: bf16[128,128], index: 6, kind: input, shape index: {}]   ;;  %s3655_s7 = inlined_call_operand.vmem [shape: f32[1,128], index: 7, kind: input, shape index: {}, may-alias: {3,5,7,9,11}]   ;;  %s3656_s8 = inlined_call_operand.vmem [shape: bf16[128,128], index: 8, kind: input, shape index: {}]   ;;  %s3657_s9 = inlined_call_operand.vmem [shape: f32[1,128], index: 9, kind: input, shape index: {}, may-alias: {3,5,7,9,11}]   ;;  %s3658_s10 = inlined_call_operand.vmem [shape: bf16[128,128], index: 10, kind: input, shape index: {}]   ;;  %s3659_s11 = inlined_call_operand.vmem [shape: f32[1,128], index: 11, kind: input, shape index: {}, may-alias: {3,5,7,9,11}]   ;;  %s3660_s12 = inlined_call_operand.vmem [shape: f32[2,8,128], index: 12, kind: output, shape index: {}]  }
   0x1   :  { %s2909_s23 = smov 0   ;;  %s2911_s24 = smov 0  }
   0x2   :  { %s2913_s25 = smov 0  }
   0x3 LB: > { %s31_s26 = sadd.s32 1, %s2823_s23  ;;  %s34_s27 = sadd.s32 1, %s2827_s24  ;;  %s2831_s25 = sphi %s2913_s25, %s22_s25   ;;  %s2827_s24 = sphi %s2911_s24, %s3752_s24   ;;  %s2823_s23 = sphi %s2909_s23, %s3751_s23   ;;  %s2819_s22 = sphi %s2907_s22, %s3750_s22   ;;  %s2815_s21 = sphi %s2905_s21, %s3749_s21  }
   0x4   : > { %p32_p0 = scmp.ge.s32.totalorder %s31_s26, 3  ;;  %p2160_p1 = scmp.ge.s32.totalorder %s2831_s25, 1 }
   0x5   : > { %p381_p2 = scmp.lt.s32.totalorder %s2831_s25, 7 }
   0x6   : > { %s3754_s26 = smov (%p32_p0, %s31_s26), 0  ;;  %s3756_s27 = smov (!%p32_p0, %s34_s27), %s2827_s24 }
   0x7   : > { %p382_p3 = pnand %p2160_p1, %p381_p2  ;;  %p36_p4 = scmp.ge.s32.totalorder %s3756_s27, 2 }
   0x9   : > { %s3758_s27 = smov (%p36_p4, %s3756_s27), 0  ;;  %385 = sbr.rel (%p382_p3) target bundleno = 1935 (0x78f), region = 68 }
   0xe   : > { %s2161_s28 = sshll.u32 %s2815_s21, 6  ;;  %p427_p5 = scmp.lt.s32.totalorder %s2819_s22, 1 }
   0xf   : > { %p429_p6 = scmp.lt.s32.totalorder %s2161_s28, 191  ;;  %p2164_p7 = scmp.ne.s32.totalorder %s2815_s21, 0 }
  0x10   : > { %s3760_s22 = smov (!%p427_p5, %s2819_s22), 1 }
  0x11   : > { %s3762_s28 = smov (!%p429_p6, %s2161_s28), 191  ;;  %s2654_s29 = smul.u32 192, %s3760_s22 }
  0x12   : > { %s2163_s30 = sshll.u32 %s3760_s22, 3  ;;  %444 = sbr.rel (%p2164_p7) target bundleno = 256 (0x100), region = 72 }
  0x13   : > { %s2941_s15 = scalar_lea.vmem %s3660_s12, %s2163_s30  ;;  %s432_s16 = sadd.s32 %s2654_s29, %s3762_s28 }
  0x14   : > { %s2162_s17 = sshll.u32 %s432_s16, 2 }
  0x15   : > { %s2946_s20 = scalar_lea.vmem %s3648_s0, %s2162_s17 }
  0x17   : > { %vm560_vm0 = vcmask 7168   ;;  %v2833_v0 = vmov 0.0   ;;  %v2834_v1 = vmov -1e+30   ;;  %v2702_v2 = vld [vmem:[%s3650_s2 + $0x38] sm:$0xff]   ;;  %vm2835_vm1 = vmmov 0  }
  0x18   : > { %2434 = vmatprep.subr.bf16.mxu0 %v2833_v0  ;;  %561 = vst.msk [vmem:[#allocation3] sm:$0xff] %vm560_vm0, %v2834_v1  ;;  %562 = vst.msk [vmem:[#allocation4] sm:$0xff] %vm560_vm0, %v2833_v0  ;;  %2450 = vmatprep.mubr.msk.bf16.mxu0 %vm2835_vm1, %v2833_v0  ;;  %v2703_v3 = vld [vmem:[%s3650_s2 + $0x30] sm:$0xff]   ;;  %v2704_v4 = vld [vmem:[%s3650_s2 + $0x28] sm:$0xff]  }
  0x19   : > { %563 = vst [vmem:[#allocation5] sm:$0xff] %v2833_v0  ;;  %2435 = vmatpush3.bf16.msra.mxu0 %v2702_v2  ;;  %v2705_v5 = vld [vmem:[%s3650_s2 + $0x20] sm:$0xff]   ;;  %v2706_v6 = vld [vmem:[%s3650_s2 + $0x18] sm:$0xff]   ;;  %v2707_v7 = vld [vmem:[%s3650_s2 + $0x10] sm:$0xff]  }
  0x1a   : > { %2436 = vmatprep.subr.bf16.mxu0 %v2833_v0  ;;  %v2708_v8 = vld [vmem:[%s3650_s2 + $0x8] sm:$0xff]   ;;  %v2709_v9 = vld [vmem:[%s3650_s2] sm:$0xff]  }
  0x1b   : > { %v445_v10 = vld [vmem:[%s3649_s1] sm:$0xf] }
  0x1c   : > { %v2165_v11 = vld [vmem:[%s3651_s3] ss:$0 sm:$0xff] }
  0x1d   : > { %2437 = vmatpush3.bf16.msra.mxu0 %v2703_v3 }
  0x1e   : > { %2438 = vmatprep.subr.bf16.mxu0 %v2833_v0 }
  0x21   : > { %2439 = vmatpush3.bf16.msra.mxu0 %v2704_v4 }
  0x22   : > { %2440 = vmatprep.subr.bf16.mxu0 %v2833_v0 }
  0x25   : > { %2441 = vmatpush3.bf16.msra.mxu0 %v2705_v5 }
  0x26   : > { %2442 = vmatprep.subr.bf16.mxu0 %v2833_v0 }
  0x29   : > { %2443 = vmatpush3.bf16.msra.mxu0 %v2706_v6 }
  0x2a   : > { %2444 = vmatprep.subr.bf16.mxu0 %v2833_v0 }
  0x2d   : > { %2445 = vmatpush3.bf16.msra.mxu0 %v2707_v7 }
  0x2e   : > { %2446 = vmatprep.subr.bf16.mxu0 %v2833_v0 }
  0x31   : > { %2447 = vmatpush3.bf16.msra.mxu0 %v2708_v8 }
  0x32   : > { %2448 = vmatprep.subr.bf16.mxu0 %v2833_v0 }
  0x35   : > { %2449 = vmatpush3.bf16.msra.mxu0 %v2709_v9 }
  0x38   : > { %2451 = vmatmul.mubr.bf16.vlgmr.msra.gmra.mxu0 %v445_v10 }
  0xf8   : > { %v551_v12 = vpop.f32.mrf.mxu0 }
  0xf9   : > { %v552_v13 = vadd.f32 %v2165_v11, %v551_v12 }
  0xfa   : > { %v2452_v14 = vpop.f32.mrf.mxu0 }
  0xfb   : > { %v557_v15 = vmul.f32 0.088388346, %v552_v13 }
  0xfc   : > { %v554_v16 = vpop.f32.mrf.mxu0 }
  0xfd   : > { %v558_v17 = vpack.c.bf16 %v557_v15, %v557_v15 }
  0xfe   : > { %v2453_v18 = vpop.f32.mrf.mxu0 }
  0xff   : > { %559 = vst [vmem:[#allocation2] sm:$0xf] %v558_v17 }
 0x100 PF: > { %v2712_v19 = vld [vmem:[%s3652_s4 + $0x38] sm:$0xff]   ;;  %v2713_v20 = vld [vmem:[%s3652_s4 + $0x30] sm:$0xff]   ;;  %v2714_v21 = vld [vmem:[%s3652_s4 + $0x28] sm:$0xff]   ;;  %s2224_s14 = sshll.u32 %s2815_s21, 9  ;;  %vm1741_vm6 = vcmask 7168   ;;  %p2225_p8 = scmp.ne.s32.totalorder %s2815_s21, 2 }
 0x101   : > { %2454 = vmatprep.subr.bf16.mxu0 %v2712_v19  ;;  %v2715_v22 = vld [vmem:[%s3652_s4 + $0x20] sm:$0xff]   ;;  %v2716_v24 = vld [vmem:[%s3652_s4 + $0x18] sm:$0xff]   ;;  %v2717_v25 = vld [vmem:[%s3652_s4 + $0x10] sm:$0xff]  }
 0x102   : > { %2455 = vmatpush3.bf16.msra.mxu0 %v2712_v19  ;;  %v2720_v23 = vld [vmem:[%s2946_s20] sm:$0xff]   ;;  %v2718_v26 = vld [vmem:[%s3652_s4 + $0x8] sm:$0xff]   ;;  %v2722_v29 = vld [vmem:[%s2946_s20 + $0x10] sm:$0xff]  }
 0x103   : > { %2456 = vmatprep.subr.bf16.mxu0 %v2713_v20  ;;  %2470 = vmatprep.mubr.bf16.mxu0 %v2720_v23  ;;  %v2719_v27 = vld [vmem:[%s3652_s4] sm:$0xff]   ;;  %v2721_v28 = vld [vmem:[%s2946_s20 + $0x8] sm:$0xff]   ;;  %v2723_v30 = vld [vmem:[%s2946_s20 + $0x18] sm:$0xff]  }
 0x104   : > { %2550 = vmatprep.mubr.bf16.mxu1 %v2720_v23  ;;  %v2724_v31 = vld [vmem:[%s2946_s20 + $0x20] sm:$0xff]   ;;  %v2752_v32 = vld [vmem:[%s3654_s6 + $0x38] sm:$0xff]   ;;  %v2753_v33 = vld [vmem:[%s3654_s6 + $0x30] sm:$0xff]  }
 0x105   : > { %2534 = vmatprep.subr.bf16.mxu1 %v2752_v32  ;;  %v2725_v34 = vld [vmem:[%s2946_s20 + $0x28] sm:$0xff]   ;;  %v2726_v35 = vld [vmem:[%s2946_s20 + $0x30] sm:$0xff]   ;;  %v2755_v37 = vld [vmem:[%s3654_s6 + $0x20] sm:$0xff]  }
 0x106   : > { %2457 = vmatpush3.bf16.msra.mxu0 %v2713_v20  ;;  %2535 = vmatpush3.bf16.msra.mxu1 %v2752_v32  ;;  %v2754_v36 = vld [vmem:[%s3654_s6 + $0x28] sm:$0xff]   ;;  %v2727_v38 = vld [vmem:[%s2946_s20 + $0x38] sm:$0xff]   ;;  %v2728_v39 = vld [vmem:[%s2946_s20 + $0x40] sm:$0xff]  }
 0x107   : > { %2458 = vmatprep.subr.bf16.mxu0 %v2714_v21  ;;  %2536 = vmatprep.subr.bf16.mxu1 %v2753_v33  ;;  %v2756_v40 = vld [vmem:[%s3654_s6 + $0x18] sm:$0xff]   ;;  %v2757_v41 = vld [vmem:[%s3654_s6 + $0x10] sm:$0xff]   ;;  %v2729_v42 = vld [vmem:[%s2946_s20 + $0x48] sm:$0xff]  }
 0x108   : > { %v2730_v43 = vld [vmem:[%s2946_s20 + $0x50] sm:$0xff]   ;;  %v2758_v44 = vld [vmem:[%s3654_s6 + $0x8] sm:$0xff]   ;;  %v2759_v45 = vld [vmem:[%s3654_s6] sm:$0xff]  }
 0x109   : > { %v2731_v46 = vld [vmem:[%s2946_s20 + $0x58] sm:$0xff]   ;;  %v2732_v47 = vld [vmem:[%s2946_s20 + $0x60] sm:$0xff]   ;;  %v2733_v48 = vld [vmem:[%s2946_s20 + $0x68] sm:$0xff]  }
 0x10a   : > { %2459 = vmatpush3.bf16.msra.mxu0 %v2714_v21  ;;  %2537 = vmatpush3.bf16.msra.mxu1 %v2753_v33  ;;  %v2734_v49 = vld [vmem:[%s2946_s20 + $0x70] sm:$0xff]   ;;  %v2735_v50 = vld [vmem:[%s2946_s20 + $0x78] sm:$0xff]   ;;  %v2736_v51 = vld [vmem:[%s2946_s20 + $0x80] sm:$0xff]  }
 0x10b   : > { %2460 = vmatprep.subr.bf16.mxu0 %v2715_v22  ;;  %2538 = vmatprep.subr.bf16.mxu1 %v2754_v36  ;;  %v2737_v52 = vld [vmem:[%s2946_s20 + $0x88] sm:$0xff]   ;;  %v2738_v53 = vld [vmem:[%s2946_s20 + $0x90] sm:$0xff]   ;;  %v2739_v54 = vld [vmem:[%s2946_s20 + $0x98] sm:$0xff]  }
 0x10c   : > { %v2740_v55 = vld [vmem:[%s2946_s20 + $0xa0] sm:$0xff]   ;;  %v2741_v56 = vld [vmem:[%s2946_s20 + $0xa8] sm:$0xff]   ;;  %v2742_v57 = vld [vmem:[%s2946_s20 + $0xb0] sm:$0xff]  }
 0x10d   : > { %v2743_v58 = vld [vmem:[%s2946_s20 + $0xb8] sm:$0xff]   ;;  %v2744_v59 = vld [vmem:[%s2946_s20 + $0xc0] sm:$0xff]   ;;  %v2745_v60 = vld [vmem:[%s2946_s20 + $0xc8] sm:$0xff]  }
 0x10e   : > { %2461 = vmatpush3.bf16.msra.mxu0 %v2715_v22  ;;  %2539 = vmatpush3.bf16.msra.mxu1 %v2754_v36  ;;  %v2746_v61 = vld [vmem:[%s2946_s20 + $0xd0] sm:$0xff]   ;;  %v2747_v62 = vld [vmem:[%s2946_s20 + $0xd8] sm:$0xff]   ;;  %v2748_v63 = vld [vmem:[%s2946_s20 + $0xe0] sm:$0xff]  }
 0x10f   : > { %2462 = vmatprep.subr.bf16.mxu0 %v2716_v24  ;;  %2540 = vmatprep.subr.bf16.mxu1 %v2755_v37  ;;  %v2749_v0 = vld [vmem:[%s2946_s20 + $0xe8] sm:$0xff]   ;;  %v2750_v1 = vld [vmem:[%s2946_s20 + $0xf0] sm:$0xff]   ;;  %v2751_v2 = vld [vmem:[%s2946_s20 + $0xf8] sm:$0xff]  }
 0x110   : > { %v3062_v4 = vld [vmem:[%s3653_s5] ss:$0 sm:$0xff] }
 0x112   : > { %2463 = vmatpush3.bf16.msra.mxu0 %v2716_v24  ;;  %2541 = vmatpush3.bf16.msra.mxu1 %v2755_v37 }
 0x113   : > { %2464 = vmatprep.subr.bf16.mxu0 %v2717_v25  ;;  %2542 = vmatprep.subr.bf16.mxu1 %v2756_v40 }
 0x116   : > { %2465 = vmatpush3.bf16.msra.mxu0 %v2717_v25  ;;  %2543 = vmatpush3.bf16.msra.mxu1 %v2756_v40 }
 0x117   : > { %2466 = vmatprep.subr.bf16.mxu0 %v2718_v26  ;;  %2544 = vmatprep.subr.bf16.mxu1 %v2757_v41 }
 0x11a   : > { %2467 = vmatpush3.bf16.msra.mxu0 %v2718_v26  ;;  %2545 = vmatpush3.bf16.msra.mxu1 %v2757_v41 }
 0x11b   : > { %2468 = vmatprep.subr.bf16.mxu0 %v2719_v27  ;;  %2546 = vmatprep.subr.bf16.mxu1 %v2758_v44 }
 0x11e   : > { %2469 = vmatpush3.bf16.msra.mxu0 %v2719_v27  ;;  %2547 = vmatpush3.bf16.msra.mxu1 %v2758_v44 }
 0x11f   : > { %2548 = vmatprep.subr.bf16.mxu1 %v2759_v45 }
 0x121   : > { %2471 = vmatmul.mubr.bf16.vlgmr.msra.gmra.mxu0 %v2721_v28 }
 0x122   : > { %2474 = vmatprep.mubr.bf16.mxu0 %v2722_v29  ;;  %2549 = vmatpush3.bf16.msra.mxu1 %v2759_v45 }
 0x125   : > { %2551 = vmatmul.mubr.bf16.vlgmr.msra.gmra.mxu1 %v2721_v28 }
 0x126   : > { %2554 = vmatprep.mubr.bf16.mxu1 %v2722_v29 }
 0x129   : > { %2475 = vmatmul.mubr.bf16.gmra.mxu0 %v2723_v30 }
 0x12a   : > { %2478 = vmatprep.mubr.bf16.mxu0 %v2724_v31 }
 0x12d   : > { %2555 = vmatmul.mubr.bf16.gmra.mxu1 %v2723_v30 }
 0x12e   : > { %2558 = vmatprep.mubr.bf16.mxu1 %v2724_v31 }
 0x131   : > { %2479 = vmatmul.mubr.bf16.gmra.mxu0 %v2725_v34 }
 0x132   : > { %2482 = vmatprep.mubr.bf16.mxu0 %v2726_v35 }
 0x135   : > { %2559 = vmatmul.mubr.bf16.gmra.mxu1 %v2725_v34 }
 0x136   : > { %2562 = vmatprep.mubr.bf16.mxu1 %v2726_v35 }
 0x139   : > { %2483 = vmatmul.mubr.bf16.gmra.mxu0 %v2727_v38 }
 0x13a   : > { %2486 = vmatprep.mubr.bf16.mxu0 %v2728_v39 }
 0x13d   : > { %2563 = vmatmul.mubr.bf16.gmra.mxu1 %v2727_v38 }
 0x13e   : > { %2566 = vmatprep.mubr.bf16.mxu1 %v2728_v39 }
 0x141   : > { %2487 = vmatmul.mubr.bf16.gmra.mxu0 %v2729_v42 }
 0x142   : > { %2490 = vmatprep.mubr.bf16.mxu0 %v2730_v43 }
 0x145   : > { %2567 = vmatmul.mubr.bf16.gmra.mxu1 %v2729_v42 }
 0x146   : > { %2570 = vmatprep.mubr.bf16.mxu1 %v2730_v43 }
 0x149   : > { %2491 = vmatmul.mubr.bf16.gmra.mxu0 %v2731_v46 }
 0x14a   : > { %2494 = vmatprep.mubr.bf16.mxu0 %v2732_v47 }
 0x14d   : > { %2571 = vmatmul.mubr.bf16.gmra.mxu1 %v2731_v46 }
 0x14e   : > { %2574 = vmatprep.mubr.bf16.mxu1 %v2732_v47 }
 0x151   : > { %2495 = vmatmul.mubr.bf16.gmra.mxu0 %v2733_v48 }
 0x152   : > { %2498 = vmatprep.mubr.bf16.mxu0 %v2734_v49 }
 0x155   : > { %2575 = vmatmul.mubr.bf16.gmra.mxu1 %v2733_v48 }
 0x156   : > { %2578 = vmatprep.mubr.bf16.mxu1 %v2734_v49 }
 0x159   : > { %2499 = vmatmul.mubr.bf16.gmra.mxu0 %v2735_v50 }
 0x15a   : > { %2502 = vmatprep.mubr.bf16.mxu0 %v2736_v51 }
 0x15d   : > { %2579 = vmatmul.mubr.bf16.gmra.mxu1 %v2735_v50 }
 0x15e   : > { %2582 = vmatprep.mubr.bf16.mxu1 %v2736_v51 }
 0x161   : > { %2503 = vmatmul.mubr.bf16.gmra.mxu0 %v2737_v52 }
 0x162   : > { %2506 = vmatprep.mubr.bf16.mxu0 %v2738_v53 }
 0x165   : > { %2583 = vmatmul.mubr.bf16.gmra.mxu1 %v2737_v52 }
 0x166   : > { %2586 = vmatprep.mubr.bf16.mxu1 %v2738_v53 }
 0x169   : > { %2507 = vmatmul.mubr.bf16.gmra.mxu0 %v2739_v54 }
 0x16a   : > { %2510 = vmatprep.mubr.bf16.mxu0 %v2740_v55 }
 0x16d   : > { %2587 = vmatmul.mubr.bf16.gmra.mxu1 %v2739_v54 }
 0x16e   : > { %2590 = vmatprep.mubr.bf16.mxu1 %v2740_v55 }
 0x171   : > { %2511 = vmatmul.mubr.bf16.gmra.mxu0 %v2741_v56 }
 0x172   : > { %2514 = vmatprep.mubr.bf16.mxu0 %v2742_v57 }
 0x175   : > { %2591 = vmatmul.mubr.bf16.gmra.mxu1 %v2741_v56 }
 0x176   : > { %2594 = vmatprep.mubr.bf16.mxu1 %v2742_v57 }
 0x179   : > { %2515 = vmatmul.mubr.bf16.gmra.mxu0 %v2743_v58 }
 0x17a   : > { %2518 = vmatprep.mubr.bf16.mxu0 %v2744_v59 }
 0x17d   : > { %2595 = vmatmul.mubr.bf16.gmra.mxu1 %v2743_v58 }
 0x17e   : > { %2598 = vmatprep.mubr.bf16.mxu1 %v2744_v59 }
 0x181   : > { %2519 = vmatmul.mubr.bf16.gmra.mxu0 %v2745_v60 }
 0x182   : > { %2522 = vmatprep.mubr.bf16.mxu0 %v2746_v61 }
 0x185   : > { %2599 = vmatmul.mubr.bf16.gmra.mxu1 %v2745_v60  ;;  %v3136_v60 = vld [vmem:[#allocation2] sm:$0xf] }
 0x186   : > { %2602 = vmatprep.mubr.bf16.mxu1 %v2746_v61 }
 0x189   : > { %2523 = vmatmul.mubr.bf16.gmra.mxu0 %v2747_v62 }
 0x18a   : > { %2526 = vmatprep.mubr.bf16.mxu0 %v2748_v63 }
 0x18d   : > { %2603 = vmatmul.mubr.bf16.gmra.mxu1 %v2747_v62 }
 0x18e   : > { %2606 = vmatprep.mubr.bf16.mxu1 %v2748_v63 }
 0x191   : > { %2527 = vmatmul.mubr.bf16.gmra.mxu0 %v2749_v0 }
 0x192   : > { %2530 = vmatprep.mubr.bf16.mxu0 %v2750_v1 }
 0x195   : > { %2607 = vmatmul.mubr.bf16.gmra.mxu1 %v2749_v0 }
 0x196   : > { %2610 = vmatprep.mubr.bf16.mxu1 %v2750_v1 }
 0x199   : > { %2531 = vmatmul.mubr.bf16.gmra.mxu0 %v2751_v2 }
 0x19a   : > { %2352 = vmatprep.mubr.bf16.mxu0 %v3136_v60 }
 0x19d   : > { %2611 = vmatmul.mubr.bf16.gmra.mxu1 %v2751_v2 }
 0x19e   : > { %2370 = vmatprep.mubr.bf16.mxu1 %v3136_v60 }
 0x1e1   : > { %v2472_v3 = vpop.f32.mrf.mxu0 }
 0x1e2   : > { %v3065_v7 = vadd.f32 %v2472_v3, %v3062_v4 }
 0x1e3   : > { %v925_v5 = vpop.f32.mrf.mxu0 }
 0x1e4   : > { %v3071_v10 = vadd.f32 %v3062_v4, %v925_v5 }
 0x1e5   : > { %v2473_v6 = vpop.f32.mrf.mxu0  ;;  %v2552_v42 = vpop.f32.mrf.mxu1 }
 0x1e6   : > { %v3068_v8 = vadd.f32 %v2473_v6, %v3062_v4 }
 0x1e7   : > { %v928_v9 = vpop.f32.mrf.mxu0  ;;  %v1317_v45 = vpop.f32.mrf.mxu1 }
 0x1e8   : > { %v3076_v12 = vadd.f32 %v3062_v4, %v928_v9 }
 0x1e9   : > { %v2476_v13 = vpop.f32.mrf.mxu0  ;;  %v2553_v47 = vpop.f32.mrf.mxu1 }
 0x1ea   : > { %v3081_v17 = vadd.f32 %v2476_v13, %v3062_v4 }
 0x1eb   : > { %v941_v15 = vpop.f32.mrf.mxu0  ;;  %v1320_v49 = vpop.f32.mrf.mxu1 }
 0x1ec   : > { %v3087_v20 = vadd.f32 %v3062_v4, %v941_v15 }
 0x1ed   : > { %v2477_v16 = vpop.f32.mrf.mxu0  ;;  %v2556_v51 = vpop.f32.mrf.mxu1 }
 0x1ee   : > { %v3084_v18 = vadd.f32 %v2477_v16, %v3062_v4 }
 0x1ef   : > { %v944_v19 = vpop.f32.mrf.mxu0  ;;  %v1333_v53 = vpop.f32.mrf.mxu1 }
 0x1f0   : > { %v3092_v22 = vadd.f32 %v3062_v4, %v944_v19 }
 0x1f1   : > { %v3094_v23 = vpop.f32.mrf.mxu0  ;;  %v2557_v55 = vpop.f32.mrf.mxu1 }
 0x1f3   : > { %v3098_v25 = vpop.f32.mrf.mxu0  ;;  %v1336_v57 = vpop.f32.mrf.mxu1 }
 0x1f5   : > { %v3100_v26 = vpop.f32.mrf.mxu0  ;;  %v3134_v59 = vpop.f32.mrf.mxu1 }
 0x1f7   : > { %v3102_v27 = vpop.f32.mrf.mxu0  ;;  %v3140_v62 = vpop.f32.mrf.mxu1 }
 0x1f9   : > { %v2484_v28 = vpop.f32.mrf.mxu0  ;;  %v3143_v1 = vpop.f32.mrf.mxu1 }
 0x1fa   : > { %v982_v5 = vadd.f32 %v2484_v28, %v3062_v4 }
 0x1fb   : > { %v3104_v29 = vpop.f32.mrf.mxu0  ;;  %v3148_v9 = vpop.f32.mrf.mxu1 }
 0x1fd   : > { %v2485_v30 = vpop.f32.mrf.mxu0 }
 0x1fe   : > { %v985_v63 = vadd.f32 %v2485_v30, %v3062_v4  ;;  %v3152_v30 = vpop.f32.mrf.mxu1 }
 0x1ff   : > { %v976_v31 = vpop.f32.mrf.mxu0 }
 0x200   : > { %v1187_v19 = vpack.c.bf16 %v985_v63, %v982_v5 }
 0x201   : > { %v2488_v32 = vpop.f32.mrf.mxu0 }
 0x202   : > { %v3107_v35 = vadd.f32 %v2488_v32, %v3062_v4 }
 0x203   : > { %v989_v33 = vpop.f32.mrf.mxu0 }
 0x204   : > { %v3113_v38 = vadd.f32 %v3062_v4, %v989_v33 }
 0x205   : > { %v2489_v34 = vpop.f32.mrf.mxu0 }
 0x206   : > { %v3110_v36 = vadd.f32 %v2489_v34, %v3062_v4  ;;  %v3157_v34 = vld [vmem:[%s3655_s7] ss:$0 sm:$0xff] }
 0x207   : > { %v992_v37 = vpop.f32.mrf.mxu0  ;;  %v3169_v63 = vadd.f32 %v3157_v34, %v1320_v49 }
 0x208   : > { %v3118_v40 = vadd.f32 %v3062_v4, %v992_v37  ;;  %v3160_v37 = vadd.f32 %v2552_v42, %v3157_v34  ;;  %v3180_v42 = vadd.f32 %v2557_v55, %v3157_v34 }
 0x209   : > { %v3120_v41 = vpop.f32.mrf.mxu0  ;;  %3684 = vst [vmem:[#allocation7_spill] sm:$0xff] %v3169_v63 }
 0x20b   : > { %v3124_v44 = vpop.f32.mrf.mxu0 }
 0x20d   : > { %v3126_v46 = vpop.f32.mrf.mxu0 }
 0x20f   : > { %v3128_v48 = vpop.f32.mrf.mxu0 }
 0x211   : > { %v2496_v50 = vpop.f32.mrf.mxu0 }
 0x213   : > { %v3130_v52 = vpop.f32.mrf.mxu0 }
 0x215   : > { %v2497_v54 = vpop.f32.mrf.mxu0 }
 0x217   : > { %v3132_v56 = vpop.f32.mrf.mxu0 }
 0x219   : > { %v2500_v58 = vpop.f32.mrf.mxu0 }
 0x21a   : > { %v1046_v2 = vadd.f32 %v2500_v58, %v3062_v4  ;;  %v3163_v58 = vadd.f32 %v3157_v34, %v1317_v45  ;;  %v977_v45 = vadd.f32 %v3062_v4, %v976_v31 }
 0x21b   : > { %v1037_v61 = vpop.f32.mrf.mxu0 }
 0x21c   : > { %v1038_v13 = vadd.f32 %v3062_v4, %v1037_v61  ;;  %3683 = vst [vmem:[#allocation6_spill] sm:$0xff] %v3163_v58  ;;  %v3166_v61 = vadd.f32 %v2553_v47, %v3157_v34 }
 0x21d   : > { %v2501_v0 = vpop.f32.mrf.mxu0 }
 0x21e   : > { %v1049_v3 = vadd.f32 %v2501_v0, %v3062_v4  ;;  %v3171_v0 = vpop.f32.mrf.mxu1 }
 0x21f   : > { %v1040_v6 = vpop.f32.mrf.mxu0 }
 0x220   : > { %v1195_v15 = vpack.c.bf16 %v1049_v3, %v1046_v2  ;;  %v1041_v16 = vadd.f32 %v3062_v4, %v1040_v6  ;;  %v3174_v2 = vadd.f32 %v2556_v51, %v3157_v34  ;;  %v3177_v3 = vadd.f32 %v3157_v34, %v1333_v53  ;;  %v3190_v51 = vpop.f32.mrf.mxu1 }
 0x221   : > { %v2504_v32 = vpop.f32.mrf.mxu0  ;;  %v3188_v6 = vadd.f32 %v3157_v34, %v1336_v57  ;;  %v1033_v53 = vadd.f32 %v2497_v54, %v3062_v4  ;;  %v1030_v54 = vadd.f32 %v2496_v50, %v3062_v4 }
 0x222   : > { %v1194_v33 = vpack.c.bf16 %v1041_v16, %v1038_v13  ;;  %2336 = vmatprep.subr.bf16.mxu0 %v1195_v15  ;;  %v3194_v13 = vadd.f32 %v2504_v32, %v3062_v4  ;;  %v974_v15 = vadd.f32 %v3062_v4, %v3104_v29 }
 0x223   : > { %v1053_v28 = vpop.f32.mrf.mxu0  ;;  %2337 = vmatpush3.bf16.xpose.msra.mxu0 %v1187_v19  ;;  %v3205_v19 = vpop.f32.mrf.mxu1  ;;  %v1193_v31 = vpack.c.bf16 %v1033_v53, %v1030_v54 }
 0x224   : > { %2338 = vmatprep.subr.bf16.mxu0 %v1194_v33  ;;  %3685 = vst [vmem:[#allocation8_spill] sm:$0xff] %v3194_v13  ;;  %v3209_v32 = vadd.f32 %v3062_v4, %v1053_v28  ;;  %v1186_v49 = vpack.c.bf16 %v977_v45, %v974_v15  ;;  %v969_v28 = vadd.f32 %v3100_v26, %v3062_v4 }
 0x225   : > { %v2505_v5 = vpop.f32.mrf.mxu0  ;;  %v3216_v29 = vpop.f32.mrf.mxu1  ;;  %v1025_v45 = vadd.f32 %v3062_v4, %v3132_v56  ;;  %v1022_v26 = vadd.f32 %v3062_v4, %v3130_v52  ;;  %v961_v52 = vadd.f32 %v3062_v4, %v3102_v27  ;;  %v1009_v13 = vadd.f32 %v3062_v4, %v3128_v48 }
 0x226   : > { %v3197_v55 = vadd.f32 %v2505_v5, %v3062_v4  ;;  %3687 = vst [vmem:[#allocation10_spill] sm:$0xff] %v3209_v32 }
 0x227   : > { %v1056_v16 = vpop.f32.mrf.mxu0  ;;  %v3220_v50 = vpop.f32.mrf.mxu1 }
 0x228   : > { %3686 = vst [vmem:[#allocation9_spill] sm:$0xff] %v3197_v55  ;;  %v3214_v5 = vadd.f32 %v3062_v4, %v1056_v16 }
 0x229   : > { %v2508_v47 = vpop.f32.mrf.mxu0  ;;  %v3224_v43 = vpop.f32.mrf.mxu1 }
 0x22a   : > { %3688 = vst [vmem:[#allocation11_spill] sm:$0xff] %v3214_v5  ;;  %v3229_v15 = vadd.f32 %v2508_v47, %v3062_v4 }
 0x22b   : > { %v1069_v14 = vpop.f32.mrf.mxu0  ;;  %2339 = vmatpush3.bf16.xpose.msra.mxu0 %v1186_v49  ;;  %v966_v49 = vadd.f32 %v3094_v23, %v3062_v4  ;;  %v1192_v23 = vpack.c.bf16 %v1025_v45, %v1022_v26  ;;  %v958_v45 = vadd.f32 %v3062_v4, %v3098_v25 }
 0x22c   : > { %2340 = vmatprep.subr.bf16.mxu0 %v1193_v31  ;;  %3689 = vst [vmem:[#allocation12_spill] sm:$0xff] %v3229_v15  ;;  %v3236_v31 = vpop.f32.mrf.mxu1  ;;  %v3241_v54 = vadd.f32 %v3062_v4, %v1069_v14 }
 0x22d   : > { %v2509_v33 = vpop.f32.mrf.mxu0 }
 0x22e   : > { %v3232_v53 = vadd.f32 %v2509_v33, %v3062_v4  ;;  %3691 = vst [vmem:[#allocation14_spill] sm:$0xff] %v3241_v54  ;;  %v1185_v33 = vpack.c.bf16 %v969_v28, %v966_v49  ;;  %v3250_v11 = vpop.f32.mrf.mxu1  ;;  %v1017_v49 = vadd.f32 %v3126_v46, %v3062_v4 }
 0x22f   : > { %v1072_v16 = vpop.f32.mrf.mxu0 }
 0x230   : > { %3690 = vst [vmem:[#allocation13_spill] sm:$0xff] %v3232_v53  ;;  %v3246_v47 = vadd.f32 %v3062_v4, %v1072_v16  ;;  %v3256_v14 = vpop.f32.mrf.mxu1 }
 0x231   : > { %v3248_v57 = vpop.f32.mrf.mxu0 }
 0x232   : > { %3692 = vst [vmem:[#allocation15_spill] sm:$0xff] %v3246_v47  ;;  %v3262_v28 = vpop.f32.mrf.mxu1 }
 0x233   : > { %v3254_v24 = vpop.f32.mrf.mxu0  ;;  %2341 = vmatpush3.bf16.xpose.msra.mxu0 %v1185_v33  ;;  %v1014_v33 = vadd.f32 %v3120_v41, %v3062_v4 }
 0x234   : > { %2342 = vmatprep.subr.bf16.mxu0 %v1192_v23  ;;  %v3270_v39 = vpop.f32.mrf.mxu1  ;;  %v1184_v23 = vpack.c.bf16 %v961_v52, %v958_v45 }
 0x235   : > { %v3260_v16 = vpop.f32.mrf.mxu0  ;;  %v1191_v21 = vpack.c.bf16 %v1017_v49, %v1014_v33  ;;  %v1006_v49 = vadd.f32 %v3062_v4, %v3124_v44 }
 0x236   : > { %v3276_v27 = vpop.f32.mrf.mxu1 }
 0x237   : > { %v3268_v26 = vpop.f32.mrf.mxu0 }
 0x238   : > { %v3280_v46 = vpop.f32.mrf.mxu1 }
 0x239   : > { %v3274_v56 = vpop.f32.mrf.mxu0 }
 0x23a   : > { %v3284_v5 = vpop.f32.mrf.mxu1 }
 0x23b   : > { %v3278_v32 = vpop.f32.mrf.mxu0  ;;  %2343 = vmatpush3.bf16.xpose.msra.mxu0 %v1184_v23  ;;  %v1190_v23 = vpack.c.bf16 %v1009_v13, %v1006_v49 }
 0x23c   : > { %2344 = vmatprep.subr.bf16.mxu0 %v1191_v21  ;;  %v3290_v52 = vpop.f32.mrf.mxu1  ;;  %v3693_v21 = vpack.c.bf16 %v3084_v18, %v3081_v17 }
 0x23d   : > { %v3282_v25 = vpop.f32.mrf.mxu0 }
 0x23e   : > { %v2580_v33 = vpop.f32.mrf.mxu1 }
 0x23f   : > { %v3288_v41 = vpop.f32.mrf.mxu0 }
 0x240   : > { %v1429_v54 = vpop.f32.mrf.mxu1 }
 0x241   : > { %v2520_v45 = vpop.f32.mrf.mxu0 }
 0x242   : > { %v2581_v15 = vpop.f32.mrf.mxu1  ;;  %v3298_v48 = vadd.f32 %v2520_v45, %v3062_v4 }
 0x243   : > { %v1117_v55 = vpop.f32.mrf.mxu0  ;;  %2345 = vmatpush3.bf16.xpose.msra.mxu0 %v3693_v21  ;;  %v3699_v21 = vpack.c.bf16 %v3110_v36, %v3107_v35 }
 0x244   : > { %2346 = vmatprep.subr.bf16.mxu0 %v1190_v23  ;;  %3694 = vst [vmem:[#allocation16_spill] sm:$0xff] %v3298_v48  ;;  %v1432_v44 = vpop.f32.mrf.mxu1  ;;  %v3304_v63 = vadd.f32 %v3062_v4, %v1117_v55 }
 0x245   : > { %v2521_v47 = vpop.f32.mrf.mxu0 }
 0x246   : > { %v3301_v53 = vadd.f32 %v2521_v47, %v3062_v4  ;;  %3696 = vst [vmem:[#allocation18_spill] sm:$0xff] %v3304_v63  ;;  %v2584_v49 = vpop.f32.mrf.mxu1  ;;  %v3698_v47 = vpack.c.bf16 %v3092_v22, %v3087_v20  ;;  %v1441_v22 = vadd.f32 %v2581_v15, %v3157_v34 }
 0x247   : > { %v1120_v58 = vpop.f32.mrf.mxu0 }
 0x248   : > { %3695 = vst [vmem:[#allocation17_spill] sm:$0xff] %v3301_v53  ;;  %v3309_v17 = vadd.f32 %v3062_v4, %v1120_v58  ;;  %v1445_v55 = vpop.f32.mrf.mxu1  ;;  %v3324_v58 = vadd.f32 %v2584_v49, %v3157_v34 }
 0x249   : > { %v3311_v18 = vpop.f32.mrf.mxu0  ;;  %v3329_v53 = vadd.f32 %v3157_v34, %v1445_v55 }
 0x24a   : > { %3697 = vst [vmem:[#allocation19_spill] sm:$0xff] %v3309_v17  ;;  %3700 = vst [vmem:[#allocation20_spill] sm:$0xff] %v3324_v58  ;;  %v2585_v48 = vpop.f32.mrf.mxu1  ;;  %v3705_v17 = vpack.c.bf16 %v3118_v40, %v3113_v38 }
 0x24b   : > { %v3315_v23 = vpop.f32.mrf.mxu0  ;;  %2347 = vmatpush3.bf16.xpose.msra.mxu0 %v3698_v47  ;;  %3701 = vst [vmem:[#allocation21_spill] sm:$0xff] %v3329_v53  ;;  %v3332_v45 = vadd.f32 %v2585_v48, %v3157_v34  ;;  %v3704_v48 = vpack.c.bf16 %v3068_v8, %v3065_v7 }
 0x24c   : > { %2348 = vmatprep.subr.bf16.mxu0 %v3699_v21  ;;  %v1448_v20 = vpop.f32.mrf.mxu1 }
 0x24d   : > { %v3326_v13 = vpop.f32.mrf.mxu0  ;;  %3702 = vst [vmem:[#allocation22_spill] sm:$0xff] %v3332_v45  ;;  %v3339_v35 = vadd.f32 %v3157_v34, %v1448_v20  ;;  %v1438_v20 = vadd.f32 %v2580_v33, %v3157_v34 }
 0x24e   : > { %v2588_v49 = vpop.f32.mrf.mxu1 }
 0x24f   : > { %v3334_v63 = vpop.f32.mrf.mxu0  ;;  %3703 = vst [vmem:[#allocation23_spill] sm:$0xff] %v3339_v35  ;;  %v3356_v58 = vadd.f32 %v2588_v49, %v3157_v34  ;;  %v1587_v38 = vpack.c.bf16 %v1441_v22, %v1438_v20  ;;  %v1374_v22 = vadd.f32 %v3152_v30, %v3157_v34  ;;  %v1377_v20 = vadd.f32 %v3190_v51, %v3157_v34 }
 0x250   : > { %v1461_v21 = vpop.f32.mrf.mxu1  ;;  %v1433_v35 = vadd.f32 %v3157_v34, %v1432_v44  ;;  %v1113_v49 = vadd.f32 %v3282_v25, %v3062_v4  ;;  %v1366_v30 = vadd.f32 %v3157_v34, %v3171_v0  ;;  %v1369_v51 = vadd.f32 %v3157_v34, %v3205_v19 }
 0x251   : > { %v3341_v36 = vpop.f32.mrf.mxu0  ;;  %3706 = vst [vmem:[#allocation24_spill] sm:$0xff] %v3356_v58  ;;  %v3359_v53 = vadd.f32 %v3157_v34, %v1461_v21  ;;  %v1422_v25 = vadd.f32 %v3276_v27, %v3157_v34  ;;  %v1358_v27 = vadd.f32 %v3134_v59, %v3157_v34 }
 0x252   : > { %v2589_v47 = vpop.f32.mrf.mxu1 }
 0x253   : > { %v3345_v55 = vpop.f32.mrf.mxu0  ;;  %2349 = vmatpush3.bf16.xpose.msra.mxu0 %v3704_v48  ;;  %3707 = vst [vmem:[#allocation25_spill] sm:$0xff] %v3359_v53  ;;  %v3362_v7 = vadd.f32 %v2589_v47, %v3157_v34  ;;  %v3710_v47 = vpack.c.bf16 %v3076_v12, %v3071_v10 }
 0x254   : > { %2350 = vmatprep.subr.bf16.mxu0 %v3705_v17  ;;  %v1464_v48 = vpop.f32.mrf.mxu1 }
 0x255   : > { %v2529_v45 = vpop.f32.mrf.mxu0  ;;  %3708 = vst [vmem:[#allocation26_spill] sm:$0xff] %v3362_v7  ;;  %v3369_v15 = vadd.f32 %v3157_v34, %v1464_v48  ;;  %v1430_v48 = vadd.f32 %v3157_v34, %v1429_v54  ;;  %v1110_v54 = vadd.f32 %v3274_v56, %v3062_v4 }
 0x256   : > { %v3371_v17 = vpop.f32.mrf.mxu1 }
 0x257   : > { %v3364_v8 = vpop.f32.mrf.mxu0  ;;  %3709 = vst [vmem:[#allocation27_spill] sm:$0xff] %v3369_v15  ;;  %v1586_v7 = vpack.c.bf16 %v1433_v35, %v1430_v48  ;;  %v1203_v19 = vpack.c.bf16 %v1113_v49, %v1110_v54  ;;  %v1414_v35 = vadd.f32 %v3157_v34, %v3280_v46  ;;  %v1102_v48 = vadd.f32 %v3062_v4, %v3278_v32 }
 0x258   : > { %v3382_v40 = vpop.f32.mrf.mxu1  ;;  %v1353_v46 = vadd.f32 %v3157_v34, %v3148_v9 }
 0x259   : > { %v2532_v33 = vpop.f32.mrf.mxu0  ;;  %3711 = vst [vmem:[#allocation28_spill] sm:$0xff] %v3382_v40 }
 0x25a   : > { %v3388_v15 = vpop.f32.mrf.mxu1  ;;  %v1174_v10 = vadd.f32 %v2532_v33, %v3062_v4 }
 0x25b   : > { %v1165_v21 = vpop.f32.mrf.mxu0  ;;  %2351 = vmatpush3.bf16.xpose.msra.mxu0 %v3710_v47  ;;  %v1425_v47 = vadd.f32 %v3284_v5, %v3157_v34  ;;  %v1361_v5 = vadd.f32 %v3143_v1, %v3157_v34  ;;  %v1161_v1 = vadd.f32 %v2529_v45, %v3062_v4  ;;  %v1409_v45 = vadd.f32 %v3262_v28, %v3157_v34 }
 0x25c   : > { %2372 = vmatprep.subr.bf16.mxu0 %v1587_v38  ;;  %v1579_v38 = vpack.c.bf16 %v1377_v20, %v1374_v22  ;;  %v3402_v33 = vpop.f32.mrf.mxu1  ;;  %v1578_v22 = vpack.c.bf16 %v1369_v51, %v1366_v30  ;;  %v1105_v20 = vadd.f32 %v3062_v4, %v3288_v41  ;;  %v1158_v41 = vadd.f32 %v3341_v36, %v3062_v4 }
 0x25d   : > { %v2533_v53 = vpop.f32.mrf.mxu0  ;;  %v1585_v49 = vpack.c.bf16 %v1425_v47, %v1422_v25  ;;  %v1398_v36 = vadd.f32 %v3157_v34, %v3256_v14  ;;  %v1097_v28 = vadd.f32 %v3260_v16, %v3062_v4  ;;  %v1153_v25 = vadd.f32 %v3062_v4, %v3364_v8 }
 0x25e   : > { %v1177_v12 = vadd.f32 %v2533_v53, %v3062_v4  ;;  %v1166_v53 = vadd.f32 %v3062_v4, %v1165_v21  ;;  %v3406_v40 = vpop.f32.mrf.mxu1  ;;  %v1202_v30 = vpack.c.bf16 %v1105_v20, %v1102_v48  ;;  %v1209_v51 = vpack.c.bf16 %v1161_v1, %v1158_v41  ;;  %v3716_v1 = vld [vmem:[#allocation6_spill] sm:$0xff]  ;;  %v3719_v41 = vld [vmem:[#allocation12_spill] sm:$0xff] }
 0x25f   : > { %v1168_v44 = vpop.f32.mrf.mxu0  ;;  %v1094_v47 = vadd.f32 %v3248_v57, %v3062_v4  ;;  %v1150_v14 = vadd.f32 %v3062_v4, %v3345_v55  ;;  %v1393_v16 = vadd.f32 %v3224_v43, %v3157_v34  ;;  %v3712_v57 = vpack.c.bf16 %v3180_v42, %v3174_v2 }
 0x260   : > { %v1211_v58 = vpack.c.bf16 %v1177_v12, %v1174_v10  ;;  %v1169_v0 = vadd.f32 %v3062_v4, %v1168_v44  ;;  %v3413_v21 = vpop.f32.mrf.mxu1  ;;  %v1350_v10 = vadd.f32 %v3157_v34, %v3140_v62  ;;  %v1577_v12 = vpack.c.bf16 %v1361_v5, %v1358_v27 }
 0x261   : > { %v1208_v8 = vpack.c.bf16 %v1153_v25, %v1150_v14  ;;  %v1385_v43 = vadd.f32 %v3157_v34, %v3236_v31  ;;  %v1089_v5 = vadd.f32 %v3062_v4, %v3268_v26  ;;  %v1086_v2 = vadd.f32 %v3062_v4, %v3254_v24  ;;  %v3731_v25 = vld [vmem:[#allocation18_spill] sm:$0xff] }
 0x262   : > { %v1210_v56 = vpack.c.bf16 %v1169_v0, %v1166_v53  ;;  %2354 = vmatprep.subr.bf16.mxu1 %v1211_v58  ;;  %2353 = vmatmul.mubr.bf16.vlgmr.msra.gmra.mxu0 %v3136_v60  ;;  %v1417_v58 = vadd.f32 %v3157_v34, %v3290_v52  ;;  %v3421_v59 = vpop.f32.mrf.mxu1  ;;  %v1576_v9 = vpack.c.bf16 %v1353_v46, %v1350_v10  ;;  %v3718_v46 = vld [vmem:[#allocation13_spill] sm:$0xff] }
 0x263   : > { %2355 = vmatpush3.bf16.xpose.msra.mxu1 %v1203_v19  ;;  %2373 = vmatpush3.bf16.msra.mxu0 %v1579_v38  ;;  %v1201_v19 = vpack.c.bf16 %v1097_v28, %v1094_v47  ;;  %v3713_v42 = vpack.c.bf16 %v3188_v6, %v3177_v3  ;;  %v1142_v31 = vadd.f32 %v3311_v18, %v3062_v4  ;;  %v3715_v6 = vld [vmem:[#allocation7_spill] sm:$0xff] }
 0x264   : > { %2356 = vmatprep.subr.bf16.mxu1 %v1210_v56  ;;  %2374 = vmatprep.subr.bf16.mxu0 %v1586_v7  ;;  %v3430_v52 = vpop.f32.mrf.mxu1  ;;  %v1406_v7 = vadd.f32 %v3250_v11, %v3157_v34  ;;  %v1584_v32 = vpack.c.bf16 %v1417_v58, %v1414_v35  ;;  %v1401_v11 = vadd.f32 %v3157_v34, %v3270_v39  ;;  %v3730_v28 = vld [vmem:[#allocation19_spill] sm:$0xff] }
 0x265   : > { %v1390_v39 = vadd.f32 %v3216_v29, %v3157_v34  ;;  %v1382_v29 = vadd.f32 %v3157_v34, %v3220_v50  ;;  %v1145_v35 = vadd.f32 %v3326_v13, %v3062_v4  ;;  %v1200_v58 = vpack.c.bf16 %v1089_v5, %v1086_v2 }
 0x266   : > { %v3438_v62 = vpop.f32.mrf.mxu1  ;;  %v1583_v44 = vpack.c.bf16 %v1409_v45, %v1406_v7  ;;  %v1582_v0 = vpack.c.bf16 %v1401_v11, %v1398_v36  ;;  %v3714_v13 = vpack.c.bf16 %v3166_v61, %v3160_v37  ;;  %v1137_v3 = vadd.f32 %v3062_v4, %v3334_v63  ;;  %v3721_v45 = vld [vmem:[#allocation15_spill] sm:$0xff]  ;;  %v3724_v63 = vld [vmem:[#allocation17_spill] sm:$0xff] }
 0x267   : > { %2375 = vmatpush3.bf16.msra.mxu0 %v1578_v22  ;;  %v1581_v55 = vpack.c.bf16 %v1393_v16, %v1390_v39  ;;  %v1207_v20 = vpack.c.bf16 %v1145_v35, %v1142_v31  ;;  %v3717_v48 = vpack.c.bf16 %v3715_v6, %v3716_v1  ;;  %v1134_v18 = vadd.f32 %v3062_v4, %v3315_v23  ;;  %v3727_v4 = vld [vmem:[#allocation9_spill] sm:$0xff]  ;;  %v3728_v23 = vld [vmem:[#allocation8_spill] sm:$0xff] }
 0x268   : > { %2376 = vmatprep.subr.bf16.mxu0 %v1585_v49  ;;  %v3440_v54 = vpop.f32.mrf.mxu1  ;;  %v1580_v49 = vpack.c.bf16 %v1385_v43, %v1382_v29  ;;  %v3720_v7 = vpack.c.bf16 %v3718_v46, %v3719_v41  ;;  %v3729_v11 = vpack.c.bf16 %v3727_v4, %v3728_v23  ;;  %v3732_v47 = vpack.c.bf16 %v3730_v28, %v3731_v25  ;;  %v3738_v46 = vld [vmem:[#allocation24_spill] sm:$0xff] }
 0x269   : > { %v1502_v29 = vadd.f32 %v3406_v40, %v3157_v34  ;;  %v1494_v35 = vadd.f32 %v3157_v34, %v3413_v21 }
 0x26a   : > { %v3448_v38 = vpop.f32.mrf.mxu1 }
 0x26b   : > { %2357 = vmatpush3.bf16.xpose.msra.mxu1 %v1202_v30  ;;  %2377 = vmatpush3.bf16.msra.mxu0 %v1577_v12  ;;  %v1206_v12 = vpack.c.bf16 %v1137_v3, %v1134_v18 }
 0x26c   : > { %2358 = vmatprep.subr.bf16.mxu1 %v1209_v51  ;;  %2378 = vmatprep.subr.bf16.mxu0 %v1584_v32  ;;  %v3454_v53 = vpop.f32.mrf.mxu1  ;;  %v3722_v32 = vld [vmem:[#allocation14_spill] sm:$0xff]  ;;  %v3725_v51 = vld [vmem:[#allocation16_spill] sm:$0xff] }
 0x26d   : > { %v3723_v30 = vpack.c.bf16 %v3721_v45, %v3722_v32  ;;  %v3743_v45 = vld [vmem:[#allocation22_spill] sm:$0xff]  ;;  %v3744_v32 = vld [vmem:[#allocation20_spill] sm:$0xff] }
 0x26e   : > { %v3462_v56 = vpop.f32.mrf.mxu1 }
 0x26f   : > { %2379 = vmatpush3.bf16.msra.mxu0 %v1576_v9  ;;  %v3726_v9 = vpack.c.bf16 %v3724_v63, %v3725_v51  ;;  %v3746_v63 = vld [vmem:[#allocation23_spill] sm:$0xff]  ;;  %v3747_v51 = vld [vmem:[#allocation21_spill] sm:$0xff] }
 0x270   : > { %2380 = vmatprep.subr.bf16.mxu0 %v1583_v44  ;;  %v3467_v27 = vpop.f32.mrf.mxu1 }
 0x272   : > { %v2605_v22 = vpop.f32.mrf.mxu1 }
 0x273   : > { %2359 = vmatpush3.bf16.xpose.msra.mxu1 %v1201_v19  ;;  %2381 = vmatpush3.bf16.msra.mxu0 %v3712_v57  ;;  %v3733_v19 = vld [vmem:[#allocation11_spill] sm:$0xff] }
 0x274   : > { %2360 = vmatprep.subr.bf16.mxu1 %v1208_v8  ;;  %2382 = vmatprep.subr.bf16.mxu0 %v1582_v0  ;;  %v3482_v50 = vpop.f32.mrf.mxu1  ;;  %v3734_v8 = vld [vmem:[#allocation10_spill] sm:$0xff] }
 0x275   : > { %v3735_v57 = vpack.c.bf16 %v3733_v19, %v3734_v8 }
 0x276   : > { %v2608_v26 = vpop.f32.mrf.mxu1 }
 0x277   : > { %2383 = vmatpush3.bf16.msra.mxu0 %v3713_v42  ;;  %v1497_v42 = vadd.f32 %v3157_v34, %v3430_v52  ;;  %v1550_v31 = vadd.f32 %v2608_v26, %v3157_v34  ;;  %v3736_v26 = vld [vmem:[#allocation28_spill] sm:$0xff] }
 0x278   : > { %2384 = vmatprep.subr.bf16.mxu0 %v1581_v55  ;;  %v1541_v24 = vpop.f32.mrf.mxu1  ;;  %v1505_v55 = vadd.f32 %v3421_v59, %v3157_v34  ;;  %v1486_v59 = vadd.f32 %v3371_v17, %v3157_v34  ;;  %v1478_v3 = vadd.f32 %v3157_v34, %v3736_v26  ;;  %v1534_v17 = vadd.f32 %v3462_v56, %v3157_v34 }
 0x279   : > { %v1542_v21 = vadd.f32 %v3157_v34, %v1541_v24  ;;  %v1521_v56 = vadd.f32 %v3448_v38, %v3157_v34 }
 0x27a   : > { %v2609_v10 = vpop.f32.mrf.mxu1  ;;  %v1595_v2 = vpack.c.bf16 %v1505_v55, %v1502_v29 }
 0x27b   : > { %2361 = vmatpush3.bf16.xpose.msra.mxu1 %v1200_v58  ;;  %2385 = vmatpush3.bf16.msra.mxu0 %v3714_v13  ;;  %v1489_v58 = vadd.f32 %v3388_v15, %v3157_v34  ;;  %v1537_v15 = vadd.f32 %v2605_v22, %v3157_v34 }
 0x27c   : > { %2362 = vmatprep.subr.bf16.mxu1 %v1207_v20  ;;  %2386 = vmatprep.subr.bf16.mxu0 %v1580_v49  ;;  %v1544_v37 = vpop.f32.mrf.mxu1  ;;  %v1553_v49 = vadd.f32 %v2609_v10, %v3157_v34  ;;  %v1594_v20 = vpack.c.bf16 %v1497_v42, %v1494_v35  ;;  %v1529_v10 = vadd.f32 %v3157_v34, %v3482_v50 }
 0x27d   : > { %v1545_v52 = vadd.f32 %v3157_v34, %v1544_v37  ;;  %v1593_v6 = vpack.c.bf16 %v1489_v58, %v1486_v59  ;;  %v1599_v18 = vpack.c.bf16 %v1537_v15, %v1534_v17  ;;  %v1513_v50 = vadd.f32 %v3157_v34, %v3454_v53  ;;  %v3740_v37 = vld [vmem:[#allocation27_spill] sm:$0xff] }
 0x27e   : > { %v2612_v61 = vpop.f32.mrf.mxu1  ;;  %v1601_v13 = vpack.c.bf16 %v1553_v49, %v1550_v31  ;;  %v1687_v53 = vlaneseq  ;;  %v2836_v31 = vmov 0   ;;  %v1706_v49 = vld [vmem:[#allocation3] sm:$0xff] }
 0x27f   : > { %2387 = vmatpush3.bf16.msra.mxu0 %v3717_v48  ;;  %v1566_v14 = vadd.f32 %v2612_v61, %v3157_v34  ;;  %v1600_v1 = vpack.c.bf16 %v1545_v52, %v1542_v21  ;;  %v1526_v48 = vadd.f32 %v3157_v34, %v3467_v27  ;;  %v1510_v27 = vadd.f32 %v3157_v34, %v3440_v54 }
 0x280   : > { %v1557_v36 = vpop.f32.mrf.mxu1  ;;  %v3748_v54 = vpack.c.bf16 %v3746_v63, %v3747_v51  ;;  %v3566_v4 = vand.u32 127, %v1687_v53  ;;  %2710 = vset.pattern.permute.xlu0 %v2836_v31  ;;  %2711 = vset.pattern.permute.xlu1 %v2836_v31  ;;  %v1743_v63 = vld [vmem:[#allocation5] sm:$0xff] }
 0x281   : > { %v1558_v43 = vadd.f32 %v3157_v34, %v1557_v36  ;;  %v1598_v22 = vpack.c.bf16 %v1529_v10, %v1526_v48  ;;  %v1596_v38 = vpack.c.bf16 %v1513_v50, %v1510_v27 }
 0x282   : > { %v2613_v44 = vpop.f32.mrf.mxu1  ;;  %v1689_v23 = vadd.s32 128, %v3566_v4  ;;  %v1690_v28 = vadd.s32 256, %v3566_v4  ;;  %v1691_v25 = vadd.s32 384, %v3566_v4 }
 0x283   : > { %2363 = vmatpush3.bf16.xpose.msra.mxu1 %v3720_v7  ;;  %v1569_v39 = vadd.f32 %v2613_v44, %v3157_v34 }
 0x284   : > { %2364 = vmatprep.subr.bf16.mxu1 %v1206_v12  ;;  %v1560_v0 = vpop.f32.mrf.mxu1  ;;  %v3737_v12 = vld [vmem:[#allocation26_spill] sm:$0xff] }
 0x285   : > { %v1603_v16 = vpack.c.bf16 %v1569_v39, %v1566_v14  ;;  %v1561_v5 = vadd.f32 %v3157_v34, %v1560_v0  ;;  %v3739_v41 = vpack.c.bf16 %v3737_v12, %v3738_v46 }
 0x287   : > { %v1602_v40 = vpack.c.bf16 %v1561_v5, %v1558_v43 }
 0x28b   : > { %2365 = vmatpush3.bf16.xpose.msra.mxu1 %v3723_v30  ;;  %v3745_v30 = vpack.c.bf16 %v3743_v45, %v3744_v32 }
 0x28c   : > { %2366 = vmatprep.subr.bf16.mxu1 %v3726_v9 }
 0x293   : > { %2367 = vmatpush3.bf16.xpose.msra.mxu1 %v3729_v11  ;;  %v1693_v11 = vstv %s2224_s14 }
 0x294   : > { %2368 = vmatprep.subr.bf16.mxu1 %v3732_v47  ;;  %v1694_v47 = vadd.s32 %v1693_v11, %v3566_v4  ;;  %v1695_v14 = vadd.s32 %v1693_v11, %v1689_v23  ;;  %v1696_v39 = vadd.s32 %v1693_v11, %v1690_v28 }
 0x296   : > { %vm1698_vm2 = vcmp.lt.s32.totalorder %v1694_v47, 1344  ;;  %vm1699_vm3 = vcmp.lt.s32.totalorder %v1695_v14, 1344  ;;  %vm1700_vm4 = vcmp.lt.s32.totalorder %v1696_v39, 1344 }
 0x29b   : > { %2369 = vmatpush3.bf16.xpose.msra.mxu1 %v3735_v57 }
 0x29c   : > { %2394 = vmatprep.subr.bf16.mxu1 %v1603_v16  ;;  %v1697_v16 = vadd.s32 %v1693_v11, %v1691_v25 }
 0x29e   : > { %vm1701_vm5 = vcmp.lt.s32.totalorder %v1697_v16, 1344 }
 0x2a2   : > { %2371 = vmatmul.mubr.bf16.vlgmr.msra.gmra.mxu1 %v3136_v60  ;;  %v1481_v60 = vadd.f32 %v3157_v34, %v3402_v33  ;;  %v1518_v33 = vadd.f32 %v3438_v62, %v3157_v34  ;;  %v3741_v62 = vld [vmem:[#allocation25_spill] sm:$0xff] }
 0x2a3   : > { %2395 = vmatpush3.bf16.msra.mxu1 %v1595_v2  ;;  %v3742_v61 = vpack.c.bf16 %v3740_v37, %v3741_v62 }
 0x2a4   : > { %2396 = vmatprep.subr.bf16.mxu1 %v1602_v40  ;;  %v1592_v24 = vpack.c.bf16 %v1481_v60, %v1478_v3  ;;  %v1597_v7 = vpack.c.bf16 %v1521_v56, %v1518_v33 }
 0x2a7   : > { %2397 = vmatpush3.bf16.msra.mxu1 %v1594_v20 }
 0x2a8   : > { %2398 = vmatprep.subr.bf16.mxu1 %v1601_v13 }
 0x2ab   : > { %2399 = vmatpush3.bf16.msra.mxu1 %v1593_v6 }
 0x2ac   : > { %2400 = vmatprep.subr.bf16.mxu1 %v1600_v1 }
 0x2af   : > { %2401 = vmatpush3.bf16.msra.mxu1 %v1592_v24 }
 0x2b0   : > { %2402 = vmatprep.subr.bf16.mxu1 %v1599_v18 }
 0x2b3   : > { %2403 = vmatpush3.bf16.msra.mxu1 %v3739_v41 }
 0x2b4   : > { %2404 = vmatprep.subr.bf16.mxu1 %v1598_v22 }
 0x2b7   : > { %2405 = vmatpush3.bf16.msra.mxu1 %v3742_v61 }
 0x2b8   : > { %2406 = vmatprep.subr.bf16.mxu1 %v1597_v7  ;;  %v1733_v7 = vld [vmem:[#allocation4] sm:$0xff] }
 0x2bb   : > { %2407 = vmatpush3.bf16.msra.mxu1 %v3745_v30 }
 0x2bc   : > { %2408 = vmatprep.subr.bf16.mxu1 %v1596_v38 }
 0x2bf   : > { %2409 = vmatpush3.bf16.msra.mxu1 %v3748_v54 }
 0x322   : > { %v1639_v9 = vpop.f32.mrf.mxu0 }
 0x323   : > { %v1702_v19 = vsel %vm1698_vm2, %v1639_v9, -1e+30 }
 0x324   : > { %v1641_v36 = vpop.f32.mrf.mxu0 }
 0x325   : > { %v1703_v8 = vsel %vm1699_vm3, %v1641_v36, -1e+30 }
 0x326   : > { %v1643_v44 = vpop.f32.mrf.mxu0  ;;  %v1707_v43 = vmax.f32 %v1702_v19, %v1703_v8 }
 0x328   : > { %v1644_v34 = vpop.f32.mrf.mxu0 }
 0x362   : > { %v1680_v0 = vpop.f32.mrf.mxu1 }
 0x363   : > { %v1704_v29 = vsel %vm1700_vm4, %v1680_v0, -1e+30 }
 0x364   : > { %v1682_v57 = vpop.f32.mrf.mxu1 }
 0x365   : > { %v1705_v55 = vsel %vm1701_vm5, %v1682_v57, -1e+30 }
 0x366   : > { %v1708_v5 = vmax.f32 %v1704_v29, %v1705_v55  ;;  %v1684_v35 = vpop.f32.mrf.mxu1 }
 0x368   : > { %v1709_v2 = vmax.f32 %v1707_v43, %v1708_v5  ;;  %v1685_v42 = vpop.f32.mrf.mxu1 }
 0x36a   : > { %1710 = vmax.xlane.f32.xlu0 %v1709_v2 }
 0x3f3   : > { %v1711_v40 = vpop.xlane.xlu0 %1710 }
 0x3f4   : > { %v1712_v59 = vmax.f32 %v1706_v49, %v1711_v40 }
 0x3f6   : > { %v1713_v58 = vsub.f32 %v1706_v49, %v1712_v59  ;;  %1836 = vst.msk [vmem:[#allocation3] sm:$0xff] %vm1741_vm6, %v1712_v59  ;;  %1718 = vperm.xlu0 %2710, %v1712_v59  }
 0x3f8   : > { %v1714_v41 = vmul.f32 1.442695, %v1713_v58 }
 0x471   : > { %v1719_v20 = vpop.permute.xlu0 %1718 }
 0x472   : > { %v1721_v21 = vsub.f32 %v1702_v19, %v1719_v20  ;;  %v1722_v13 = vsub.f32 %v1703_v8, %v1719_v20  ;;  %v1723_v52 = vsub.f32 %v1704_v29, %v1719_v20  ;;  %v1724_v26 = vsub.f32 %v1705_v55, %v1719_v20 }
 0x474   : > { %v1725_v3 = vmul.f32 1.442695, %v1721_v21  ;;  %v1727_v6 = vmul.f32 1.442695, %v1722_v13  ;;  %v1729_v60 = vmul.f32 1.442695, %v1723_v52 }
 0x475   : > { %v1731_v17 = vmul.f32 1.442695, %v1724_v26 }
 0x476   : > { %2760 = vpow2.f32 %v1725_v3 }
 0x477   : > { %2762 = vpow2.f32 %v1727_v6 }
 0x478   : > { %2764 = vpow2.f32 %v1729_v60 }
 0x479   : > { %2766 = vpow2.f32 %v1731_v17 }
 0x47a   : > { %2768 = vpow2.f32 %v1714_v41 }
 0x483   : > { %v2761_v15 = vpop.eup %2760 }
 0x484   : > { %v2763_v1 = vpop.eup %2762  ;;  %v1750_v24 = vpack.c.bf16 %v2761_v15, %v2761_v15 }
 0x485   : > { %v2765_v48 = vpop.eup %2764  ;;  %v1751_v18 = vpack.c.bf16 %v2763_v1, %v2763_v1  ;;  %v1735_v10 = vadd.f32 %v2763_v1, %v2761_v15 }
 0x486   : > { %v2767_v33 = vpop.eup %2766  ;;  %v1752_v56 = vpack.c.bf16 %v2765_v48, %v2765_v48 }
 0x487   : > { %1786 = vmatprep.mubr.bf16.mxu0 %v1751_v18  ;;  %v1753_v22 = vpack.c.bf16 %v2767_v33, %v2767_v33  ;;  %v1736_v12 = vadd.f32 %v2765_v48, %v1735_v10  ;;  %v2769_v27 = vpop.eup %2768 }
 0x488   : > { %1787 = vmatmul.mubr.bf16.vlgmr.msra.gmra.mxu0 %v1750_v24  ;;  %v1734_v50 = vmul.f32 %v2769_v27, %v1733_v7 }
 0x489   : > { %1826 = vmatprep.mubr.bf16.mxu1 %v1753_v22  ;;  %v1737_v46 = vadd.f32 %v2767_v33, %v1736_v12 }
 0x48a   : > { %1827 = vmatmul.mubr.bf16.vlgmr.msra.gmra.mxu1 %v1752_v56 }
 0x48b   : > { %1738 = vadd.xlane.f32.xlu1 %v1737_v46 }
 0x49c   : > { %1746 = vperm.xlu1 %2711, %v2769_v27  }
 0x514   : > { %v1739_v37 = vpop.xlane.xlu1 %1738 }
 0x515   : > { %v1740_v62 = vadd.f32 %v1739_v37, %v1734_v50 }
 0x517   : > { %1742 = vst.msk [vmem:[#allocation4] sm:$0xff] %vm1741_vm6, %v1740_v62 }
 0x518   : > { %v1747_v32 = vpop.permute.xlu1 %1746 }
 0x519   : > { %v1749_v34 = vmul.f32 %v1747_v32, %v1743_v63 }
 0x548   : > { %v2388_v61 = vpop.f32.mrf.mxu0 }
 0x54a   : > { %v2410_v38 = vpop.f32.mrf.mxu1  ;;  %v2389_v45 = vpop.f32.mrf.mxu0 }
 0x54b   : > { %v2390_v30 = vadd.f32 %v2389_v45, %v2388_v61 }
 0x54c   : > { %v2411_v51 = vpop.f32.mrf.mxu1  ;;  %v2391_v54 = vpop.f32.mrf.mxu0 }
 0x54d   : > { %v2412_v9 = vadd.f32 %v2411_v51, %v2410_v38 }
 0x54e   : > { %v2413_v36 = vpop.f32.mrf.mxu1  ;;  %v2392_v44 = vpop.f32.mrf.mxu0 }
 0x54f   : > { %v1829_v53 = vadd.f32 %v2412_v9, %v2390_v30  ;;  %1840 = sbr.rel (%p2225_p8) target bundleno = 1935 (0x78f), region = 76 }
 0x550   : > { %v2414_v23 = vpop.f32.mrf.mxu1 }
 0x551   : > { %v1834_v11 = vadd.f32 %v1829_v53, %v1749_v34 }
 0x553   : > { %1835 = vst [vmem:[#allocation5] sm:$0xff] %v1834_v11 }
 0x554   : > { %v1842_v28 = vld [vmem:[#allocation4] sm:$0xff]  ;;  %v2771_v25 = vld [vmem:[%s3656_s8 + $0x38] sm:$0xff]   ;;  %v2837_v47 = vmov 0   ;;  %v2838_v14 = vmov 0.0   ;;  %v2774_v0 = vld [vmem:[%s3656_s8 + $0x20] sm:$0xff]   ;;  %vm2839_vm7 = vmmov 0  }
 0x555   : > { %2770 = vset.pattern.permute.xlu0 %v2837_v47  ;;  %2787 = vrcp.f32 %v1842_v28  ;;  %2614 = vmatprep.subr.bf16.mxu0 %v2838_v14  ;;  %v2772_v39 = vld [vmem:[%s3656_s8 + $0x30] sm:$0xff]   ;;  %v2773_v16 = vld [vmem:[%s3656_s8 + $0x28] sm:$0xff]   ;;  %v2775_v8 = vld [vmem:[%s3656_s8 + $0x18] sm:$0xff]   ;;  %vm2075_vm8 = vcmp.ge.s32.totalorder %v3566_v4, 8  ;;  %vm2076_vm9 = vcmp.lt.s32.totalorder %v3566_v4, 12 }
 0x556   : > { %2615 = vmatpush3.bf16.msra.mxu0 %v2771_v25  ;;  %2634 = vmatprep.subr.bf16.mxu1 %v2838_v14  ;;  %v2779_v57 = vld [vmem:[%s3658_s10 + $0x38] sm:$0xff]   ;;  %v2780_v29 = vld [vmem:[%s3658_s10 + $0x30] sm:$0xff]   ;;  %v2781_v43 = vld [vmem:[%s3658_s10 + $0x28] sm:$0xff]  }
 0x557   : > { %2616 = vmatprep.subr.bf16.mxu0 %v2838_v14  ;;  %2630 = vmatprep.mubr.msk.bf16.mxu0 %vm2839_vm7, %v2838_v14  ;;  %v2776_v55 = vld [vmem:[%s3656_s8 + $0x10] sm:$0xff]   ;;  %v2777_v5 = vld [vmem:[%s3656_s8 + $0x8] sm:$0xff]   ;;  %v2782_v35 = vld [vmem:[%s3658_s10 + $0x20] sm:$0xff]  }
 0x558   : > { %2650 = vmatprep.mubr.msk.bf16.mxu1 %vm2839_vm7, %v2838_v14  ;;  %2635 = vmatpush3.bf16.msra.mxu1 %v2779_v57  ;;  %v2778_v2 = vld [vmem:[%s3656_s8] sm:$0xff]   ;;  %v2783_v42 = vld [vmem:[%s3658_s10 + $0x18] sm:$0xff]   ;;  %v2784_v31 = vld [vmem:[%s3658_s10 + $0x10] sm:$0xff]  }
 0x559   : > { %2636 = vmatprep.subr.bf16.mxu1 %v2838_v14  ;;  %v2785_v20 = vld [vmem:[%s3658_s10 + $0x8] sm:$0xff]   ;;  %v2786_v21 = vld [vmem:[%s3658_s10] sm:$0xff]   ;;  %vm2077_vm10 = vmand %vm2075_vm8, %vm2076_vm9 }
 0x55a   : > { %2617 = vmatpush3.bf16.msra.mxu0 %v2772_v39  ;;  %v1841_v49 = vld [vmem:[#allocation5] sm:$0xff]  ;;  %v2226_v13 = vld [vmem:[%s3657_s9] ss:$0 sm:$0xff] }
 0x55b   : > { %2618 = vmatprep.subr.bf16.mxu0 %v2838_v14  ;;  %v2235_v1 = vld [vmem:[%s3659_s11] ss:$0 sm:$0xff] }
 0x55c   : > { %2637 = vmatpush3.bf16.msra.mxu1 %v2780_v29 }
 0x55d   : > { %2638 = vmatprep.subr.bf16.mxu1 %v2838_v14 }
 0x55e   : > { %2619 = vmatpush3.bf16.msra.mxu0 %v2773_v16 }
 0x55f   : > { %2620 = vmatprep.subr.bf16.mxu0 %v2838_v14 }
 0x560   : > { %2639 = vmatpush3.bf16.msra.mxu1 %v2781_v43 }
 0x561   : > { %2640 = vmatprep.subr.bf16.mxu1 %v2838_v14 }
 0x562   : > { %v2788_v19 = vpop.eup %2787  ;;  %2621 = vmatpush3.bf16.msra.mxu0 %v2774_v0 }
 0x563   : > { %1846 = vperm.xlu0 %2770, %v2788_v19   ;;  %2622 = vmatprep.subr.bf16.mxu0 %v2838_v14 }
 0x564   : > { %2641 = vmatpush3.bf16.msra.mxu1 %v2782_v35 }
 0x565   : > { %2642 = vmatprep.subr.bf16.mxu1 %v2838_v14 }
 0x566   : > { %2623 = vmatpush3.bf16.msra.mxu0 %v2775_v8 }
 0x567   : > { %2624 = vmatprep.subr.bf16.mxu0 %v2838_v14 }
 0x568   : > { %2643 = vmatpush3.bf16.msra.mxu1 %v2783_v42 }
 0x569   : > { %2644 = vmatprep.subr.bf16.mxu1 %v2838_v14 }
 0x56a   : > { %2625 = vmatpush3.bf16.msra.mxu0 %v2776_v55 }
 0x56b   : > { %2626 = vmatprep.subr.bf16.mxu0 %v2838_v14 }
 0x56c   : > { %2645 = vmatpush3.bf16.msra.mxu1 %v2784_v31 }
 0x56d   : > { %2646 = vmatprep.subr.bf16.mxu1 %v2838_v14 }
 0x56e   : > { %2627 = vmatpush3.bf16.msra.mxu0 %v2777_v5 }
 0x56f   : > { %2628 = vmatprep.subr.bf16.mxu0 %v2838_v14 }
 0x570   : > { %2647 = vmatpush3.bf16.msra.mxu1 %v2785_v20 }
 0x571   : > { %2648 = vmatprep.subr.bf16.mxu1 %v2838_v14 }
 0x572   : > { %2629 = vmatpush3.bf16.msra.mxu0 %v2778_v2 }
 0x574   : > { %2649 = vmatpush3.bf16.msra.mxu1 %v2786_v21 }
 0x5de   : > { %v1847_v40 = vpop.permute.xlu0 %1846 }
 0x5df   : > { %v1849_v59 = vmul.f32 %v1847_v40, %v1841_v49 }
 0x5e1   : > { %v1850_v58 = vpack.c.bf16 %v1849_v59, %v1849_v59 }
 0x5e3   : > { %2631 = vmatmul.mubr.bf16.vlgmr.msra.gmra.mxu0 %v1850_v58 }
 0x6a3   : > { %v1956_v52 = vpop.f32.mrf.mxu0 }
 0x6a4   : > { %v1957_v26 = vadd.f32 %v2226_v13, %v1956_v52 }
 0x6a5   : > { %v2632_v3 = vpop.f32.mrf.mxu0 }
 0x6a6   : > { %v1962_v6 = vmax.f32 %v1957_v26, 0.0 }
 0x6a7   : > { %v1959_v60 = vpop.f32.mrf.mxu0 }
 0x6a8   : > { %v1963_v17 = vpack.c.bf16 %v1962_v6, %v1962_v6 }
 0x6a9   : > { %v2633_v15 = vpop.f32.mrf.mxu0 }
 0x6aa   : > { %2651 = vmatmul.mubr.bf16.vlgmr.msra.gmra.mxu1 %v1963_v17 }
 0x76a   : > { %v2069_v24 = vpop.f32.mrf.mxu1 }
 0x76b   : > { %v2070_v48 = vadd.f32 %v2235_v1, %v2069_v24 }
 0x76c   : > { %v2652_v18 = vpop.f32.mrf.mxu1 }
 0x76d   : > { %v2244_v10 = vmul.f32 -1.442695, %v2070_v48 }
 0x76e   : > { %v2072_v33 = vpop.f32.mrf.mxu1 }
 0x76f   : > { %2789 = vpow2.f32 %v2244_v10 }
 0x770   : > { %v2653_v56 = vpop.f32.mrf.mxu1 }
 0x77c   : > { %v2790_v22 = vpop.eup %2789 }
 0x77d   : > { %v2081_v12 = vadd.f32 1.0, %v2790_v22 }
 0x77f   : > { %2791 = vrcp.f32 %v2081_v12 }
 0x78c   : > { %v2792_v46 = vpop.eup %2791 }
 0x78d   : > { %v2084_v41 = vsel %vm2077_vm10, %v2792_v46, %v2070_v48 }
 0x78e   : > { %2085 = vst [vmem:[%s2941_s15] sm:$0xff] %v2084_v41 }
 0x78f PF: > { %s22_s25 = sadd.s32 1, %s2831_s25   ;;  %s3749_s21 = smov %s2823_s23 }
 0x790   : > { %p19_p9 = scmp.ge.s32.totalorder %s22_s25, 8   ;;  %s3750_s22 = smov %s2827_s24 }
 0x791   : > { %s3751_s23 = smov %s3754_s26  ;;  %s3752_s24 = smov %s3758_s27 }
 0x792   :  { %21 = sbr.rel (!%p19_p9) target bundleno = 3 (0x3), region = 106 }

</bundles_post_ra>
